<compile_context>
chip_gen: v7x
topology: tpu7x:2x2x1
jax: 0.10.0
libtpu: 0.0.40
codegen_flags: <defaults>
</compile_context>

<pallas_src>
import functools
import math

import jax
import jax.numpy as jnp
from jax.experimental import pallas as pl
from jax.experimental.pallas import tpu as pltpu


# 3x3 tap offsets, row-major, matching an HWIO (3,3,Cin,Cout) weight layout.
_TAPS = tuple((ky, kx) for ky in (-1, 0, 1) for kx in (-1, 0, 1))


def _round8(n):
    return -(-n // 8) * 8


def _tap_masks(n_lanes, H, W):
    """Packed (8, n_lanes) f32 mask, one row per NON-centre tap (in _TAPS order).

    Lane p encodes (image, y, x) as p = img*H*W + y*W + x; the masks also stop
    leakage across image / frame boundaries introduced by the circular roll,
    because every geometrically valid 3x3 tap stays inside its own H*W block.
    """
    HW = H * W
    p = jnp.arange(n_lanes, dtype=jnp.int32)
    q = p % HW
    yy, xx = q // W, q % W
    rows = []
    for ky, kx in _TAPS:
        if ky == 0 and kx == 0:
            continue
        ok = (yy + ky >= 0) & (yy + ky < H) & (xx + kx >= 0) & (xx + kx < W)
        rows.append(ok.astype(jnp.float32))
    return jnp.stack(rows, axis=0)


def _im2col(x, masks, *, W, constant_planes=False):
    """3x3 'SAME' im2col stack of x in channels-in-sublane / spatial-in-lane layout.

    x: (Cin, N) value; masks: (8, N) packed non-centre tap masks.
    Returns (9*Cin, N), taps stacked along sublanes (tap-major, channel-minor),
    matching the wrapper-side weight packing in `_pack_conv`.
    `constant_planes=True` skips the rolls (valid for per-image-constant planes
    such as the broadcast action one-hot).
    NOTE: the circular roll + geometric mask scheme is only valid for a 3x3
    'SAME' conv on a lane-dense layout (|tap offset| < H*W, no padding lanes).
    """
    n = x.shape[1]
    parts = []
    r = 0
    for ky, kx in _TAPS:
        off = ky * W + kx
        if off == 0:
            parts.append(x)
        else:
            xs = x if constant_planes else pltpu.roll(x, (-off) % n, 1)
            parts.append(xs * masks[r:r + 1, :])   # implicit (1,N) broadcast
            r += 1
    return jnp.concatenate(parts, axis=0)


def _ssm_fused_kernel(frames_ref, act_ref, sel_ref, pool_ref, mask_ref,
                      we1, be1, we2, be2,
                      wi, bi,
                      wp, bp,
                      wt1, bt1,
                      wt2, bt2,
                      wd1, bd1,
                      wd2, bd2,
                      wrw, brw,
                      img_ref, rew_ref, *, H, W, B):
    HW = H * W
    N = B * HW                       # lanes of a single-step tensor
    masks_f = mask_ref[...]          # (8, 3*N)  all 3 context frames
    masks_b = masks_f[:, :N]         # (8, N)    lane slice (multiple of 128)

    def conv(stacks, w_ref, b_ref, relu):
        # One MXU matmul per conv: taps + channel-concat segments are all in K.
        s = stacks[0] if len(stacks) == 1 else jnp.concatenate(stacks, axis=0)
        y = jnp.dot(w_ref[...], s, preferred_element_type=jnp.float32) + b_ref[...]
        return jnp.maximum(y, 0.0) if relu else y

    # ---- encoder, applied once to all 3 context frames (stacked along lanes)
    e = conv([_im2col(frames_ref[...], masks_f, W=W)], we1, be1, True)
    e = conv([_im2col(e, masks_f, W=W)], we2, be2, True)

    # ---- initial state module: build the im2col stack of `e` ONCE over all
    #      3*N lanes, then lane-slice it into the three frame segments
    #      (channel concat == K split of one matmul, nothing re-rolled).
    e_stack = _im2col(e, masks_f, W=W)                         # (9*Cenc, 3*N)
    state = conv([e_stack[:, 0:N],          # encoding of observation[:, -1]
                  e_stack[:, N:2 * N],      # encoding of observation[:, -2]
                  e_stack[:, 2 * N:3 * N]], # encoding of observation[:, -3]
                 wi, bi, True)

    # ---- action one-hot -> per-image-constant spatial planes via one matmul
    a_planes = jnp.dot(act_ref[...], sel_ref[...],
                       preferred_element_type=jnp.float32)     # (A_pad, N)

    # im2col stacks of `state` / action planes are shared by the prior conv
    # and the first state-transition conv (identical inputs, different weights).
    state_stack = _im2col(state, masks_b, W=W)
    act_stack = _im2col(a_planes, masks_b, W=W, constant_planes=True)

    # ---- prior module (dSSM_DET: sigma branch discarded, only mu computed)
    z = conv([state_stack, act_stack], wp, bp, False)          # _get_prior_dSSM_DET

    # ---- state transition
    h = conv([state_stack, act_stack, _im2col(z, masks_b, W=W)], wt1, bt1, True)
    next_state = conv([_im2col(h, masks_b, W=W)], wt2, bt2, True)

    # ---- decoder image head (use_vae=False -> ignores z) -> Bernoulli logits
    d = conv([_im2col(next_state, masks_b, W=W)], wd1, bd1, True)
    img = conv([_im2col(d, masks_b, W=W)], wd2, bd2, False)
    img_ref[...] = img.astype(img_ref.dtype)

    # ---- reward head: matmul mean-pool (K = N, good MXU shape) + tiny linear
    pooled = jnp.dot(next_state, pool_ref[...],
                     preferred_element_type=jnp.float32)       # (C_state, B)
    rew = jnp.dot(wrw[...], pooled, preferred_element_type=jnp.float32) + brw[...]
    rew_ref[...] = rew.astype(rew_ref.dtype)


def _pack_conv(w, b, splits=None):
    """HWIO (3,3,Cin,Cout) -> single (Cout, 9*sum(Cin_pad_i)) packed weight.

    splits: list of (cin_i, cin_pad_i) channel-concat segments; K is ordered
    segment-major, tap-major within segment, channel-minor within tap — exactly
    matching the in-kernel `_im2col` + segment `jnp.concatenate` ordering.
    """
    _, _, cin, cout = w.shape
    if splits is None:
        splits = [(cin, _round8(cin))]
    w9 = jnp.transpose(w, (0, 1, 3, 2)).reshape(9, cout, cin)   # (tap, Cout, Cin)
    segs, start = [], 0
    for cin_i, cin_pad in splits:
        ws = w9[:, :, start:start + cin_i]
        if cin_pad > cin_i:
            ws = jnp.pad(ws, ((0, 0), (0, 0), (0, cin_pad - cin_i)))
        segs.append(jnp.transpose(ws, (1, 0, 2)).reshape(cout, 9 * cin_pad))
        start += cin_i
    return jnp.concatenate(segs, axis=1), b.reshape(cout, 1)


@functools.partial(jax.jit, static_argnums=(3,))
def ssm_forward(params, obs_nchw, action, num_actions):
    """obs_nchw: (B, T, C, H, W) float32 (PyTorch layout), action: (B,) int32."""
    B, T, C, H, W = obs_nchw.shape
    HW = H * W
    N = B * HW
    NF = 3 * N
    assert T >= 3 and H >= 3 and W >= 3
    # Lane-dense layout: no padding lanes may exist for the roll+mask scheme.
    assert N % 128 == 0, "B*H*W must be a multiple of 128"

    C_enc = params['enc1'][0].shape[3]
    C_state = params['init_state'][0].shape[3]
    C_z = params['prior'][0].shape[3] // 2
    bits = params['rw_w'].shape[1]
    C_pad = _round8(C)
    A_pad = _round8(num_actions)

    # Last three context frames, channels-in-sublane / spatial-in-lane:
    # (C, frame, batch, H, W) -> (C_pad, 3*B*H*W), frame-major along lanes.
    # TODO(synk): in a rollout loop this stack/transpose should be hoisted
    # upstream (store observations channel-major) instead of per call.
    last3 = jnp.stack([obs_nchw[:, -1], obs_nchw[:, -2], obs_nchw[:, -3]], axis=0)
    frames = jnp.transpose(last3, (2, 0, 1, 3, 4)).reshape(C, NF)
    frames = jnp.pad(frames, ((0, C_pad - C), (0, 0)))

    # Action one-hot (channel rows padded to a sublane multiple).
    act_oh = jax.nn.one_hot(action, num_actions, dtype=jnp.float32).T   # (A, B)
    act_oh = jnp.pad(act_oh, ((0, A_pad - num_actions), (0, 0)))

    # Lane selector sel[b, p] = 1 iff lane p belongs to image b; pool = sel.T/HW
    # turns the per-image mean pool into one matmul.
    bidx = jnp.arange(N, dtype=jnp.int32) // HW
    sel = (bidx[None, :] == jnp.arange(B, dtype=jnp.int32)[:, None]).astype(jnp.float32)
    pool = sel.T * (1.0 / HW)

    masks = _tap_masks(NF, H, W)                       # (8, 3*N) packed masks

    # Pre-packed conv weights: taps + channel-concat segments folded into K.
    we1, be1 = _pack_conv(*params['enc1'], splits=[(C, C_pad)])
    we2, be2 = _pack_conv(*params['enc2'])
    wi, bi = _pack_conv(*params['init_state'], splits=[(C_enc, _round8(C_enc))] * 3)
    # dSSM_DET uses only mu_prior; the sigma half of the prior conv is dropped.
    wp, bp = _pack_conv(params['prior'][0][..., :C_z], params['prior'][1][:C_z],
                        splits=[(C_state, _round8(C_state)), (num_actions, A_pad)])
    wt1, bt1 = _pack_conv(*params['trans1'],
                          splits=[(C_state, _round8(C_state)),
                                  (num_actions, A_pad),
                                  (C_z, _round8(C_z))])
    wt2, bt2 = _pack_conv(*params['trans2'])
    wd1, bd1 = _pack_conv(*params['dec1'])
    wd2, bd2 = _pack_conv(*params['dec2'])
    wrw = params['rw_w'].T                             # (bits, C_state)
    brw = params['rw_b'].reshape(bits, 1)

    kernel_inputs = (frames, act_oh, sel, pool, masks,
                     we1, be1, we2, be2, wi, bi, wp, bp,
                     wt1, bt1, wt2, bt2, wd1, bd1, wd2, bd2, wrw, brw)

    # Advisory cost estimate for XLA's scheduler.
    conv_lanes = ((we1, NF), (we2, NF), (wi, N), (wp, N), (wt1, N), (wt2, N),
                  (wd1, N), (wd2, N))
    flops = 2 * sum(int(w.shape[0]) * int(w.shape[1]) * ln for w, ln in conv_lanes)
    flops += 2 * (C_state * N * B + bits * C_state * B)
    bytes_accessed = 4 * (sum(int(x.size) for x in kernel_inputs) + C * N + bits * B)

    # Single fused, grid-less pallas_call: all weights + activations stay
    # resident in VMEM (< a few MiB at this config).
    # TODO(synk): at realistic sizes add a 1-D "parallel" grid over a
    # lane-dense split of N (e.g. batch) so v7x's two TensorCores are both
    # used and per-step VMEM stays within 64 MiB.
    img_flat, rew_t = pl.pallas_call(
        functools.partial(_ssm_fused_kernel, H=H, W=W, B=B),
        out_shape=(jax.ShapeDtypeStruct((C, N), jnp.float32),
                   jax.ShapeDtypeStruct((bits, B), jnp.float32)),
        cost_estimate=pl.CostEstimate(flops=flops, transcendentals=0,
                                      bytes_accessed=bytes_accessed),
    )(*kernel_inputs)

    image_log_probs = img_flat.reshape(C, B, H, W).transpose(1, 0, 2, 3)  # NCHW
    reward_log_probs = rew_t.T                                            # (B, bits)
    # TODO(synk): get_numerical_reward() (Bernoulli sampling + data-dependent
    # Python loop) is not part of forward() and is not implemented as a kernel.
    return image_log_probs, reward_log_probs


# ----------------------------------------------------------------------------
# Pure-JAX reference (for correctness verification only)
# ----------------------------------------------------------------------------
def _ref_conv(x, w, b, *, relu):
    y = jax.lax.conv_general_dilated(
        x, w, window_strides=(1, 1), padding='SAME',
        dimension_numbers=('NCHW', 'HWIO', 'NCHW'),
        precision=jax.lax.Precision.HIGHEST)
    y = y + b[None, :, None, None]
    return jnp.maximum(y, 0.0) if relu else y


def ssm_forward_ref(params, obs, action, num_actions):
    B, T, C, H, W = obs.shape
    C_z = params['prior'][0].shape[3] // 2

    def enc(x):
        h = _ref_conv(x, *params['enc1'], relu=True)
        return _ref_conv(h, *params['enc2'], relu=True)

    e2, e1, e0 = enc(obs[:, -1]), enc(obs[:, -2]), enc(obs[:, -3])
    state = _ref_conv(jnp.concatenate([e2, e1, e0], axis=1),
                      *params['init_state'], relu=True)
    a_oh = jax.nn.one_hot(action, num_actions, dtype=jnp.float32)
    a_planes = jnp.broadcast_to(a_oh[:, :, None, None], (B, num_actions, H, W))
    prior_out = _ref_conv(jnp.concatenate([state, a_planes], axis=1),
                          *params['prior'], relu=False)
    mu = prior_out[:, :C_z]
    h = _ref_conv(jnp.concatenate([state, a_planes, mu], axis=1),
                  *params['trans1'], relu=True)
    next_state = _ref_conv(h, *params['trans2'], relu=True)
    d = _ref_conv(next_state, *params['dec1'], relu=True)
    img = _ref_conv(d, *params['dec2'], relu=False)
    pooled = jnp.mean(next_state, axis=(2, 3))
    rew = jnp.dot(pooled, params['rw_w'],
                  precision=jax.lax.Precision.HIGHEST) + params['rw_b']
    return img, rew


# ----------------------------------------------------------------------------
# Parameter init (deterministic, synthetic)
# ----------------------------------------------------------------------------
def _conv_init(key, cin, cout):
    kw, kb = jax.random.split(key)
    w = jax.random.normal(kw, (3, 3, cin, cout), jnp.float32) / math.sqrt(9 * cin)
    b = 0.01 * jax.random.normal(kb, (cout,), jnp.float32)
    return w, b


if __name__ == "__main__":
    key = jax.random.PRNGKey(0)
    B, T, C, H, W = 2, 3, 3, 16, 16
    num_actions = 4
    C_enc, C_state, C_z = 8, 8, 8
    reward_prediction_bits = 8

    keys = jax.random.split(key, 12)
    params = {
        'enc1': _conv_init(keys[0], C, C_enc),
        'enc2': _conv_init(keys[1], C_enc, C_enc),
        'init_state': _conv_init(keys[2], 3 * C_enc, C_state),
        'prior': _conv_init(keys[3], C_state + num_actions, 2 * C_z),
        'trans1': _conv_init(keys[4], C_state + num_actions + C_z, C_state),
        'trans2': _conv_init(keys[5], C_state, C_state),
        'dec1': _conv_init(keys[6], C_state, C_enc),
        'dec2': _conv_init(keys[7], C_enc, C),
        'rw_w': jax.random.normal(keys[8], (C_state, reward_prediction_bits),
                                  jnp.float32) / math.sqrt(C_state),
        'rw_b': jnp.zeros((reward_prediction_bits,), jnp.float32),
    }

    obs = jax.random.normal(keys[9], (B, T, C, H, W), jnp.float32)   # NCHW frames
    action = jnp.array([1, 3], dtype=jnp.int32)

    image_log_probs, reward_log_probs = ssm_forward(params, obs, action, num_actions)
    jax.block_until_ready((image_log_probs, reward_log_probs))

    assert image_log_probs.shape == (B, C, H, W)
    assert reward_log_probs.shape == (B, reward_prediction_bits)

    # Numerical check against a pure-JAX reference of the same forward pass.
    img_ref, rew_ref = ssm_forward_ref(params, obs, action, num_actions)
    img_err = float(jnp.max(jnp.abs(image_log_probs - img_ref)))
    rew_err = float(jnp.max(jnp.abs(reward_log_probs - rew_ref)))
    assert img_err < 2e-2 and rew_err < 2e-2, (img_err, rew_err)

    print("KERNEL_OK")
</pallas_src>

<mosaic_0001>
module attributes {stable_mosaic.version = 11 : i64} {
  func.func @_ssm_fused_kernel(%arg0: memref<8x1536xf32, #tpu.memory_space<vmem>>, %arg1: memref<8x2xf32, #tpu.memory_space<vmem>>, %arg2: memref<2x512xf32, #tpu.memory_space<vmem>>, %arg3: memref<512x2xf32, #tpu.memory_space<vmem>>, %arg4: memref<8x1536xf32, #tpu.memory_space<vmem>>, %arg5: memref<8x72xf32, #tpu.memory_space<vmem>>, %arg6: memref<8x1xf32, #tpu.memory_space<vmem>>, %arg7: memref<8x72xf32, #tpu.memory_space<vmem>>, %arg8: memref<8x1xf32, #tpu.memory_space<vmem>>, %arg9: memref<8x216xf32, #tpu.memory_space<vmem>>, %arg10: memref<8x1xf32, #tpu.memory_space<vmem>>, %arg11: memref<8x144xf32, #tpu.memory_space<vmem>>, %arg12: memref<8x1xf32, #tpu.memory_space<vmem>>, %arg13: memref<8x216xf32, #tpu.memory_space<vmem>>, %arg14: memref<8x1xf32, #tpu.memory_space<vmem>>, %arg15: memref<8x72xf32, #tpu.memory_space<vmem>>, %arg16: memref<8x1xf32, #tpu.memory_space<vmem>>, %arg17: memref<8x72xf32, #tpu.memory_space<vmem>>, %arg18: memref<8x1xf32, #tpu.memory_space<vmem>>, %arg19: memref<3x72xf32, #tpu.memory_space<vmem>>, %arg20: memref<3x1xf32, #tpu.memory_space<vmem>>, %arg21: memref<8x8xf32, #tpu.memory_space<vmem>>, %arg22: memref<8x1xf32, #tpu.memory_space<vmem>>, %arg23: memref<3x512xf32, #tpu.memory_space<vmem>>, %arg24: memref<8x2xf32, #tpu.memory_space<vmem>>) attributes {dimension_semantics = [], scalar_prefetch = 0 : i64, scratch_operands = 0 : i64, tpu.core_type = #tpu.core_type<tc>} {
    %c0 = arith.constant 0 : index
    %c0_0 = arith.constant 0 : index
    %0 = vector.load %arg4[%c0, %c0_0] : memref<8x1536xf32, #tpu.memory_space<vmem>>, vector<8x1536xf32>
    %1 = vector.extract_strided_slice %0 {offsets = [0, 0], sizes = [8, 512], strides = [1, 1]} : vector<8x1536xf32> to vector<8x512xf32>
    %c0_1 = arith.constant 0 : index
    %c0_2 = arith.constant 0 : index
    %2 = vector.load %arg0[%c0_1, %c0_2] : memref<8x1536xf32, #tpu.memory_space<vmem>>, vector<8x1536xf32>
    %c17_i32 = arith.constant 17 : i32
    %3 = tpu.dynamic_rotate %2 by %c17_i32 dim 1 : vector<8x1536xf32>, i32 -> vector<8x1536xf32>
    %4 = vector.extract_strided_slice %0 {offsets = [0, 0], sizes = [1, 1536], strides = [1, 1]} : vector<8x1536xf32> to vector<1x1536xf32>
    %5 = vector.broadcast %4 : vector<1x1536xf32> to vector<8x1536xf32>
    %6 = arith.mulf %3, %5 : vector<8x1536xf32>
    %c16_i32 = arith.constant 16 : i32
    %7 = tpu.dynamic_rotate %2 by %c16_i32 dim 1 : vector<8x1536xf32>, i32 -> vector<8x1536xf32>
    %8 = vector.extract_strided_slice %0 {offsets = [1, 0], sizes = [1, 1536], strides = [1, 1]} : vector<8x1536xf32> to vector<1x1536xf32>
    %9 = vector.broadcast %8 : vector<1x1536xf32> to vector<8x1536xf32>
    %10 = arith.mulf %7, %9 : vector<8x1536xf32>
    %c15_i32 = arith.constant 15 : i32
    %11 = tpu.dynamic_rotate %2 by %c15_i32 dim 1 : vector<8x1536xf32>, i32 -> vector<8x1536xf32>
    %12 = vector.extract_strided_slice %0 {offsets = [2, 0], sizes = [1, 1536], strides = [1, 1]} : vector<8x1536xf32> to vector<1x1536xf32>
    %13 = vector.broadcast %12 : vector<1x1536xf32> to vector<8x1536xf32>
    %14 = arith.mulf %11, %13 : vector<8x1536xf32>
    %c1_i32 = arith.constant 1 : i32
    %15 = tpu.dynamic_rotate %2 by %c1_i32 dim 1 : vector<8x1536xf32>, i32 -> vector<8x1536xf32>
    %16 = vector.extract_strided_slice %0 {offsets = [3, 0], sizes = [1, 1536], strides = [1, 1]} : vector<8x1536xf32> to vector<1x1536xf32>
    %17 = vector.broadcast %16 : vector<1x1536xf32> to vector<8x1536xf32>
    %18 = arith.mulf %15, %17 : vector<8x1536xf32>
    %c1535_i32 = arith.constant 1535 : i32
    %19 = tpu.dynamic_rotate %2 by %c1535_i32 dim 1 : vector<8x1536xf32>, i32 -> vector<8x1536xf32>
    %20 = vector.extract_strided_slice %0 {offsets = [4, 0], sizes = [1, 1536], strides = [1, 1]} : vector<8x1536xf32> to vector<1x1536xf32>
    %21 = vector.broadcast %20 : vector<1x1536xf32> to vector<8x1536xf32>
    %22 = arith.mulf %19, %21 : vector<8x1536xf32>
    %c1521_i32 = arith.constant 1521 : i32
    %23 = tpu.dynamic_rotate %2 by %c1521_i32 dim 1 : vector<8x1536xf32>, i32 -> vector<8x1536xf32>
    %24 = vector.extract_strided_slice %0 {offsets = [5, 0], sizes = [1, 1536], strides = [1, 1]} : vector<8x1536xf32> to vector<1x1536xf32>
    %25 = vector.broadcast %24 : vector<1x1536xf32> to vector<8x1536xf32>
    %26 = arith.mulf %23, %25 : vector<8x1536xf32>
    %c1520_i32 = arith.constant 1520 : i32
    %27 = tpu.dynamic_rotate %2 by %c1520_i32 dim 1 : vector<8x1536xf32>, i32 -> vector<8x1536xf32>
    %28 = vector.extract_strided_slice %0 {offsets = [6, 0], sizes = [1, 1536], strides = [1, 1]} : vector<8x1536xf32> to vector<1x1536xf32>
    %29 = vector.broadcast %28 : vector<1x1536xf32> to vector<8x1536xf32>
    %30 = arith.mulf %27, %29 : vector<8x1536xf32>
    %c1519_i32 = arith.constant 1519 : i32
    %31 = tpu.dynamic_rotate %2 by %c1519_i32 dim 1 : vector<8x1536xf32>, i32 -> vector<8x1536xf32>
    %32 = vector.extract_strided_slice %0 {offsets = [7, 0], sizes = [1, 1536], strides = [1, 1]} : vector<8x1536xf32> to vector<1x1536xf32>
    %33 = vector.broadcast %32 : vector<1x1536xf32> to vector<8x1536xf32>
    %34 = arith.mulf %31, %33 : vector<8x1536xf32>
    %35 = tpu.concatenate %6, %10, %14, %18, %2, %22, %26, %30, %34 in 0 : vector<8x1536xf32>, vector<8x1536xf32>, vector<8x1536xf32>, vector<8x1536xf32>, vector<8x1536xf32>, vector<8x1536xf32>, vector<8x1536xf32>, vector<8x1536xf32>, vector<8x1536xf32> -> vector<72x1536xf32>
    %c0_3 = arith.constant 0 : index
    %c0_4 = arith.constant 0 : index
    %36 = vector.load %arg5[%c0_3, %c0_4] : memref<8x72xf32, #tpu.memory_space<vmem>>, vector<8x72xf32>
    %cst = arith.constant dense<0.000000e+00> : vector<8x1536xf32>
    %37 = tpu.matmul %36, %35, %cst {dimension_numbers = #tpu.dot_dimension_numbers<[1], [0], [0], [1], [0, 0, 1, 1], [], []>} : vector<8x72xf32>, vector<72x1536xf32>, vector<8x1536xf32> -> vector<8x1536xf32>
    %c0_5 = arith.constant 0 : index
    %c0_6 = arith.constant 0 : index
    %38 = vector.load %arg6[%c0_5, %c0_6] : memref<8x1xf32, #tpu.memory_space<vmem>>, vector<8x1xf32>
    %39 = vector.broadcast %38 : vector<8x1xf32> to vector<8x1536xf32>
    %40 = arith.addf %37, %39 : vector<8x1536xf32>
    %cst_7 = arith.constant 0.000000e+00 : f32
    %41 = vector.broadcast %cst_7 : f32 to vector<8x1536xf32>
    %42 = arith.maximumf %40, %41 : vector<8x1536xf32>
    %c17_i32_8 = arith.constant 17 : i32
    %43 = tpu.dynamic_rotate %42 by %c17_i32_8 dim 1 : vector<8x1536xf32>, i32 -> vector<8x1536xf32>
    %44 = vector.extract_strided_slice %0 {offsets = [0, 0], sizes = [1, 1536], strides = [1, 1]} : vector<8x1536xf32> to vector<1x1536xf32>
    %45 = vector.broadcast %44 : vector<1x1536xf32> to vector<8x1536xf32>
    %46 = arith.mulf %43, %45 : vector<8x1536xf32>
    %c16_i32_9 = arith.constant 16 : i32
    %47 = tpu.dynamic_rotate %42 by %c16_i32_9 dim 1 : vector<8x1536xf32>, i32 -> vector<8x1536xf32>
    %48 = vector.extract_strided_slice %0 {offsets = [1, 0], sizes = [1, 1536], strides = [1, 1]} : vector<8x1536xf32> to vector<1x1536xf32>
    %49 = vector.broadcast %48 : vector<1x1536xf32> to vector<8x1536xf32>
    %50 = arith.mulf %47, %49 : vector<8x1536xf32>
    %c15_i32_10 = arith.constant 15 : i32
    %51 = tpu.dynamic_rotate %42 by %c15_i32_10 dim 1 : vector<8x1536xf32>, i32 -> vector<8x1536xf32>
    %52 = vector.extract_strided_slice %0 {offsets = [2, 0], sizes = [1, 1536], strides = [1, 1]} : vector<8x1536xf32> to vector<1x1536xf32>
    %53 = vector.broadcast %52 : vector<1x1536xf32> to vector<8x1536xf32>
    %54 = arith.mulf %51, %53 : vector<8x1536xf32>
    %c1_i32_11 = arith.constant 1 : i32
    %55 = tpu.dynamic_rotate %42 by %c1_i32_11 dim 1 : vector<8x1536xf32>, i32 -> vector<8x1536xf32>
    %56 = vector.extract_strided_slice %0 {offsets = [3, 0], sizes = [1, 1536], strides = [1, 1]} : vector<8x1536xf32> to vector<1x1536xf32>
    %57 = vector.broadcast %56 : vector<1x1536xf32> to vector<8x1536xf32>
    %58 = arith.mulf %55, %57 : vector<8x1536xf32>
    %c1535_i32_12 = arith.constant 1535 : i32
    %59 = tpu.dynamic_rotate %42 by %c1535_i32_12 dim 1 : vector<8x1536xf32>, i32 -> vector<8x1536xf32>
    %60 = vector.extract_strided_slice %0 {offsets = [4, 0], sizes = [1, 1536], strides = [1, 1]} : vector<8x1536xf32> to vector<1x1536xf32>
    %61 = vector.broadcast %60 : vector<1x1536xf32> to vector<8x1536xf32>
    %62 = arith.mulf %59, %61 : vector<8x1536xf32>
    %c1521_i32_13 = arith.constant 1521 : i32
    %63 = tpu.dynamic_rotate %42 by %c1521_i32_13 dim 1 : vector<8x1536xf32>, i32 -> vector<8x1536xf32>
    %64 = vector.extract_strided_slice %0 {offsets = [5, 0], sizes = [1, 1536], strides = [1, 1]} : vector<8x1536xf32> to vector<1x1536xf32>
    %65 = vector.broadcast %64 : vector<1x1536xf32> to vector<8x1536xf32>
    %66 = arith.mulf %63, %65 : vector<8x1536xf32>
    %c1520_i32_14 = arith.constant 1520 : i32
    %67 = tpu.dynamic_rotate %42 by %c1520_i32_14 dim 1 : vector<8x1536xf32>, i32 -> vector<8x1536xf32>
    %68 = vector.extract_strided_slice %0 {offsets = [6, 0], sizes = [1, 1536], strides = [1, 1]} : vector<8x1536xf32> to vector<1x1536xf32>
    %69 = vector.broadcast %68 : vector<1x1536xf32> to vector<8x1536xf32>
    %70 = arith.mulf %67, %69 : vector<8x1536xf32>
    %c1519_i32_15 = arith.constant 1519 : i32
    %71 = tpu.dynamic_rotate %42 by %c1519_i32_15 dim 1 : vector<8x1536xf32>, i32 -> vector<8x1536xf32>
    %72 = vector.extract_strided_slice %0 {offsets = [7, 0], sizes = [1, 1536], strides = [1, 1]} : vector<8x1536xf32> to vector<1x1536xf32>
    %73 = vector.broadcast %72 : vector<1x1536xf32> to vector<8x1536xf32>
    %74 = arith.mulf %71, %73 : vector<8x1536xf32>
    %75 = tpu.concatenate %46, %50, %54, %58, %42, %62, %66, %70, %74 in 0 : vector<8x1536xf32>, vector<8x1536xf32>, vector<8x1536xf32>, vector<8x1536xf32>, vector<8x1536xf32>, vector<8x1536xf32>, vector<8x1536xf32>, vector<8x1536xf32>, vector<8x1536xf32> -> vector<72x1536xf32>
    %c0_16 = arith.constant 0 : index
    %c0_17 = arith.constant 0 : index
    %76 = vector.load %arg7[%c0_16, %c0_17] : memref<8x72xf32, #tpu.memory_space<vmem>>, vector<8x72xf32>
    %cst_18 = arith.constant dense<0.000000e+00> : vector<8x1536xf32>
    %77 = tpu.matmul %76, %75, %cst_18 {dimension_numbers = #tpu.dot_dimension_numbers<[1], [0], [0], [1], [0, 0, 1, 1], [], []>} : vector<8x72xf32>, vector<72x1536xf32>, vector<8x1536xf32> -> vector<8x1536xf32>
    %c0_19 = arith.constant 0 : index
    %c0_20 = arith.constant 0 : index
    %78 = vector.load %arg8[%c0_19, %c0_20] : memref<8x1xf32, #tpu.memory_space<vmem>>, vector<8x1xf32>
    %79 = vector.broadcast %78 : vector<8x1xf32> to vector<8x1536xf32>
    %80 = arith.addf %77, %79 : vector<8x1536xf32>
    %cst_21 = arith.constant 0.000000e+00 : f32
    %81 = vector.broadcast %cst_21 : f32 to vector<8x1536xf32>
    %82 = arith.maximumf %80, %81 : vector<8x1536xf32>
    %c17_i32_22 = arith.constant 17 : i32
    %83 = tpu.dynamic_rotate %82 by %c17_i32_22 dim 1 : vector<8x1536xf32>, i32 -> vector<8x1536xf32>
    %84 = vector.extract_strided_slice %0 {offsets = [0, 0], sizes = [1, 1536], strides = [1, 1]} : vector<8x1536xf32> to vector<1x1536xf32>
    %85 = vector.broadcast %84 : vector<1x1536xf32> to vector<8x1536xf32>
    %86 = arith.mulf %83, %85 : vector<8x1536xf32>
    %c16_i32_23 = arith.constant 16 : i32
    %87 = tpu.dynamic_rotate %82 by %c16_i32_23 dim 1 : vector<8x1536xf32>, i32 -> vector<8x1536xf32>
    %88 = vector.extract_strided_slice %0 {offsets = [1, 0], sizes = [1, 1536], strides = [1, 1]} : vector<8x1536xf32> to vector<1x1536xf32>
    %89 = vector.broadcast %88 : vector<1x1536xf32> to vector<8x1536xf32>
    %90 = arith.mulf %87, %89 : vector<8x1536xf32>
    %c15_i32_24 = arith.constant 15 : i32
    %91 = tpu.dynamic_rotate %82 by %c15_i32_24 dim 1 : vector<8x1536xf32>, i32 -> vector<8x1536xf32>
    %92 = vector.extract_strided_slice %0 {offsets = [2, 0], sizes = [1, 1536], strides = [1, 1]} : vector<8x1536xf32> to vector<1x1536xf32>
    %93 = vector.broadcast %92 : vector<1x1536xf32> to vector<8x1536xf32>
    %94 = arith.mulf %91, %93 : vector<8x1536xf32>
    %c1_i32_25 = arith.constant 1 : i32
    %95 = tpu.dynamic_rotate %82 by %c1_i32_25 dim 1 : vector<8x1536xf32>, i32 -> vector<8x1536xf32>
    %96 = vector.extract_strided_slice %0 {offsets = [3, 0], sizes = [1, 1536], strides = [1, 1]} : vector<8x1536xf32> to vector<1x1536xf32>
    %97 = vector.broadcast %96 : vector<1x1536xf32> to vector<8x1536xf32>
    %98 = arith.mulf %95, %97 : vector<8x1536xf32>
    %c1535_i32_26 = arith.constant 1535 : i32
    %99 = tpu.dynamic_rotate %82 by %c1535_i32_26 dim 1 : vector<8x1536xf32>, i32 -> vector<8x1536xf32>
    %100 = vector.extract_strided_slice %0 {offsets = [4, 0], sizes = [1, 1536], strides = [1, 1]} : vector<8x1536xf32> to vector<1x1536xf32>
    %101 = vector.broadcast %100 : vector<1x1536xf32> to vector<8x1536xf32>
    %102 = arith.mulf %99, %101 : vector<8x1536xf32>
    %c1521_i32_27 = arith.constant 1521 : i32
    %103 = tpu.dynamic_rotate %82 by %c1521_i32_27 dim 1 : vector<8x1536xf32>, i32 -> vector<8x1536xf32>
    %104 = vector.extract_strided_slice %0 {offsets = [5, 0], sizes = [1, 1536], strides = [1, 1]} : vector<8x1536xf32> to vector<1x1536xf32>
    %105 = vector.broadcast %104 : vector<1x1536xf32> to vector<8x1536xf32>
    %106 = arith.mulf %103, %105 : vector<8x1536xf32>
    %c1520_i32_28 = arith.constant 1520 : i32
    %107 = tpu.dynamic_rotate %82 by %c1520_i32_28 dim 1 : vector<8x1536xf32>, i32 -> vector<8x1536xf32>
    %108 = vector.extract_strided_slice %0 {offsets = [6, 0], sizes = [1, 1536], strides = [1, 1]} : vector<8x1536xf32> to vector<1x1536xf32>
    %109 = vector.broadcast %108 : vector<1x1536xf32> to vector<8x1536xf32>
    %110 = arith.mulf %107, %109 : vector<8x1536xf32>
    %c1519_i32_29 = arith.constant 1519 : i32
    %111 = tpu.dynamic_rotate %82 by %c1519_i32_29 dim 1 : vector<8x1536xf32>, i32 -> vector<8x1536xf32>
    %112 = vector.extract_strided_slice %0 {offsets = [7, 0], sizes = [1, 1536], strides = [1, 1]} : vector<8x1536xf32> to vector<1x1536xf32>
    %113 = vector.broadcast %112 : vector<1x1536xf32> to vector<8x1536xf32>
    %114 = arith.mulf %111, %113 : vector<8x1536xf32>
    %115 = tpu.concatenate %86, %90, %94, %98, %82, %102, %106, %110, %114 in 0 : vector<8x1536xf32>, vector<8x1536xf32>, vector<8x1536xf32>, vector<8x1536xf32>, vector<8x1536xf32>, vector<8x1536xf32>, vector<8x1536xf32>, vector<8x1536xf32>, vector<8x1536xf32> -> vector<72x1536xf32>
    %116 = vector.extract_strided_slice %115 {offsets = [0, 0], sizes = [72, 512], strides = [1, 1]} : vector<72x1536xf32> to vector<72x512xf32>
    %117 = vector.extract_strided_slice %115 {offsets = [0, 512], sizes = [72, 512], strides = [1, 1]} : vector<72x1536xf32> to vector<72x512xf32>
    %118 = vector.extract_strided_slice %115 {offsets = [0, 1024], sizes = [72, 512], strides = [1, 1]} : vector<72x1536xf32> to vector<72x512xf32>
    %119 = tpu.concatenate %116, %117, %118 in 0 : vector<72x512xf32>, vector<72x512xf32>, vector<72x512xf32> -> vector<216x512xf32>
    %c0_30 = arith.constant 0 : index
    %c0_31 = arith.constant 0 : index
    %120 = vector.load %arg9[%c0_30, %c0_31] : memref<8x216xf32, #tpu.memory_space<vmem>>, vector<8x216xf32>
    %cst_32 = arith.constant dense<0.000000e+00> : vector<8x512xf32>
    %121 = tpu.matmul %120, %119, %cst_32 {dimension_numbers = #tpu.dot_dimension_numbers<[1], [0], [0], [1], [0, 0, 1, 1], [], []>} : vector<8x216xf32>, vector<216x512xf32>, vector<8x512xf32> -> vector<8x512xf32>
    %c0_33 = arith.constant 0 : index
    %c0_34 = arith.constant 0 : index
    %122 = vector.load %arg10[%c0_33, %c0_34] : memref<8x1xf32, #tpu.memory_space<vmem>>, vector<8x1xf32>
    %123 = vector.broadcast %122 : vector<8x1xf32> to vector<8x512xf32>
    %124 = arith.addf %121, %123 : vector<8x512xf32>
    %cst_35 = arith.constant 0.000000e+00 : f32
    %125 = vector.broadcast %cst_35 : f32 to vector<8x512xf32>
    %126 = arith.maximumf %124, %125 : vector<8x512xf32>
    %c0_36 = arith.constant 0 : index
    %c0_37 = arith.constant 0 : index
    %127 = vector.load %arg1[%c0_36, %c0_37] : memref<8x2xf32, #tpu.memory_space<vmem>>, vector<8x2xf32>
    %c0_38 = arith.constant 0 : index
    %c0_39 = arith.constant 0 : index
    %128 = vector.load %arg2[%c0_38, %c0_39] : memref<2x512xf32, #tpu.memory_space<vmem>>, vector<2x512xf32>
    %cst_40 = arith.constant dense<0.000000e+00> : vector<8x512xf32>
    %129 = tpu.matmul %127, %128, %cst_40 {dimension_numbers = #tpu.dot_dimension_numbers<[1], [0], [0], [1], [0, 0, 1, 1], [], []>} : vector<8x2xf32>, vector<2x512xf32>, vector<8x512xf32> -> vector<8x512xf32>
    %c17_i32_41 = arith.constant 17 : i32
    %130 = tpu.dynamic_rotate %126 by %c17_i32_41 dim 1 : vector<8x512xf32>, i32 -> vector<8x512xf32>
    %131 = vector.extract_strided_slice %1 {offsets = [0, 0], sizes = [1, 512], strides = [1, 1]} : vector<8x512xf32> to vector<1x512xf32>
    %132 = vector.broadcast %131 : vector<1x512xf32> to vector<8x512xf32>
    %133 = arith.mulf %130, %132 : vector<8x512xf32>
    %c16_i32_42 = arith.constant 16 : i32
    %134 = tpu.dynamic_rotate %126 by %c16_i32_42 dim 1 : vector<8x512xf32>, i32 -> vector<8x512xf32>
    %135 = vector.extract_strided_slice %1 {offsets = [1, 0], sizes = [1, 512], strides = [1, 1]} : vector<8x512xf32> to vector<1x512xf32>
    %136 = vector.broadcast %135 : vector<1x512xf32> to vector<8x512xf32>
    %137 = arith.mulf %134, %136 : vector<8x512xf32>
    %c15_i32_43 = arith.constant 15 : i32
    %138 = tpu.dynamic_rotate %126 by %c15_i32_43 dim 1 : vector<8x512xf32>, i32 -> vector<8x512xf32>
    %139 = vector.extract_strided_slice %1 {offsets = [2, 0], sizes = [1, 512], strides = [1, 1]} : vector<8x512xf32> to vector<1x512xf32>
    %140 = vector.broadcast %139 : vector<1x512xf32> to vector<8x512xf32>
    %141 = arith.mulf %138, %140 : vector<8x512xf32>
    %c1_i32_44 = arith.constant 1 : i32
    %142 = tpu.dynamic_rotate %126 by %c1_i32_44 dim 1 : vector<8x512xf32>, i32 -> vector<8x512xf32>
    %143 = vector.extract_strided_slice %1 {offsets = [3, 0], sizes = [1, 512], strides = [1, 1]} : vector<8x512xf32> to vector<1x512xf32>
    %144 = vector.broadcast %143 : vector<1x512xf32> to vector<8x512xf32>
    %145 = arith.mulf %142, %144 : vector<8x512xf32>
    %c511_i32 = arith.constant 511 : i32
    %146 = tpu.dynamic_rotate %126 by %c511_i32 dim 1 : vector<8x512xf32>, i32 -> vector<8x512xf32>
    %147 = vector.extract_strided_slice %1 {offsets = [4, 0], sizes = [1, 512], strides = [1, 1]} : vector<8x512xf32> to vector<1x512xf32>
    %148 = vector.broadcast %147 : vector<1x512xf32> to vector<8x512xf32>
    %149 = arith.mulf %146, %148 : vector<8x512xf32>
    %c497_i32 = arith.constant 497 : i32
    %150 = tpu.dynamic_rotate %126 by %c497_i32 dim 1 : vector<8x512xf32>, i32 -> vector<8x512xf32>
    %151 = vector.extract_strided_slice %1 {offsets = [5, 0], sizes = [1, 512], strides = [1, 1]} : vector<8x512xf32> to vector<1x512xf32>
    %152 = vector.broadcast %151 : vector<1x512xf32> to vector<8x512xf32>
    %153 = arith.mulf %150, %152 : vector<8x512xf32>
    %c496_i32 = arith.constant 496 : i32
    %154 = tpu.dynamic_rotate %126 by %c496_i32 dim 1 : vector<8x512xf32>, i32 -> vector<8x512xf32>
    %155 = vector.extract_strided_slice %1 {offsets = [6, 0], sizes = [1, 512], strides = [1, 1]} : vector<8x512xf32> to vector<1x512xf32>
    %156 = vector.broadcast %155 : vector<1x512xf32> to vector<8x512xf32>
    %157 = arith.mulf %154, %156 : vector<8x512xf32>
    %c495_i32 = arith.constant 495 : i32
    %158 = tpu.dynamic_rotate %126 by %c495_i32 dim 1 : vector<8x512xf32>, i32 -> vector<8x512xf32>
    %159 = vector.extract_strided_slice %1 {offsets = [7, 0], sizes = [1, 512], strides = [1, 1]} : vector<8x512xf32> to vector<1x512xf32>
    %160 = vector.broadcast %159 : vector<1x512xf32> to vector<8x512xf32>
    %161 = arith.mulf %158, %160 : vector<8x512xf32>
    %162 = tpu.concatenate %133, %137, %141, %145, %126, %149, %153, %157, %161 in 0 : vector<8x512xf32>, vector<8x512xf32>, vector<8x512xf32>, vector<8x512xf32>, vector<8x512xf32>, vector<8x512xf32>, vector<8x512xf32>, vector<8x512xf32>, vector<8x512xf32> -> vector<72x512xf32>
    %163 = vector.extract_strided_slice %1 {offsets = [0, 0], sizes = [1, 512], strides = [1, 1]} : vector<8x512xf32> to vector<1x512xf32>
    %164 = vector.broadcast %163 : vector<1x512xf32> to vector<8x512xf32>
    %165 = arith.mulf %129, %164 : vector<8x512xf32>
    %166 = vector.extract_strided_slice %1 {offsets = [1, 0], sizes = [1, 512], strides = [1, 1]} : vector<8x512xf32> to vector<1x512xf32>
    %167 = vector.broadcast %166 : vector<1x512xf32> to vector<8x512xf32>
    %168 = arith.mulf %129, %167 : vector<8x512xf32>
    %169 = vector.extract_strided_slice %1 {offsets = [2, 0], sizes = [1, 512], strides = [1, 1]} : vector<8x512xf32> to vector<1x512xf32>
    %170 = vector.broadcast %169 : vector<1x512xf32> to vector<8x512xf32>
    %171 = arith.mulf %129, %170 : vector<8x512xf32>
    %172 = vector.extract_strided_slice %1 {offsets = [3, 0], sizes = [1, 512], strides = [1, 1]} : vector<8x512xf32> to vector<1x512xf32>
    %173 = vector.broadcast %172 : vector<1x512xf32> to vector<8x512xf32>
    %174 = arith.mulf %129, %173 : vector<8x512xf32>
    %175 = vector.extract_strided_slice %1 {offsets = [4, 0], sizes = [1, 512], strides = [1, 1]} : vector<8x512xf32> to vector<1x512xf32>
    %176 = vector.broadcast %175 : vector<1x512xf32> to vector<8x512xf32>
    %177 = arith.mulf %129, %176 : vector<8x512xf32>
    %178 = vector.extract_strided_slice %1 {offsets = [5, 0], sizes = [1, 512], strides = [1, 1]} : vector<8x512xf32> to vector<1x512xf32>
    %179 = vector.broadcast %178 : vector<1x512xf32> to vector<8x512xf32>
    %180 = arith.mulf %129, %179 : vector<8x512xf32>
    %181 = vector.extract_strided_slice %1 {offsets = [6, 0], sizes = [1, 512], strides = [1, 1]} : vector<8x512xf32> to vector<1x512xf32>
    %182 = vector.broadcast %181 : vector<1x512xf32> to vector<8x512xf32>
    %183 = arith.mulf %129, %182 : vector<8x512xf32>
    %184 = vector.extract_strided_slice %1 {offsets = [7, 0], sizes = [1, 512], strides = [1, 1]} : vector<8x512xf32> to vector<1x512xf32>
    %185 = vector.broadcast %184 : vector<1x512xf32> to vector<8x512xf32>
    %186 = arith.mulf %129, %185 : vector<8x512xf32>
    %187 = tpu.concatenate %165, %168, %171, %174, %129, %177, %180, %183, %186 in 0 : vector<8x512xf32>, vector<8x512xf32>, vector<8x512xf32>, vector<8x512xf32>, vector<8x512xf32>, vector<8x512xf32>, vector<8x512xf32>, vector<8x512xf32>, vector<8x512xf32> -> vector<72x512xf32>
    %188 = tpu.concatenate %162, %187 in 0 : vector<72x512xf32>, vector<72x512xf32> -> vector<144x512xf32>
    %c0_45 = arith.constant 0 : index
    %c0_46 = arith.constant 0 : index
    %189 = vector.load %arg11[%c0_45, %c0_46] : memref<8x144xf32, #tpu.memory_space<vmem>>, vector<8x144xf32>
    %cst_47 = arith.constant dense<0.000000e+00> : vector<8x512xf32>
    %190 = tpu.matmul %189, %188, %cst_47 {dimension_numbers = #tpu.dot_dimension_numbers<[1], [0], [0], [1], [0, 0, 1, 1], [], []>} : vector<8x144xf32>, vector<144x512xf32>, vector<8x512xf32> -> vector<8x512xf32>
    %c0_48 = arith.constant 0 : index
    %c0_49 = arith.constant 0 : index
    %191 = vector.load %arg12[%c0_48, %c0_49] : memref<8x1xf32, #tpu.memory_space<vmem>>, vector<8x1xf32>
    %192 = vector.broadcast %191 : vector<8x1xf32> to vector<8x512xf32>
    %193 = arith.addf %190, %192 : vector<8x512xf32>
    %c17_i32_50 = arith.constant 17 : i32
    %194 = tpu.dynamic_rotate %193 by %c17_i32_50 dim 1 : vector<8x512xf32>, i32 -> vector<8x512xf32>
    %195 = vector.extract_strided_slice %1 {offsets = [0, 0], sizes = [1, 512], strides = [1, 1]} : vector<8x512xf32> to vector<1x512xf32>
    %196 = vector.broadcast %195 : vector<1x512xf32> to vector<8x512xf32>
    %197 = arith.mulf %194, %196 : vector<8x512xf32>
    %c16_i32_51 = arith.constant 16 : i32
    %198 = tpu.dynamic_rotate %193 by %c16_i32_51 dim 1 : vector<8x512xf32>, i32 -> vector<8x512xf32>
    %199 = vector.extract_strided_slice %1 {offsets = [1, 0], sizes = [1, 512], strides = [1, 1]} : vector<8x512xf32> to vector<1x512xf32>
    %200 = vector.broadcast %199 : vector<1x512xf32> to vector<8x512xf32>
    %201 = arith.mulf %198, %200 : vector<8x512xf32>
    %c15_i32_52 = arith.constant 15 : i32
    %202 = tpu.dynamic_rotate %193 by %c15_i32_52 dim 1 : vector<8x512xf32>, i32 -> vector<8x512xf32>
    %203 = vector.extract_strided_slice %1 {offsets = [2, 0], sizes = [1, 512], strides = [1, 1]} : vector<8x512xf32> to vector<1x512xf32>
    %204 = vector.broadcast %203 : vector<1x512xf32> to vector<8x512xf32>
    %205 = arith.mulf %202, %204 : vector<8x512xf32>
    %c1_i32_53 = arith.constant 1 : i32
    %206 = tpu.dynamic_rotate %193 by %c1_i32_53 dim 1 : vector<8x512xf32>, i32 -> vector<8x512xf32>
    %207 = vector.extract_strided_slice %1 {offsets = [3, 0], sizes = [1, 512], strides = [1, 1]} : vector<8x512xf32> to vector<1x512xf32>
    %208 = vector.broadcast %207 : vector<1x512xf32> to vector<8x512xf32>
    %209 = arith.mulf %206, %208 : vector<8x512xf32>
    %c511_i32_54 = arith.constant 511 : i32
    %210 = tpu.dynamic_rotate %193 by %c511_i32_54 dim 1 : vector<8x512xf32>, i32 -> vector<8x512xf32>
    %211 = vector.extract_strided_slice %1 {offsets = [4, 0], sizes = [1, 512], strides = [1, 1]} : vector<8x512xf32> to vector<1x512xf32>
    %212 = vector.broadcast %211 : vector<1x512xf32> to vector<8x512xf32>
    %213 = arith.mulf %210, %212 : vector<8x512xf32>
    %c497_i32_55 = arith.constant 497 : i32
    %214 = tpu.dynamic_rotate %193 by %c497_i32_55 dim 1 : vector<8x512xf32>, i32 -> vector<8x512xf32>
    %215 = vector.extract_strided_slice %1 {offsets = [5, 0], sizes = [1, 512], strides = [1, 1]} : vector<8x512xf32> to vector<1x512xf32>
    %216 = vector.broadcast %215 : vector<1x512xf32> to vector<8x512xf32>
    %217 = arith.mulf %214, %216 : vector<8x512xf32>
    %c496_i32_56 = arith.constant 496 : i32
    %218 = tpu.dynamic_rotate %193 by %c496_i32_56 dim 1 : vector<8x512xf32>, i32 -> vector<8x512xf32>
    %219 = vector.extract_strided_slice %1 {offsets = [6, 0], sizes = [1, 512], strides = [1, 1]} : vector<8x512xf32> to vector<1x512xf32>
    %220 = vector.broadcast %219 : vector<1x512xf32> to vector<8x512xf32>
    %221 = arith.mulf %218, %220 : vector<8x512xf32>
    %c495_i32_57 = arith.constant 495 : i32
    %222 = tpu.dynamic_rotate %193 by %c495_i32_57 dim 1 : vector<8x512xf32>, i32 -> vector<8x512xf32>
    %223 = vector.extract_strided_slice %1 {offsets = [7, 0], sizes = [1, 512], strides = [1, 1]} : vector<8x512xf32> to vector<1x512xf32>
    %224 = vector.broadcast %223 : vector<1x512xf32> to vector<8x512xf32>
    %225 = arith.mulf %222, %224 : vector<8x512xf32>
    %226 = tpu.concatenate %197, %201, %205, %209, %193, %213, %217, %221, %225 in 0 : vector<8x512xf32>, vector<8x512xf32>, vector<8x512xf32>, vector<8x512xf32>, vector<8x512xf32>, vector<8x512xf32>, vector<8x512xf32>, vector<8x512xf32>, vector<8x512xf32> -> vector<72x512xf32>
    %227 = tpu.concatenate %162, %187, %226 in 0 : vector<72x512xf32>, vector<72x512xf32>, vector<72x512xf32> -> vector<216x512xf32>
    %c0_58 = arith.constant 0 : index
    %c0_59 = arith.constant 0 : index
    %228 = vector.load %arg13[%c0_58, %c0_59] : memref<8x216xf32, #tpu.memory_space<vmem>>, vector<8x216xf32>
    %cst_60 = arith.constant dense<0.000000e+00> : vector<8x512xf32>
    %229 = tpu.matmul %228, %227, %cst_60 {dimension_numbers = #tpu.dot_dimension_numbers<[1], [0], [0], [1], [0, 0, 1, 1], [], []>} : vector<8x216xf32>, vector<216x512xf32>, vector<8x512xf32> -> vector<8x512xf32>
    %c0_61 = arith.constant 0 : index
    %c0_62 = arith.constant 0 : index
    %230 = vector.load %arg14[%c0_61, %c0_62] : memref<8x1xf32, #tpu.memory_space<vmem>>, vector<8x1xf32>
    %231 = vector.broadcast %230 : vector<8x1xf32> to vector<8x512xf32>
    %232 = arith.addf %229, %231 : vector<8x512xf32>
    %cst_63 = arith.constant 0.000000e+00 : f32
    %233 = vector.broadcast %cst_63 : f32 to vector<8x512xf32>
    %234 = arith.maximumf %232, %233 : vector<8x512xf32>
    %c17_i32_64 = arith.constant 17 : i32
    %235 = tpu.dynamic_rotate %234 by %c17_i32_64 dim 1 : vector<8x512xf32>, i32 -> vector<8x512xf32>
    %236 = vector.extract_strided_slice %1 {offsets = [0, 0], sizes = [1, 512], strides = [1, 1]} : vector<8x512xf32> to vector<1x512xf32>
    %237 = vector.broadcast %236 : vector<1x512xf32> to vector<8x512xf32>
    %238 = arith.mulf %235, %237 : vector<8x512xf32>
    %c16_i32_65 = arith.constant 16 : i32
    %239 = tpu.dynamic_rotate %234 by %c16_i32_65 dim 1 : vector<8x512xf32>, i32 -> vector<8x512xf32>
    %240 = vector.extract_strided_slice %1 {offsets = [1, 0], sizes = [1, 512], strides = [1, 1]} : vector<8x512xf32> to vector<1x512xf32>
    %241 = vector.broadcast %240 : vector<1x512xf32> to vector<8x512xf32>
    %242 = arith.mulf %239, %241 : vector<8x512xf32>
    %c15_i32_66 = arith.constant 15 : i32
    %243 = tpu.dynamic_rotate %234 by %c15_i32_66 dim 1 : vector<8x512xf32>, i32 -> vector<8x512xf32>
    %244 = vector.extract_strided_slice %1 {offsets = [2, 0], sizes = [1, 512], strides = [1, 1]} : vector<8x512xf32> to vector<1x512xf32>
    %245 = vector.broadcast %244 : vector<1x512xf32> to vector<8x512xf32>
    %246 = arith.mulf %243, %245 : vector<8x512xf32>
    %c1_i32_67 = arith.constant 1 : i32
    %247 = tpu.dynamic_rotate %234 by %c1_i32_67 dim 1 : vector<8x512xf32>, i32 -> vector<8x512xf32>
    %248 = vector.extract_strided_slice %1 {offsets = [3, 0], sizes = [1, 512], strides = [1, 1]} : vector<8x512xf32> to vector<1x512xf32>
    %249 = vector.broadcast %248 : vector<1x512xf32> to vector<8x512xf32>
    %250 = arith.mulf %247, %249 : vector<8x512xf32>
    %c511_i32_68 = arith.constant 511 : i32
    %251 = tpu.dynamic_rotate %234 by %c511_i32_68 dim 1 : vector<8x512xf32>, i32 -> vector<8x512xf32>
    %252 = vector.extract_strided_slice %1 {offsets = [4, 0], sizes = [1, 512], strides = [1, 1]} : vector<8x512xf32> to vector<1x512xf32>
    %253 = vector.broadcast %252 : vector<1x512xf32> to vector<8x512xf32>
    %254 = arith.mulf %251, %253 : vector<8x512xf32>
    %c497_i32_69 = arith.constant 497 : i32
    %255 = tpu.dynamic_rotate %234 by %c497_i32_69 dim 1 : vector<8x512xf32>, i32 -> vector<8x512xf32>
    %256 = vector.extract_strided_slice %1 {offsets = [5, 0], sizes = [1, 512], strides = [1, 1]} : vector<8x512xf32> to vector<1x512xf32>
    %257 = vector.broadcast %256 : vector<1x512xf32> to vector<8x512xf32>
    %258 = arith.mulf %255, %257 : vector<8x512xf32>
    %c496_i32_70 = arith.constant 496 : i32
    %259 = tpu.dynamic_rotate %234 by %c496_i32_70 dim 1 : vector<8x512xf32>, i32 -> vector<8x512xf32>
    %260 = vector.extract_strided_slice %1 {offsets = [6, 0], sizes = [1, 512], strides = [1, 1]} : vector<8x512xf32> to vector<1x512xf32>
    %261 = vector.broadcast %260 : vector<1x512xf32> to vector<8x512xf32>
    %262 = arith.mulf %259, %261 : vector<8x512xf32>
    %c495_i32_71 = arith.constant 495 : i32
    %263 = tpu.dynamic_rotate %234 by %c495_i32_71 dim 1 : vector<8x512xf32>, i32 -> vector<8x512xf32>
    %264 = vector.extract_strided_slice %1 {offsets = [7, 0], sizes = [1, 512], strides = [1, 1]} : vector<8x512xf32> to vector<1x512xf32>
    %265 = vector.broadcast %264 : vector<1x512xf32> to vector<8x512xf32>
    %266 = arith.mulf %263, %265 : vector<8x512xf32>
    %267 = tpu.concatenate %238, %242, %246, %250, %234, %254, %258, %262, %266 in 0 : vector<8x512xf32>, vector<8x512xf32>, vector<8x512xf32>, vector<8x512xf32>, vector<8x512xf32>, vector<8x512xf32>, vector<8x512xf32>, vector<8x512xf32>, vector<8x512xf32> -> vector<72x512xf32>
    %c0_72 = arith.constant 0 : index
    %c0_73 = arith.constant 0 : index
    %268 = vector.load %arg15[%c0_72, %c0_73] : memref<8x72xf32, #tpu.memory_space<vmem>>, vector<8x72xf32>
    %cst_74 = arith.constant dense<0.000000e+00> : vector<8x512xf32>
    %269 = tpu.matmul %268, %267, %cst_74 {dimension_numbers = #tpu.dot_dimension_numbers<[1], [0], [0], [1], [0, 0, 1, 1], [], []>} : vector<8x72xf32>, vector<72x512xf32>, vector<8x512xf32> -> vector<8x512xf32>
    %c0_75 = arith.constant 0 : index
    %c0_76 = arith.constant 0 : index
    %270 = vector.load %arg16[%c0_75, %c0_76] : memref<8x1xf32, #tpu.memory_space<vmem>>, vector<8x1xf32>
    %271 = vector.broadcast %270 : vector<8x1xf32> to vector<8x512xf32>
    %272 = arith.addf %269, %271 : vector<8x512xf32>
    %cst_77 = arith.constant 0.000000e+00 : f32
    %273 = vector.broadcast %cst_77 : f32 to vector<8x512xf32>
    %274 = arith.maximumf %272, %273 : vector<8x512xf32>
    %c17_i32_78 = arith.constant 17 : i32
    %275 = tpu.dynamic_rotate %274 by %c17_i32_78 dim 1 : vector<8x512xf32>, i32 -> vector<8x512xf32>
    %276 = vector.extract_strided_slice %1 {offsets = [0, 0], sizes = [1, 512], strides = [1, 1]} : vector<8x512xf32> to vector<1x512xf32>
    %277 = vector.broadcast %276 : vector<1x512xf32> to vector<8x512xf32>
    %278 = arith.mulf %275, %277 : vector<8x512xf32>
    %c16_i32_79 = arith.constant 16 : i32
    %279 = tpu.dynamic_rotate %274 by %c16_i32_79 dim 1 : vector<8x512xf32>, i32 -> vector<8x512xf32>
    %280 = vector.extract_strided_slice %1 {offsets = [1, 0], sizes = [1, 512], strides = [1, 1]} : vector<8x512xf32> to vector<1x512xf32>
    %281 = vector.broadcast %280 : vector<1x512xf32> to vector<8x512xf32>
    %282 = arith.mulf %279, %281 : vector<8x512xf32>
    %c15_i32_80 = arith.constant 15 : i32
    %283 = tpu.dynamic_rotate %274 by %c15_i32_80 dim 1 : vector<8x512xf32>, i32 -> vector<8x512xf32>
    %284 = vector.extract_strided_slice %1 {offsets = [2, 0], sizes = [1, 512], strides = [1, 1]} : vector<8x512xf32> to vector<1x512xf32>
    %285 = vector.broadcast %284 : vector<1x512xf32> to vector<8x512xf32>
    %286 = arith.mulf %283, %285 : vector<8x512xf32>
    %c1_i32_81 = arith.constant 1 : i32
    %287 = tpu.dynamic_rotate %274 by %c1_i32_81 dim 1 : vector<8x512xf32>, i32 -> vector<8x512xf32>
    %288 = vector.extract_strided_slice %1 {offsets = [3, 0], sizes = [1, 512], strides = [1, 1]} : vector<8x512xf32> to vector<1x512xf32>
    %289 = vector.broadcast %288 : vector<1x512xf32> to vector<8x512xf32>
    %290 = arith.mulf %287, %289 : vector<8x512xf32>
    %c511_i32_82 = arith.constant 511 : i32
    %291 = tpu.dynamic_rotate %274 by %c511_i32_82 dim 1 : vector<8x512xf32>, i32 -> vector<8x512xf32>
    %292 = vector.extract_strided_slice %1 {offsets = [4, 0], sizes = [1, 512], strides = [1, 1]} : vector<8x512xf32> to vector<1x512xf32>
    %293 = vector.broadcast %292 : vector<1x512xf32> to vector<8x512xf32>
    %294 = arith.mulf %291, %293 : vector<8x512xf32>
    %c497_i32_83 = arith.constant 497 : i32
    %295 = tpu.dynamic_rotate %274 by %c497_i32_83 dim 1 : vector<8x512xf32>, i32 -> vector<8x512xf32>
    %296 = vector.extract_strided_slice %1 {offsets = [5, 0], sizes = [1, 512], strides = [1, 1]} : vector<8x512xf32> to vector<1x512xf32>
    %297 = vector.broadcast %296 : vector<1x512xf32> to vector<8x512xf32>
    %298 = arith.mulf %295, %297 : vector<8x512xf32>
    %c496_i32_84 = arith.constant 496 : i32
    %299 = tpu.dynamic_rotate %274 by %c496_i32_84 dim 1 : vector<8x512xf32>, i32 -> vector<8x512xf32>
    %300 = vector.extract_strided_slice %1 {offsets = [6, 0], sizes = [1, 512], strides = [1, 1]} : vector<8x512xf32> to vector<1x512xf32>
    %301 = vector.broadcast %300 : vector<1x512xf32> to vector<8x512xf32>
    %302 = arith.mulf %299, %301 : vector<8x512xf32>
    %c495_i32_85 = arith.constant 495 : i32
    %303 = tpu.dynamic_rotate %274 by %c495_i32_85 dim 1 : vector<8x512xf32>, i32 -> vector<8x512xf32>
    %304 = vector.extract_strided_slice %1 {offsets = [7, 0], sizes = [1, 512], strides = [1, 1]} : vector<8x512xf32> to vector<1x512xf32>
    %305 = vector.broadcast %304 : vector<1x512xf32> to vector<8x512xf32>
    %306 = arith.mulf %303, %305 : vector<8x512xf32>
    %307 = tpu.concatenate %278, %282, %286, %290, %274, %294, %298, %302, %306 in 0 : vector<8x512xf32>, vector<8x512xf32>, vector<8x512xf32>, vector<8x512xf32>, vector<8x512xf32>, vector<8x512xf32>, vector<8x512xf32>, vector<8x512xf32>, vector<8x512xf32> -> vector<72x512xf32>
    %c0_86 = arith.constant 0 : index
    %c0_87 = arith.constant 0 : index
    %308 = vector.load %arg17[%c0_86, %c0_87] : memref<8x72xf32, #tpu.memory_space<vmem>>, vector<8x72xf32>
    %cst_88 = arith.constant dense<0.000000e+00> : vector<8x512xf32>
    %309 = tpu.matmul %308, %307, %cst_88 {dimension_numbers = #tpu.dot_dimension_numbers<[1], [0], [0], [1], [0, 0, 1, 1], [], []>} : vector<8x72xf32>, vector<72x512xf32>, vector<8x512xf32> -> vector<8x512xf32>
    %c0_89 = arith.constant 0 : index
    %c0_90 = arith.constant 0 : index
    %310 = vector.load %arg18[%c0_89, %c0_90] : memref<8x1xf32, #tpu.memory_space<vmem>>, vector<8x1xf32>
    %311 = vector.broadcast %310 : vector<8x1xf32> to vector<8x512xf32>
    %312 = arith.addf %309, %311 : vector<8x512xf32>
    %cst_91 = arith.constant 0.000000e+00 : f32
    %313 = vector.broadcast %cst_91 : f32 to vector<8x512xf32>
    %314 = arith.maximumf %312, %313 : vector<8x512xf32>
    %c17_i32_92 = arith.constant 17 : i32
    %315 = tpu.dynamic_rotate %314 by %c17_i32_92 dim 1 : vector<8x512xf32>, i32 -> vector<8x512xf32>
    %316 = vector.extract_strided_slice %1 {offsets = [0, 0], sizes = [1, 512], strides = [1, 1]} : vector<8x512xf32> to vector<1x512xf32>
    %317 = vector.broadcast %316 : vector<1x512xf32> to vector<8x512xf32>
    %318 = arith.mulf %315, %317 : vector<8x512xf32>
    %c16_i32_93 = arith.constant 16 : i32
    %319 = tpu.dynamic_rotate %314 by %c16_i32_93 dim 1 : vector<8x512xf32>, i32 -> vector<8x512xf32>
    %320 = vector.extract_strided_slice %1 {offsets = [1, 0], sizes = [1, 512], strides = [1, 1]} : vector<8x512xf32> to vector<1x512xf32>
    %321 = vector.broadcast %320 : vector<1x512xf32> to vector<8x512xf32>
    %322 = arith.mulf %319, %321 : vector<8x512xf32>
    %c15_i32_94 = arith.constant 15 : i32
    %323 = tpu.dynamic_rotate %314 by %c15_i32_94 dim 1 : vector<8x512xf32>, i32 -> vector<8x512xf32>
    %324 = vector.extract_strided_slice %1 {offsets = [2, 0], sizes = [1, 512], strides = [1, 1]} : vector<8x512xf32> to vector<1x512xf32>
    %325 = vector.broadcast %324 : vector<1x512xf32> to vector<8x512xf32>
    %326 = arith.mulf %323, %325 : vector<8x512xf32>
    %c1_i32_95 = arith.constant 1 : i32
    %327 = tpu.dynamic_rotate %314 by %c1_i32_95 dim 1 : vector<8x512xf32>, i32 -> vector<8x512xf32>
    %328 = vector.extract_strided_slice %1 {offsets = [3, 0], sizes = [1, 512], strides = [1, 1]} : vector<8x512xf32> to vector<1x512xf32>
    %329 = vector.broadcast %328 : vector<1x512xf32> to vector<8x512xf32>
    %330 = arith.mulf %327, %329 : vector<8x512xf32>
    %c511_i32_96 = arith.constant 511 : i32
    %331 = tpu.dynamic_rotate %314 by %c511_i32_96 dim 1 : vector<8x512xf32>, i32 -> vector<8x512xf32>
    %332 = vector.extract_strided_slice %1 {offsets = [4, 0], sizes = [1, 512], strides = [1, 1]} : vector<8x512xf32> to vector<1x512xf32>
    %333 = vector.broadcast %332 : vector<1x512xf32> to vector<8x512xf32>
    %334 = arith.mulf %331, %333 : vector<8x512xf32>
    %c497_i32_97 = arith.constant 497 : i32
    %335 = tpu.dynamic_rotate %314 by %c497_i32_97 dim 1 : vector<8x512xf32>, i32 -> vector<8x512xf32>
    %336 = vector.extract_strided_slice %1 {offsets = [5, 0], sizes = [1, 512], strides = [1, 1]} : vector<8x512xf32> to vector<1x512xf32>
    %337 = vector.broadcast %336 : vector<1x512xf32> to vector<8x512xf32>
    %338 = arith.mulf %335, %337 : vector<8x512xf32>
    %c496_i32_98 = arith.constant 496 : i32
    %339 = tpu.dynamic_rotate %314 by %c496_i32_98 dim 1 : vector<8x512xf32>, i32 -> vector<8x512xf32>
    %340 = vector.extract_strided_slice %1 {offsets = [6, 0], sizes = [1, 512], strides = [1, 1]} : vector<8x512xf32> to vector<1x512xf32>
    %341 = vector.broadcast %340 : vector<1x512xf32> to vector<8x512xf32>
    %342 = arith.mulf %339, %341 : vector<8x512xf32>
    %c495_i32_99 = arith.constant 495 : i32
    %343 = tpu.dynamic_rotate %314 by %c495_i32_99 dim 1 : vector<8x512xf32>, i32 -> vector<8x512xf32>
    %344 = vector.extract_strided_slice %1 {offsets = [7, 0], sizes = [1, 512], strides = [1, 1]} : vector<8x512xf32> to vector<1x512xf32>
    %345 = vector.broadcast %344 : vector<1x512xf32> to vector<8x512xf32>
    %346 = arith.mulf %343, %345 : vector<8x512xf32>
    %347 = tpu.concatenate %318, %322, %326, %330, %314, %334, %338, %342, %346 in 0 : vector<8x512xf32>, vector<8x512xf32>, vector<8x512xf32>, vector<8x512xf32>, vector<8x512xf32>, vector<8x512xf32>, vector<8x512xf32>, vector<8x512xf32>, vector<8x512xf32> -> vector<72x512xf32>
    %c0_100 = arith.constant 0 : index
    %c0_101 = arith.constant 0 : index
    %348 = vector.load %arg19[%c0_100, %c0_101] : memref<3x72xf32, #tpu.memory_space<vmem>>, vector<3x72xf32>
    %cst_102 = arith.constant dense<0.000000e+00> : vector<3x512xf32>
    %349 = tpu.matmul %348, %347, %cst_102 {dimension_numbers = #tpu.dot_dimension_numbers<[1], [0], [0], [1], [0, 0, 1, 1], [], []>} : vector<3x72xf32>, vector<72x512xf32>, vector<3x512xf32> -> vector<3x512xf32>
    %c0_103 = arith.constant 0 : index
    %c0_104 = arith.constant 0 : index
    %350 = vector.load %arg20[%c0_103, %c0_104] : memref<3x1xf32, #tpu.memory_space<vmem>>, vector<3x1xf32>
    %351 = vector.broadcast %350 : vector<3x1xf32> to vector<3x512xf32>
    %352 = arith.addf %349, %351 : vector<3x512xf32>
    %c0_105 = arith.constant 0 : index
    %c0_106 = arith.constant 0 : index
    %353 = vector.load %arg23[%c0_105, %c0_106] : memref<3x512xf32, #tpu.memory_space<vmem>>, vector<3x512xf32>
    tpu.vector_store %arg23[%c0_105, %c0_106], %352 {strides = array<i32>} : memref<3x512xf32, #tpu.memory_space<vmem>>, vector<3x512xf32>,
    %c0_107 = arith.constant 0 : index
    %c0_108 = arith.constant 0 : index
    %354 = vector.load %arg3[%c0_107, %c0_108] : memref<512x2xf32, #tpu.memory_space<vmem>>, vector<512x2xf32>
    %cst_109 = arith.constant dense<0.000000e+00> : vector<8x2xf32>
    %355 = tpu.matmul %274, %354, %cst_109 {dimension_numbers = #tpu.dot_dimension_numbers<[1], [0], [0], [1], [0, 0, 1, 1], [], []>} : vector<8x512xf32>, vector<512x2xf32>, vector<8x2xf32> -> vector<8x2xf32>
    %c0_110 = arith.constant 0 : index
    %c0_111 = arith.constant 0 : index
    %356 = vector.load %arg21[%c0_110, %c0_111] : memref<8x8xf32, #tpu.memory_space<vmem>>, vector<8x8xf32>
    %cst_112 = arith.constant dense<0.000000e+00> : vector<8x2xf32>
    %357 = tpu.matmul %356, %355, %cst_112 {dimension_numbers = #tpu.dot_dimension_numbers<[1], [0], [0], [1], [0, 0, 1, 1], [], []>} : vector<8x8xf32>, vector<8x2xf32>, vector<8x2xf32> -> vector<8x2xf32>
    %c0_113 = arith.constant 0 : index
    %c0_114 = arith.constant 0 : index
    %358 = vector.load %arg22[%c0_113, %c0_114] : memref<8x1xf32, #tpu.memory_space<vmem>>, vector<8x1xf32>
    %359 = vector.broadcast %358 : vector<8x1xf32> to vector<8x2xf32>
    %360 = arith.addf %357, %359 : vector<8x2xf32>
    %c0_115 = arith.constant 0 : index
    %c0_116 = arith.constant 0 : index
    %361 = vector.load %arg24[%c0_115, %c0_116] : memref<8x2xf32, #tpu.memory_space<vmem>>, vector<8x2xf32>
    tpu.vector_store %arg24[%c0_115, %c0_116], %360 {strides = array<i32>} : memref<8x2xf32, #tpu.memory_space<vmem>>, vector<8x2xf32>,
    return
  }
}

</mosaic_0001>

<bundles_post_ra>
// kernel: ssm_forward.1
= control target key start
LH: loop header
LB: loop body
LE: loop exit
PB: predicated region body
PF: predicated region fallthrough
CT: control target
= control target key end

     0   :  { %s9630_s29 = smov 112   ;;  %v9602_v9 = vmov 0.0   ;;  %s9634_s28 = smov 111   ;;  %v124_v10 = vlaneseq  ;;  %vm885_vm8 = vcmask 588800   ;;  %vm2551_vm9 = vcmask 719872   ;;  %s9574_s0 = inlined_call_operand.vmem [shape: f32[8,1536], index: 0, kind: input, shape index: {}]   ;;  %s9575_s4 = inlined_call_operand.vmem [shape: f32[8,1536], index: 4, kind: input, shape index: {}]   ;;  %s9576_s6 = inlined_call_operand.vmem [shape: f32[8,1], index: 6, kind: input, shape index: {}]   ;;  %s9577_s5 = inlined_call_operand.vmem [shape: f32[8,72], index: 5, kind: input, shape index: {}]   ;;  %s9578_s8 = inlined_call_operand.vmem [shape: f32[8,1], index: 8, kind: input, shape index: {}]   ;;  %s9579_s7 = inlined_call_operand.vmem [shape: f32[8,72], index: 7, kind: input, shape index: {}]   ;;  %s9580_s9 = inlined_call_operand.vmem [shape: f32[8,216], index: 9, kind: input, shape index: {}]   ;;  %s9581_s10 = inlined_call_operand.vmem [shape: f32[8,1], index: 10, kind: input, shape index: {}]   ;;  %s9582_s2 = inlined_call_operand.vmem [shape: f32[2,512], index: 2, kind: input, shape index: {}]   ;;  %s9583_s1 = inlined_call_operand.vmem [shape: f32[8,2], index: 1, kind: input, shape index: {}]   ;;  %s9584_s12 = inlined_call_operand.vmem [shape: f32[8,1], index: 12, kind: input, shape index: {}]   ;;  %s9585_s11 = inlined_call_operand.vmem [shape: f32[8,144], index: 11, kind: input, shape index: {}]   ;;  %s9586_s13 = inlined_call_operand.vmem [shape: f32[8,216], index: 13, kind: input, shape index: {}]   ;;  %s9587_s14 = inlined_call_operand.vmem [shape: f32[8,1], index: 14, kind: input, shape index: {}]   ;;  %s9588_s16 = inlined_call_operand.vmem [shape: f32[8,1], index: 16, kind: input, shape index: {}]   ;;  %s9589_s15 = inlined_call_operand.vmem [shape: f32[8,72], index: 15, kind: input, shape index: {}]   ;;  %s9590_s18 = inlined_call_operand.vmem [shape: f32[8,1], index: 18, kind: input, shape index: {}]   ;;  %s9591_s17 = inlined_call_operand.vmem [shape: f32[8,72], index: 17, kind: input, shape index: {}]   ;;  %s9592_s20 = inlined_call_operand.vmem [shape: f32[3,1], index: 20, kind: input, shape index: {}]   ;;  %s9593_s22 = inlined_call_operand.vmem [shape: f32[8,1], index: 22, kind: input, shape index: {}]   ;;  %s9594_s3 = inlined_call_operand.vmem [shape: f32[512,2], index: 3, kind: input, shape index: {}]   ;;  %s9595_s19 = inlined_call_operand.vmem [shape: f32[3,72], index: 19, kind: input, shape index: {}]   ;;  %s9596_s23 = inlined_call_operand.vmem [shape: f32[3,512], index: 23, kind: output, shape index: {0}]   ;;  %s9597_s21 = inlined_call_operand.vmem [shape: f32[8,8], index: 21, kind: input, shape index: {}]   ;;  %s9598_s24 = inlined_call_operand.vmem [shape: f32[8,2], index: 24, kind: output, shape index: {1}]  }
   0x1   :  { %9868 = sst [smem:[#allocation123_spill]] %s9574_s0  ;;  %953 = vmatprep.mubr.f32.mxu0 %v9602_v9  ;;  %1024 = vmatprep.mubr.f32.mxu1 %v9602_v9  ;;  %s9983_s26 = smov 112   ;;  %vm2725_vm10 = vcmask 1041408   ;;  %vm2721_vm11 = vcmask 15360   ;;  %vm3044_vm12 = vcmask 130048   ;;  %vm5394_vm13 = vmmov 0  }
   0x2   :  { %9869 = sst [smem:[#allocation124_spill]] %s9575_s4  ;;  %s9877_s27 = sld [smem:[#allocation123_spill]]  ;;  %v5683_v11 = vshrl.u32 %v124_v10, 7  ;;  %v5690_v15 = vand.u32 127, %v124_v10  ;;  %vm4544_vm14 = vcmask 64512  }
   0x3   :  { %9870 = sst [smem:[#allocation125_spill]] %s9576_s6  ;;  %s5383_s6 = smov 17  }
   0x4   :  { %9871 = sst [smem:[#allocation126_spill]] %s9577_s5  ;;  %s5386_s4 = smov 1   ;;  %9878 = vst [vmem:[#allocation2_spill] sm:$0xff] %v5683_v11  ;;  %v5697_v16 = vsub.s32 0, %v5683_v11  ;;  %v5700_v17 = vsub.s32 1, %v5683_v11  ;;  %vm126_vm0 = vcmp.lt.s32.totalorder %v5690_v15, 17 }
   0x5   :  { %9872 = sst [smem:[#allocation127_spill]] %s9578_s8  ;;  %s5385_s8 = smov 15   ;;  %vm223_vm1 = vcmp.lt.s32.totalorder %v5690_v15, 16  ;;  %v5814_v61 = vsub.s32 2, %v5683_v11  ;;  %v5821_v62 = vsub.s32 3, %v5683_v11  ;;  %vm320_vm2 = vcmp.lt.s32.totalorder %v5690_v15, 15 }
   0x6   :  { %9873 = sst [smem:[#allocation128_spill]] %s9579_s7  ;;  %s9632_s7 = smov 127   ;;  %vm417_vm3 = vcmp.lt.s32.totalorder %v5690_v15, 1  ;;  %vm514_vm4 = vcmp.lt.s32.totalorder %v5690_v15, 127  ;;  %vm611_vm5 = vcmp.lt.s32.totalorder %v5690_v15, 113  ;;  %vm708_vm6 = vcmp.lt.s32.totalorder %v5690_v15, 112 }
   0x7   :  { %9874 = sst [smem:[#allocation129_spill]] %s9580_s9  ;;  %s5388_s9 = smov 113   ;;  %vm805_vm7 = vcmp.lt.s32.totalorder %v5690_v15, 111 }
   0x8   :  { %9875 = sst [smem:[#allocation130_spill]] %s9581_s10  ;;  %v5523_v0 = vld [vmem:[%s9877_s27 + $0x10] sm:$0xff]  ;;  %v5528_v1 = vld [vmem:[%s9877_s27] sm:$0xff]  ;;  %v5537_v2 = vld [vmem:[%s9877_s27 + $0x18] sm:$0xff]  ;;  %s9879_s25 = sld [smem:[#allocation124_spill]] }
   0x9   :  { %9876 = sst [smem:[#allocation131_spill]] %s9582_s2  ;;  %104 = vrot.lane.b32.xlu1 %v5523_v0, %s5383_s6  ;;  %100 = vrot.lane.b32.xlu0 %v5528_v1, %s5383_s6  ;;  %v5542_v3 = vld [vmem:[%s9877_s27 + $0x8] sm:$0xff]  ;;  %s5384_s2 = smov 16   ;;  %v5559_v4 = vld [vmem:[%s9877_s27 + $0x58] sm:$0xff] }
   0xa   :  { %v5592_v5 = vld [vmem:[%s9877_s27 + $0x20] sm:$0xff]  ;;  %v5625_v6 = vld [vmem:[%s9877_s27 + $0x30] sm:$0xff]  ;;  %v5630_v7 = vld [vmem:[%s9877_s27 + $0x28] sm:$0xff]  ;;  %s9909_s10 = sld [smem:[#allocation125_spill]]  ;;  %s9982_s5 = smov 127  }
   0xb   :  { %v5639_v8 = vld [vmem:[%s9877_s27 + $0x38] sm:$0xff]  ;;  %v5688_v12 = vld [vmem:[%s9877_s27 + $0x40] sm:$0xff]  ;;  %v5811_v57 = vld [vmem:[%s9877_s27 + $0x48] sm:$0xff]  ;;  %s10238_s0 = sld [smem:[#allocation131_spill]] }
   0xc   :  { %v5826_v63 = vld [vmem:[%s9877_s27 + $0x50] sm:$0xff] }
   0xd   :  { %106 = vrot.lane.b32.xlu1 %v5537_v2, %s5383_s6  ;;  %102 = vrot.lane.b32.xlu0 %v5542_v3, %s5383_s6 }
   0xe   :  { %v5705_v18 = vld [vmem:[%s9879_s25 + $0x8] sm:$0xff]  ;;  %v5713_v21 = vld [vmem:[%s9879_s25 + $0x18] sm:$0xff]  ;;  %v5731_v24 = vld [vmem:[%s9879_s25 + $0x10] sm:$0xff] }
   0xf   :  { %v5722_v22 = vrot.slane %v5705_v18, %v5697_v16  ;;  %v5726_v23 = vrot.slane %v5705_v18, %v5700_v17  ;;  %v5737_v28 = vrot.slane %v5713_v21, %v5697_v16  ;;  %v5743_v30 = vrot.slane %v5713_v21, %v5700_v17  ;;  %v5756_v33 = vld [vmem:[%s9879_s25] sm:$0xff] }
  0x10   :  { %v5747_v31 = vrot.slane %v5731_v24, %v5697_v16  ;;  %v5751_v32 = vrot.slane %v5731_v24, %v5700_v17  ;;  %v5773_v41 = vrot.slane %v5756_v33, %v5697_v16  ;;  %v5783_v45 = vrot.slane %v5756_v33, %v5700_v17 }
  0x11   :  { %201 = vrot.lane.b32.xlu1 %v5542_v3, %s5384_s2  ;;  %199 = vrot.lane.b32.xlu0 %v5528_v1, %s5384_s2  ;;  %9880 = vst [vmem:[#allocation3_spill] sm:$0xff] %v5722_v22  ;;  %9881 = vst [vmem:[#allocation4_spill] sm:$0xff] %v5726_v23 }
  0x12   :  { %9882 = vst [vmem:[#allocation5_spill] sm:$0xff] %v5737_v28  ;;  %9883 = vst [vmem:[#allocation6_spill] sm:$0xff] %v5743_v30 }
  0x13   :  { %9884 = vst [vmem:[#allocation7_spill] sm:$0xff] %v5747_v31  ;;  %9885 = vst [vmem:[#allocation8_spill] sm:$0xff] %v5751_v32 }
  0x14   :  { %9886 = vst [vmem:[#allocation9_spill] sm:$0xff] %v5773_v41  ;;  %9887 = vst [vmem:[#allocation10_spill] sm:$0xff] %v5783_v45 }
  0x15   :  { %205 = vrot.lane.b32.xlu1 %v5537_v2, %s5384_s2  ;;  %203 = vrot.lane.b32.xlu0 %v5523_v0, %s5384_s2 }
  0x19   :  { %221 = vrot.lane.b32.xlu1 %v5559_v4, %s5384_s2  ;;  %122 = vrot.lane.b32.xlu0 %v5559_v4, %s5383_s6 }
  0x1d   :  { %298 = vrot.lane.b32.xlu1 %v5542_v3, %s5385_s8  ;;  %296 = vrot.lane.b32.xlu0 %v5528_v1, %s5385_s8 }
  0x21   :  { %302 = vrot.lane.b32.xlu1 %v5537_v2, %s5385_s8  ;;  %300 = vrot.lane.b32.xlu0 %v5523_v0, %s5385_s8 }
  0x25   :  { %395 = vrot.lane.b32.xlu1 %v5542_v3, %s5386_s4  ;;  %393 = vrot.lane.b32.xlu0 %v5528_v1, %s5386_s4 }
  0x29   :  { %399 = vrot.lane.b32.xlu1 %v5537_v2, %s5386_s4  ;;  %397 = vrot.lane.b32.xlu0 %v5523_v0, %s5386_s4 }
  0x2d   :  { %415 = vrot.lane.b32.xlu1 %v5559_v4, %s5386_s4  ;;  %318 = vrot.lane.b32.xlu0 %v5559_v4, %s5385_s8 }
  0x31   :  { %494 = vrot.lane.b32.xlu1 %v5523_v0, %s9632_s7  ;;  %492 = vrot.lane.b32.xlu0 %v5542_v3, %s9632_s7 }
  0x35   :  { %498 = vrot.lane.b32.xlu1 %v5592_v5, %s9632_s7  ;;  %496 = vrot.lane.b32.xlu0 %v5537_v2, %s9632_s7 }
  0x39   :  { %589 = vrot.lane.b32.xlu1 %v5542_v3, %s5388_s9  ;;  %490 = vrot.lane.b32.xlu0 %v5528_v1, %s9632_s7 }
  0x3d   :  { %593 = vrot.lane.b32.xlu1 %v5537_v2, %s5388_s9  ;;  %591 = vrot.lane.b32.xlu0 %v5523_v0, %s5388_s9 }
  0x41   :  { %686 = vrot.lane.b32.xlu1 %v5542_v3, %s9630_s29  ;;  %595 = vrot.lane.b32.xlu0 %v5592_v5, %s5388_s9 }
  0x45   :  { %690 = vrot.lane.b32.xlu1 %v5537_v2, %s9630_s29  ;;  %688 = vrot.lane.b32.xlu0 %v5523_v0, %s9630_s29 }
  0x49   :  { %587 = vrot.lane.b32.xlu1 %v5528_v1, %s5388_s9  ;;  %692 = vrot.lane.b32.xlu0 %v5592_v5, %s9630_s29 }
  0x4d   :  { %108 = vrot.lane.b32.xlu1 %v5592_v5, %s5383_s6  ;;  %684 = vrot.lane.b32.xlu0 %v5528_v1, %s9630_s29 }
  0x51   :  { %112 = vrot.lane.b32.xlu1 %v5625_v6, %s5383_s6  ;;  %110 = vrot.lane.b32.xlu0 %v5630_v7, %s5383_s6 }
  0x55   :  { %207 = vrot.lane.b32.xlu1 %v5592_v5, %s5384_s2  ;;  %114 = vrot.lane.b32.xlu0 %v5639_v8, %s5383_s6 }
  0x59   :  { %211 = vrot.lane.b32.xlu1 %v5625_v6, %s5384_s2  ;;  %209 = vrot.lane.b32.xlu0 %v5630_v7, %s5384_s2 }
  0x5d   :  { %783 = vrot.lane.b32.xlu1 %v5542_v3, %s9634_s28  ;;  %213 = vrot.lane.b32.xlu0 %v5639_v8, %s5384_s2 }
  0x61   :  { %787 = vrot.lane.b32.xlu1 %v5537_v2, %s9634_s28  ;;  %785 = vrot.lane.b32.xlu0 %v5523_v0, %s9634_s28 }
  0x65   :  { %781 = vrot.lane.b32.xlu1 %v5528_v1, %s9634_s28  ;;  %789 = vrot.lane.b32.xlu0 %v5592_v5, %s9634_s28 }
  0x69   :  { %306 = vrot.lane.b32.xlu1 %v5630_v7, %s5385_s8  ;;  %304 = vrot.lane.b32.xlu0 %v5592_v5, %s5385_s8 }
  0x6d   :  { %310 = vrot.lane.b32.xlu1 %v5639_v8, %s5385_s8  ;;  %308 = vrot.lane.b32.xlu0 %v5625_v6, %s5385_s8 }
  0x71   :  { %403 = vrot.lane.b32.xlu1 %v5630_v7, %s5386_s4  ;;  %401 = vrot.lane.b32.xlu0 %v5592_v5, %s5386_s4 }
  0x75   :  { %407 = vrot.lane.b32.xlu1 %v5639_v8, %s5386_s4  ;;  %405 = vrot.lane.b32.xlu0 %v5625_v6, %s5386_s4 }
  0x79   :  { %502 = vrot.lane.b32.xlu1 %v5625_v6, %s9632_s7  ;;  %500 = vrot.lane.b32.xlu0 %v5630_v7, %s9632_s7 }
  0x7b   :  { %v105_v13 = vpop.permute.xlu1 %104  ;;  %v101_v14 = vpop.permute.xlu0 %100 }
  0x7d   :  { %506 = vrot.lane.b32.xlu1 %v5688_v12, %s9632_s7  ;;  %504 = vrot.lane.b32.xlu0 %v5639_v8, %s9632_s7 }
  0x7f   :  { %v5707_v19 = vpop.permute.xlu1 %106  ;;  %v103_v20 = vpop.permute.xlu0 %102 }
  0x80   :  { %v137_v25 = vsel %vm126_vm0, %v101_v14, %v103_v20  ;;  %v135_v36 = vsel %vm126_vm0, %v105_v13, %v5707_v19  ;;  %v136_v37 = vsel %vm126_vm0, %v103_v20, %v105_v13  ;;  %v5842_v20 = vrot.slane %v5705_v18, %v5821_v62 }
  0x81   :  { %599 = vrot.lane.b32.xlu1 %v5625_v6, %s5388_s9  ;;  %597 = vrot.lane.b32.xlu0 %v5630_v7, %s5388_s9  ;;  %v188_v34 = vmul.f32 %v5722_v22, %v137_v25  ;;  %v190_v43 = vmul.f32 %v5737_v28, %v135_v36  ;;  %v189_v47 = vmul.f32 %v5747_v31, %v136_v37 }
  0x82   :  { %9889 = vst [vmem:[#allocation12_spill] sm:$0xff] %v5842_v20  ;;  %v5858_v36 = vrot.slane %v5731_v24, %v5821_v62  ;;  %v5862_v37 = vrot.slane %v5713_v21, %v5821_v62 }
  0x83   :  { %v202_v26 = vpop.permute.xlu1 %201  ;;  %v200_v27 = vpop.permute.xlu0 %199 }
  0x84   :  { %v234_v29 = vsel %vm223_vm1, %v200_v27, %v202_v26  ;;  %9892 = vst [vmem:[#allocation15_spill] sm:$0xff] %v5858_v36  ;;  %9893 = vst [vmem:[#allocation16_spill] sm:$0xff] %v5862_v37 }
  0x85   :  { %603 = vrot.lane.b32.xlu1 %v5688_v12, %s5388_s9  ;;  %601 = vrot.lane.b32.xlu0 %v5639_v8, %s5388_s9  ;;  %v285_v35 = vmul.f32 %v5726_v23, %v234_v29 }
  0x87   :  { %v5769_v38 = vpop.permute.xlu1 %205  ;;  %v204_v39 = vpop.permute.xlu0 %203  ;;  %v4735_v40 = vpack.c.bf16 %v285_v35, %v188_v34  ;;  %v5852_v34 = vrot.slane %v5713_v21, %v5814_v61 }
  0x88   :  { %v233_v42 = vsel %vm223_vm1, %v202_v26, %v204_v39  ;;  %v232_v44 = vsel %vm223_vm1, %v204_v39, %v5769_v38  ;;  %v5848_v26 = vrot.slane %v5731_v24, %v5814_v61 }
  0x89   :  { %696 = vrot.lane.b32.xlu1 %v5625_v6, %s9630_s29  ;;  %694 = vrot.lane.b32.xlu0 %v5630_v7, %s9630_s29  ;;  %v287_v46 = vmul.f32 %v5743_v30, %v232_v44  ;;  %v286_v48 = vmul.f32 %v5751_v32, %v233_v42  ;;  %9891 = vst [vmem:[#allocation14_spill] sm:$0xff] %v5852_v34 }
  0x8a   :  { %4736 = vmatprep.subr.bf16.mxu0 %v4735_v40  ;;  %9890 = vst [vmem:[#allocation13_spill] sm:$0xff] %v5848_v26 }
  0x8b   :  { %v5792_v49 = vpop.permute.xlu1 %221  ;;  %v5794_v50 = vpop.permute.xlu0 %122  ;;  %v4751_v51 = vpack.c.bf16 %v287_v46, %v190_v43  ;;  %v4753_v52 = vpack.c.bf16 %v286_v48, %v189_v47  ;;  %v5879_v48 = vrot.slane %v5756_v33, %v5821_v62 }
  0x8c   :  { %v235_v53 = vsel %vm223_vm1, %v5792_v49, %v200_v27  ;;  %v138_v54 = vsel %vm126_vm0, %v5794_v50, %v101_v14  ;;  %v5834_v14 = vrot.slane %v5705_v18, %v5814_v61 }
  0x8d   :  { %700 = vrot.lane.b32.xlu1 %v5688_v12, %s9630_s29  ;;  %698 = vrot.lane.b32.xlu0 %v5639_v8, %s9630_s29  ;;  %v187_v55 = vmul.f32 %v5773_v41, %v138_v54  ;;  %v284_v56 = vmul.f32 %v5783_v45, %v235_v53  ;;  %9894 = vst [vmem:[#allocation17_spill] sm:$0xff] %v5879_v48 }
  0x8e   :  { %4752 = vmatprep.subr.bf16.mxu1 %v4751_v51  ;;  %9888 = vst [vmem:[#allocation11_spill] sm:$0xff] %v5834_v14  ;;  %v5889_v54 = vrot.slane %v5756_v33, %v5814_v61 }
  0x8f   :  { %4754 = vmatpush1.bf16.msra.mxu1 %v4753_v52  ;;  %v299_v58 = vpop.permute.xlu1 %298  ;;  %v297_v59 = vpop.permute.xlu0 %296  ;;  %v4737_v60 = vpack.c.bf16 %v284_v56, %v187_v55 }
  0x90   :  { %v331_v25 = vsel %vm320_vm2, %v297_v59, %v299_v58  ;;  %9895 = vst [vmem:[#allocation18_spill] sm:$0xff] %v5889_v54 }
  0x91   :  { %118 = vrot.lane.b32.xlu1 %v5811_v57, %s5383_s6  ;;  %116 = vrot.lane.b32.xlu0 %v5688_v12, %s5383_s6  ;;  %v382_v39 = vmul.f32 %v5834_v14, %v331_v25 }
  0x92   :  { %4738 = vmatpush1.bf16.msra.mxu0 %v4737_v60  ;;  %v5899_v60 = vsub.s32 4, %v5683_v11 }
  0x93   :  { %v5829_v10 = vpop.permute.xlu1 %302  ;;  %v301_v13 = vpop.permute.xlu0 %300 }
  0x94   :  { %v330_v40 = vsel %vm320_vm2, %v299_v58, %v301_v13  ;;  %v329_v43 = vsel %vm320_vm2, %v301_v13, %v5829_v10 }
  0x95   :  { %215 = vrot.lane.b32.xlu1 %v5688_v12, %s5384_s2  ;;  %120 = vrot.lane.b32.xlu0 %v5826_v63, %s5383_s6  ;;  %v383_v51 = vmul.f32 %v5848_v26, %v330_v40  ;;  %v384_v55 = vmul.f32 %v5852_v34, %v329_v43 }
  0x97   :  { %v396_v27 = vpop.permute.xlu1 %395  ;;  %v394_v29 = vpop.permute.xlu0 %393 }
  0x98   :  { %v428_v35 = vsel %vm417_vm3, %v394_v29, %v396_v27 }
  0x99   :  { %v479_v42 = vmul.f32 %v5842_v20, %v428_v35  ;;  %219 = vrot.lane.b32.xlu1 %v5826_v63, %s5384_s2  ;;  %217 = vrot.lane.b32.xlu0 %v5811_v57, %s5384_s2 }
  0x9b   :  { %v5875_v44 = vpop.permute.xlu1 %399  ;;  %v398_v46 = vpop.permute.xlu0 %397  ;;  %v4739_v47 = vpack.c.bf16 %v479_v42, %v382_v39 }
  0x9c   :  { %v426_v52 = vsel %vm417_vm3, %v398_v46, %v5875_v44  ;;  %v427_v53 = vsel %vm417_vm3, %v396_v27, %v398_v46  ;;  %v5920_v46 = vrot.slane %v5705_v18, %v5899_v60 }
  0x9d   :  { %v480_v56 = vmul.f32 %v5858_v36, %v427_v53  ;;  %v481_v58 = vmul.f32 %v5862_v37, %v426_v52  ;;  %793 = vrot.lane.b32.xlu1 %v5625_v6, %s9634_s28  ;;  %791 = vrot.lane.b32.xlu0 %v5630_v7, %s9634_s28  ;;  %v5931_v53 = vrot.slane %v5731_v24, %v5899_v60 }
  0x9e   :  { %4740 = vmatprep.subr.bf16.mxu0 %v4739_v47  ;;  %9896 = vst [vmem:[#allocation19_spill] sm:$0xff] %v5920_v46 }
  0x9f   :  { %v5901_v13 = vpop.permute.xlu1 %415  ;;  %v5903_v25 = vpop.permute.xlu0 %318  ;;  %v4755_v27 = vpack.c.bf16 %v481_v58, %v384_v55  ;;  %v4757_v35 = vpack.c.bf16 %v480_v56, %v383_v51  ;;  %9897 = vst [vmem:[#allocation20_spill] sm:$0xff] %v5931_v53  ;;  %v5935_v55 = vrot.slane %v5713_v21, %v5899_v60 }
  0xa0   :  { %v429_v39 = vsel %vm417_vm3, %v5901_v13, %v394_v29  ;;  %v332_v40 = vsel %vm320_vm2, %v5903_v25, %v297_v59 }
  0xa1   :  { %v478_v42 = vmul.f32 %v5879_v48, %v429_v39  ;;  %v381_v43 = vmul.f32 %v5889_v54, %v332_v40  ;;  %797 = vrot.lane.b32.xlu1 %v5688_v12, %s9634_s28  ;;  %795 = vrot.lane.b32.xlu0 %v5639_v8, %s9634_s28  ;;  %9898 = vst [vmem:[#allocation21_spill] sm:$0xff] %v5935_v55 }
  0xa2   :  { %4756 = vmatprep.subr.bf16.mxu1 %v4755_v27 }
  0xa3   :  { %4758 = vmatpush1.bf16.msra.mxu1 %v4757_v35  ;;  %v495_v29 = vpop.permute.xlu1 %494  ;;  %v493_v59 = vpop.permute.xlu0 %492  ;;  %v4741_v47 = vpack.c.bf16 %v478_v42, %v381_v43 }
  0xa4   :  { %v524_v51 = vsel %vm514_vm4, %v493_v59, %v495_v29 }
  0xa5   :  { %v576_v52 = vmul.f32 %v5920_v46, %v524_v51  ;;  %314 = vrot.lane.b32.xlu1 %v5811_v57, %s5385_s8  ;;  %312 = vrot.lane.b32.xlu0 %v5688_v12, %s5385_s8 }
  0xa6   :  { %4742 = vmatpush1.bf16.msra.mxu0 %v4741_v47 }
  0xa7   :  { %v5937_v56 = vpop.permute.xlu1 %498  ;;  %v497_v58 = vpop.permute.xlu0 %496  ;;  %v4743_v27 = vpack.c.bf16 %v576_v52, %v5542_v3  ;;  %v5953_v3 = vrot.slane %v5756_v33, %v5899_v60 }
  0xa8   :  { %v522_v35 = vsel %vm514_vm4, %v497_v58, %v5937_v56  ;;  %v523_v39 = vsel %vm514_vm4, %v495_v29, %v497_v58 }
  0xa9   :  { %v577_v40 = vmul.f32 %v5931_v53, %v523_v39  ;;  %v578_v42 = vmul.f32 %v5935_v55, %v522_v35  ;;  %409 = vrot.lane.b32.xlu1 %v5688_v12, %s5386_s4  ;;  %316 = vrot.lane.b32.xlu0 %v5826_v63, %s5385_s8  ;;  %9899 = vst [vmem:[#allocation22_spill] sm:$0xff] %v5953_v3  ;;  %v5392_v39 = vmov 0  }
  0xaa   :  { %4744 = vmatprep.subr.bf16.mxu0 %v4743_v27  ;;  %5379 = vset.pattern.permute.xlu0 %v5392_v39 }
  0xab   :  { %v590_v43 = vpop.permute.xlu1 %589  ;;  %v5955_v47 = vpop.permute.xlu0 %490  ;;  %v4759_v29 = vpack.c.bf16 %v578_v42, %v5537_v2  ;;  %v4761_v51 = vpack.c.bf16 %v577_v40, %v5523_v0  ;;  %v5969_v0 = vsub.s32 5, %v5683_v11  ;;  %5380 = vset.pattern.permute.xlu1 %v5392_v39 }
  0xac   :  { %v525_v52 = vsel %vm514_vm4, %v5955_v47, %v493_v59  ;;  %v5976_v59 = vsub.s32 6, %v5683_v11 }
  0xad   :  { %v575_v58 = vmul.f32 %v5953_v3, %v525_v52  ;;  %413 = vrot.lane.b32.xlu1 %v5826_v63, %s5386_s4  ;;  %411 = vrot.lane.b32.xlu0 %v5811_v57, %s5386_s4  ;;  %v6033_v14 = vrot.slane %v5756_v33, %v5969_v0 }
  0xae   :  { %4760 = vmatprep.subr.bf16.mxu1 %v4759_v29  ;;  %v5992_v29 = vrot.slane %v5705_v18, %v5976_v59  ;;  %v6002_v39 = vrot.slane %v5731_v24, %v5976_v59  ;;  %v6014_v54 = vrot.slane %v5713_v21, %v5976_v59  ;;  %v6040_v20 = vrot.slane %v5756_v33, %v5976_v59 }
  0xaf   :  { %4762 = vmatpush1.bf16.msra.mxu1 %v4761_v51  ;;  %v594_v27 = vpop.permute.xlu1 %593  ;;  %v592_v35 = vpop.permute.xlu0 %591  ;;  %v4745_v2 = vpack.c.bf16 %v575_v58, %v5528_v1  ;;  %v5984_v1 = vrot.slane %v5705_v18, %v5969_v0  ;;  %9906 = vst [vmem:[#allocation29_spill] sm:$0xff] %v6033_v14 }
  0xb0   :  { %9901 = vst [vmem:[#allocation24_spill] sm:$0xff] %v5992_v29  ;;  %v621_v51 = vsel %vm611_vm5, %v590_v43, %v592_v35  ;;  %9903 = vst [vmem:[#allocation26_spill] sm:$0xff] %v6002_v39  ;;  %v620_v41 = vsel %vm611_vm5, %v592_v35, %v594_v27 }
  0xb1   :  { %510 = vrot.lane.b32.xlu1 %v5826_v63, %s9632_s7  ;;  %508 = vrot.lane.b32.xlu0 %v5811_v57, %s9632_s7  ;;  %9900 = vst [vmem:[#allocation23_spill] sm:$0xff] %v5984_v1  ;;  %v673_v3 = vmul.f32 %v5984_v1, %v621_v51  ;;  %9904 = vst [vmem:[#allocation27_spill] sm:$0xff] %v6014_v54 }
  0xb2   :  { %4746 = vmatpush1.bf16.msra.mxu0 %v4745_v2  ;;  %v5998_v2 = vrot.slane %v5713_v21, %v5969_v0  ;;  %9907 = vst [vmem:[#allocation30_spill] sm:$0xff] %v6040_v20 }
  0xb3   :  { %v687_v40 = vpop.permute.xlu1 %686  ;;  %v5979_v42 = vpop.permute.xlu0 %595 }
  0xb4   :  { %9902 = vst [vmem:[#allocation25_spill] sm:$0xff] %v5998_v2  ;;  %v619_v46 = vsel %vm611_vm5, %v594_v27, %v5979_v42 }
  0xb5   :  { %605 = vrot.lane.b32.xlu1 %v5811_v57, %s5388_s9  ;;  %512 = vrot.lane.b32.xlu0 %v5559_v4, %s9632_s7  ;;  %v675_v55 = vmul.f32 %v5998_v2, %v619_v46  ;;  %s10008_s7 = sld [smem:[#allocation127_spill]] }
  0xb7   :  { %v691_v52 = vpop.permute.xlu1 %690  ;;  %v689_v58 = vpop.permute.xlu0 %688 }
  0xb8   :  { %v718_v9 = vsel %vm708_vm6, %v687_v40, %v689_v58  ;;  %v717_v45 = vsel %vm708_vm6, %v689_v58, %v691_v52 }
  0xb9   :  { %v770_v48 = vmul.f32 %v5992_v29, %v718_v9  ;;  %609 = vrot.lane.b32.xlu1 %v5559_v4, %s5388_s9  ;;  %607 = vrot.lane.b32.xlu0 %v5826_v63, %s5388_s9  ;;  %v6023_v9 = vrot.slane %v5731_v24, %v5969_v0  ;;  %v771_v53 = vmul.f32 %v6002_v39, %v717_v45 }
  0xbb   :  { %9905 = vst [vmem:[#allocation28_spill] sm:$0xff] %v6023_v9  ;;  %v6025_v51 = vpop.permute.xlu1 %587  ;;  %v6027_v1 = vpop.permute.xlu0 %692  ;;  %v4747_v29 = vpack.c.bf16 %v770_v48, %v673_v3  ;;  %v674_v27 = vmul.f32 %v6023_v9, %v620_v41 }
  0xbc   :  { %v716_v58 = vsel %vm708_vm6, %v691_v52, %v6027_v1  ;;  %v622_v3 = vsel %vm611_vm5, %v6025_v51, %v590_v43 }
  0xbd   :  { %v772_v48 = vmul.f32 %v6014_v54, %v716_v58  ;;  %704 = vrot.lane.b32.xlu1 %v5826_v63, %s9630_s29  ;;  %702 = vrot.lane.b32.xlu0 %v5811_v57, %s9630_s29  ;;  %v672_v58 = vmul.f32 %v6033_v14, %v622_v3  ;;  %v4765_v43 = vpack.c.bf16 %v771_v53, %v674_v27 }
  0xbe   :  { %4748 = vmatprep.subr.bf16.mxu0 %v4747_v29 }
  0xbf   :  { %v109_v35 = vpop.permute.xlu1 %108  ;;  %v6053_v52 = vpop.permute.xlu0 %684  ;;  %v4763_v46 = vpack.c.bf16 %v772_v48, %v675_v55 }
  0xc0   :  { %9908 = vst [vmem:[#allocation31_spill] sm:$0xff] %v6053_v52  ;;  %v719_v45 = vsel %vm708_vm6, %v6053_v52, %v687_v40  ;;  %v879_v40 = vld [vmem:[%s9909_s10] sm:$0xff]  ;;  %s10138_s10 = sld [smem:[#allocation129_spill]] }
  0xc1   :  { %v769_v39 = vmul.f32 %v6040_v20, %v719_v45  ;;  %799 = vrot.lane.b32.xlu1 %v5811_v57, %s9634_s28  ;;  %706 = vrot.lane.b32.xlu0 %v5559_v4, %s9630_s29  ;;  %v6089_v45 = vld [vmem:[%s9879_s25 + $0x30] sm:$0xff] }
  0xc2   :  { %4764 = vmatprep.subr.bf16.mxu1 %v4763_v46  ;;  %v6074_v46 = vsub.s32 7, %v5683_v11  ;;  %v6113_v20 = vrot.slane %v6089_v45, %v5697_v16  ;;  %v6129_v54 = vrot.slane %v6089_v45, %v5700_v17 }
  0xc3   :  { %4766 = vmatpush1.bf16.msra.mxu1 %v4765_v43  ;;  %v113_v41 = vpop.permute.xlu1 %112  ;;  %v111_v29 = vpop.permute.xlu0 %110  ;;  %v4749_v55 = vpack.c.bf16 %v769_v39, %v672_v58  ;;  %v6084_v39 = vld [vmem:[%s9879_s25 + $0x28] sm:$0xff] }
  0xc4   :  { %v6109_v14 = vrot.slane %v6084_v39, %v5697_v16  ;;  %9913 = vst [vmem:[#allocation35_spill] sm:$0xff] %v6113_v20  ;;  %v6125_v2 = vrot.slane %v6084_v39, %v5700_v17  ;;  %9917 = vst [vmem:[#allocation39_spill] sm:$0xff] %v6129_v54  ;;  %v6141_v22 = vrot.slane %v5756_v33, %v6074_v46 }
  0xc5   :  { %803 = vrot.lane.b32.xlu1 %v5559_v4, %s9634_s28  ;;  %801 = vrot.lane.b32.xlu0 %v5826_v63, %s9634_s28  ;;  %v6079_v4 = vld [vmem:[%s9879_s25 + $0x20] sm:$0xff]  ;;  %v6145_v32 = vrot.slane %v5731_v24, %v6074_v46  ;;  %v6156_v52 = vrot.slane %v5713_v21, %v6074_v46  ;;  %v134_v33 = vsel %vm126_vm0, %v5707_v19, %v109_v35  ;;  %s9922_s28 = sld [smem:[#allocation126_spill]] }
  0xc6   :  { %4750 = vmatpush1.bf16.msra.mxu0 %v4749_v55  ;;  %v6096_v55 = vld [vmem:[%s9879_s25 + $0x38] sm:$0xff]  ;;  %v6105_v11 = vrot.slane %v6079_v4, %v5697_v16  ;;  %9912 = vst [vmem:[#allocation34_spill] sm:$0xff] %v6109_v14  ;;  %v6117_v9 = vrot.slane %v6079_v4, %v5700_v17  ;;  %9916 = vst [vmem:[#allocation38_spill] sm:$0xff] %v6125_v2  ;;  %v133_v24 = vsel %vm126_vm0, %v109_v35, %v111_v29 }
  0xc7   :  { %v208_v48 = vpop.permute.xlu1 %207  ;;  %v6071_v3 = vpop.permute.xlu0 %114  ;;  %v6133_v36 = vrot.slane %v6096_v55, %v5700_v17  ;;  %9919 = vst [vmem:[#allocation41_spill] sm:$0xff] %v6141_v22  ;;  %9920 = vst [vmem:[#allocation42_spill] sm:$0xff] %v6145_v32 }
  0xc8   :  { %9911 = vst [vmem:[#allocation33_spill] sm:$0xff] %v6105_v11  ;;  %9914 = vst [vmem:[#allocation36_spill] sm:$0xff] %v6117_v9  ;;  %v231_v23 = vsel %vm223_vm1, %v5769_v38, %v208_v48 }
  0xc9   :  { %882 = vperm.xlu0 %5379, %v879_v40   ;;  %v6101_v40 = vrot.slane %v5705_v18, %v6074_v46  ;;  %v6121_v18 = vrot.slane %v6096_v55, %v5697_v16  ;;  %9918 = vst [vmem:[#allocation40_spill] sm:$0xff] %v6133_v36  ;;  %9921 = vst [vmem:[#allocation43_spill] sm:$0xff] %v6156_v52 }
  0xcb   :  { %v212_v53 = vpop.permute.xlu1 %211  ;;  %v210_v27 = vpop.permute.xlu0 %209  ;;  %9910 = vst [vmem:[#allocation32_spill] sm:$0xff] %v6101_v40  ;;  %9915 = vst [vmem:[#allocation37_spill] sm:$0xff] %v6121_v18 }
  0xcc   :  { %v230_v34 = vsel %vm223_vm1, %v208_v48, %v210_v27  ;;  %v229_v38 = vsel %vm223_vm1, %v210_v27, %v212_v53  ;;  %v132_v48 = vsel %vm126_vm0, %v111_v29, %v113_v41 }
  0xcd   :  { %v289_v21 = vmul.f32 %v6125_v2, %v230_v34 }
  0xcf   :  { %v784_v58 = vpop.permute.xlu1 %783  ;;  %v6091_v43 = vpop.permute.xlu0 %213 }
  0xd0   :  { %v228_v30 = vsel %vm223_vm1, %v212_v53, %v6091_v43  ;;  %v288_v53 = vmul.f32 %v6117_v9, %v231_v23  ;;  %v6192_v23 = vld [vmem:[%s9922_s28] sm:$0xff]  ;;  %s10140_s28 = sld [smem:[#allocation130_spill]] }
  0xd1   :  { %v291_v27 = vmul.f32 %v6133_v36, %v228_v30  ;;  %v191_v30 = vmul.f32 %v6105_v11, %v134_v33 }
  0xd3   :  { %v788_v26 = vpop.permute.xlu1 %787  ;;  %v786_v37 = vpop.permute.xlu0 %785 }
  0xd4   :  { %v815_v31 = vsel %vm805_vm7, %v784_v58, %v786_v37 }
  0xd5   :  { %v867_v28 = vmul.f32 %v6101_v40, %v815_v31  ;;  %v131_v31 = vsel %vm126_vm0, %v113_v41, %v6071_v3  ;;  %v814_v40 = vsel %vm805_vm7, %v786_v37, %v788_v26  ;;  %v192_v41 = vmul.f32 %v6109_v14, %v133_v24 }
  0xd6   :  { %v290_v37 = vmul.f32 %v6129_v54, %v229_v38  ;;  %v868_v9 = vmul.f32 %v6145_v32, %v814_v40  ;;  %v6204_v40 = vrot.slane %v6084_v39, %v5814_v61 }
  0xd7   :  { %v6173_v19 = vpop.permute.xlu1 %781  ;;  %905 = vmatprep.subr.mxu0 %v867_v28  ;;  %v6175_v35 = vpop.permute.xlu0 %789 }
  0xd8   :  { %v816_v29 = vsel %vm805_vm7, %v6173_v19, %v784_v58  ;;  %v813_v34 = vsel %vm805_vm7, %v788_v26, %v6175_v35  ;;  %v194_v58 = vmul.f32 %v6121_v18, %v131_v31  ;;  %v193_v26 = vmul.f32 %v6113_v20, %v132_v48  ;;  %9923 = vst [vmem:[#allocation44_spill] sm:$0xff] %v6204_v40 }
  0xd9   :  { %v866_v28 = vmul.f32 %v6141_v22, %v816_v29  ;;  %v869_v2 = vmul.f32 %v6156_v52, %v813_v34  ;;  %v4767_v29 = vpack.c.bf16 %v289_v21, %v192_v41  ;;  %v4769_v22 = vpack.c.bf16 %v288_v53, %v191_v30 }
  0xda   :  { %v4783_v34 = vpack.c.bf16 %v291_v27, %v194_v58  ;;  %v4785_v14 = vpack.c.bf16 %v290_v37, %v193_v26  ;;  %v9924_v48 = vmov 0.0   ;;  %v6214_v31 = vrot.slane %v6079_v4, %v5814_v61 }
  0xdb   :  { %v307_v24 = vpop.permute.xlu1 %306  ;;  %906 = vmatpush1.msra.mxu0 %v866_v28  ;;  %976 = vmatprep.subr.mxu1 %v869_v2  ;;  %v305_v38 = vpop.permute.xlu0 %304  ;;  %v6230_v27 = vrot.slane %v6089_v45, %v5814_v61  ;;  %v6234_v41 = vrot.slane %v6096_v55, %v5814_v61  ;;  %v6238_v30 = vrot.slane %v6089_v45, %v5821_v62 }
  0xdc   :  { %4627 = vmatmul.mubr.msk.f32.vlgmr.msra.gmra.mrb[0].mxu0 %vm885_vm8, %v6192_v23  ;;  %977 = vmatpush1.msra.mxu1 %v868_v9  ;;  %v327_v9 = vsel %vm320_vm2, %v305_v38, %v307_v24  ;;  %9925 = vst [vmem:[#allocation45_spill] sm:$0xff] %v6214_v31  ;;  %v328_v21 = vsel %vm320_vm2, %v5829_v10, %v305_v38 }
  0xdd   :  { %4768 = vmatprep.subr.bf16.mxu0 %v4767_v29  ;;  %4628 = vmatmul.mubr.msk.f32.vlgmr.msra.gmra.mrb[0].mxu1 %vm885_vm8, %v6192_v23  ;;  %v386_v53 = vmul.f32 %v6204_v40, %v327_v9  ;;  %9928 = vst [vmem:[#allocation48_spill] sm:$0xff] %v6230_v27  ;;  %9929 = vst [vmem:[#allocation49_spill] sm:$0xff] %v6234_v41  ;;  %v385_v29 = vmul.f32 %v6214_v31, %v328_v21 }
  0xde   :  { %4770 = vmatpush1.bf16.msra.mxu0 %v4769_v22  ;;  %4784 = vmatprep.subr.bf16.mxu1 %v4783_v34  ;;  %v6218_v22 = vrot.slane %v6079_v4, %v5821_v62  ;;  %9930 = vst [vmem:[#allocation50_spill] sm:$0xff] %v6238_v30  ;;  %v6255_v40 = vrot.slane %v6096_v55, %v5821_v62 }
  0xdf   :  { %4786 = vmatpush1.bf16.msra.mxu1 %v4785_v14  ;;  %v6206_v2 = vpop.permute.xlu1 %310  ;;  %v309_v33 = vpop.permute.xlu0 %308  ;;  %1095 = vmatprep.mubr.f32.mxu0 %v9924_v48  ;;  %v6222_v14 = vrot.slane %v6084_v39, %v5821_v62  ;;  %v6355_v31 = vrot.slane %v6096_v55, %v5976_v59 }
  0xe0   :  { %1166 = vmatprep.mubr.f32.mxu1 %v9924_v48  ;;  %9926 = vst [vmem:[#allocation46_spill] sm:$0xff] %v6218_v22  ;;  %v325_v10 = vsel %vm320_vm2, %v309_v33, %v6206_v2  ;;  %v326_v58 = vsel %vm320_vm2, %v307_v24, %v309_v33  ;;  %9931 = vst [vmem:[#allocation51_spill] sm:$0xff] %v6255_v40 }
  0xe1   :  { %9927 = vst [vmem:[#allocation47_spill] sm:$0xff] %v6222_v14  ;;  %v387_v11 = vmul.f32 %v6230_v27, %v326_v58  ;;  %v388_v24 = vmul.f32 %v6234_v41, %v325_v10  ;;  %v6270_v10 = vrot.slane %v6079_v4, %v5899_v60  ;;  %v6274_v58 = vrot.slane %v6084_v39, %v5899_v60 }
  0xe2   :  { %9943 = vst [vmem:[#allocation63_spill] sm:$0xff] %v6355_v31 }
  0xe3   :  { %v404_v37 = vpop.permute.xlu1 %403  ;;  %v402_v28 = vpop.permute.xlu0 %401  ;;  %9932 = vst [vmem:[#allocation52_spill] sm:$0xff] %v6270_v10  ;;  %9933 = vst [vmem:[#allocation53_spill] sm:$0xff] %v6274_v58 }
  0xe4   :  { %v424_v26 = vsel %vm417_vm3, %v402_v28, %v404_v37  ;;  %v425_v38 = vsel %vm417_vm3, %v5875_v44, %v402_v28 }
  0xe5   :  { %v482_v34 = vmul.f32 %v6218_v22, %v425_v38  ;;  %v483_v9 = vmul.f32 %v6222_v14, %v424_v26 }
  0xe7   :  { %v4773_v33 = vpack.c.bf16 %v482_v34, %v385_v29  ;;  %v6259_v54 = vpop.permute.xlu1 %407  ;;  %v406_v20 = vpop.permute.xlu0 %405  ;;  %v4771_v36 = vpack.c.bf16 %v483_v9, %v386_v53 }
  0xe8   :  { %v422_v44 = vsel %vm417_vm3, %v406_v20, %v6259_v54  ;;  %v423_v21 = vsel %vm417_vm3, %v404_v37, %v406_v20 }
  0xe9   :  { %v484_v28 = vmul.f32 %v6238_v30, %v423_v21  ;;  %v485_v26 = vmul.f32 %v6255_v40, %v422_v44  ;;  %4772 = vmatprep.subr.bf16.mxu0 %v4771_v36  ;;  %v6285_v44 = vrot.slane %v6089_v45, %v5899_v60 }
  0xea   :  { %4774 = vmatpush1.bf16.msra.mxu0 %v4773_v33 }
  0xeb   :  { %v4789_v53 = vpack.c.bf16 %v484_v28, %v387_v11  ;;  %v503_v38 = vpop.permute.xlu1 %502  ;;  %v501_v29 = vpop.permute.xlu0 %500  ;;  %v4787_v34 = vpack.c.bf16 %v485_v26, %v388_v24  ;;  %9934 = vst [vmem:[#allocation54_spill] sm:$0xff] %v6285_v44  ;;  %v6289_v11 = vrot.slane %v6096_v55, %v5899_v60 }
  0xec   :  { %v520_v20 = vsel %vm514_vm4, %v501_v29, %v503_v38  ;;  %v521_v36 = vsel %vm514_vm4, %v5937_v56, %v501_v29 }
  0xed   :  { %v579_v37 = vmul.f32 %v6270_v10, %v521_v36  ;;  %v580_v9 = vmul.f32 %v6274_v58, %v520_v20  ;;  %4788 = vmatprep.subr.bf16.mxu1 %v4787_v34  ;;  %9935 = vst [vmem:[#allocation55_spill] sm:$0xff] %v6289_v11 }
  0xee   :  { %4790 = vmatpush1.bf16.msra.mxu1 %v4789_v53 }
  0xef   :  { %v4777_v24 = vpack.c.bf16 %v579_v37, %v5592_v5  ;;  %v6292_v33 = vpop.permute.xlu1 %506  ;;  %v505_v21 = vpop.permute.xlu0 %504  ;;  %v4775_v56 = vpack.c.bf16 %v580_v9, %v5630_v7  ;;  %v6306_v7 = vrot.slane %v6084_v39, %v5969_v0 }
  0xf0   :  { %v518_v28 = vsel %vm514_vm4, %v505_v21, %v6292_v33  ;;  %v519_v26 = vsel %vm514_vm4, %v503_v38, %v505_v21 }
  0xf1   :  { %v581_v29 = vmul.f32 %v6285_v44, %v519_v26  ;;  %v582_v34 = vmul.f32 %v6289_v11, %v518_v28  ;;  %4776 = vmatprep.subr.bf16.mxu0 %v4775_v56  ;;  %9936 = vst [vmem:[#allocation56_spill] sm:$0xff] %v6306_v7  ;;  %v6330_v28 = vrot.slane %v6089_v45, %v5969_v0 }
  0xf2   :  { %4778 = vmatpush1.bf16.msra.mxu0 %v4777_v24  ;;  %v6314_v24 = vrot.slane %v6079_v4, %v5969_v0  ;;  %v6334_v26 = vrot.slane %v6096_v55, %v5969_v0 }
  0xf3   :  { %v4793_v5 = vpack.c.bf16 %v581_v29, %v5625_v6  ;;  %v600_v53 = vpop.permute.xlu1 %599  ;;  %v598_v20 = vpop.permute.xlu0 %597  ;;  %v4791_v36 = vpack.c.bf16 %v582_v34, %v5639_v8  ;;  %v6318_v6 = vrot.slane %v6079_v4, %v5976_v59  ;;  %v6322_v8 = vrot.slane %v6084_v39, %v5976_v59  ;;  %9940 = vst [vmem:[#allocation60_spill] sm:$0xff] %v6330_v28 }
  0xf4   :  { %v617_v9 = vsel %vm611_vm5, %v598_v20, %v600_v53  ;;  %9937 = vst [vmem:[#allocation57_spill] sm:$0xff] %v6314_v24  ;;  %v618_v21 = vsel %vm611_vm5, %v5979_v42, %v598_v20  ;;  %9941 = vst [vmem:[#allocation61_spill] sm:$0xff] %v6334_v26 }
  0xf5   :  { %4792 = vmatprep.subr.bf16.mxu1 %v4791_v36  ;;  %9938 = vst [vmem:[#allocation58_spill] sm:$0xff] %v6318_v6  ;;  %9939 = vst [vmem:[#allocation59_spill] sm:$0xff] %v6322_v8  ;;  %v677_v56 = vmul.f32 %v6306_v7, %v617_v9  ;;  %v676_v7 = vmul.f32 %v6314_v24, %v618_v21 }
  0xf6   :  { %4794 = vmatpush1.bf16.msra.mxu1 %v4793_v5  ;;  %v6338_v5 = vrot.slane %v6089_v45, %v5976_v59 }
  0xf7   :  { %v6308_v37 = vpop.permute.xlu1 %603  ;;  %v602_v38 = vpop.permute.xlu0 %601 }
  0xf8   :  { %9942 = vst [vmem:[#allocation62_spill] sm:$0xff] %v6338_v5  ;;  %v615_v42 = vsel %vm611_vm5, %v602_v38, %v6308_v37  ;;  %v616_v20 = vsel %vm611_vm5, %v600_v53, %v602_v38 }
  0xf9   :  { %v678_v22 = vmul.f32 %v6330_v28, %v616_v20  ;;  %v679_v53 = vmul.f32 %v6334_v26, %v615_v42  ;;  %v6419_v28 = vrot.slane %v6084_v39, %v6074_v46 }
  0xfb   :  { %v697_v29 = vpop.permute.xlu1 %696  ;;  %v695_v34 = vpop.permute.xlu0 %694  ;;  %9949 = vst [vmem:[#allocation69_spill] sm:$0xff] %v6419_v28 }
  0xfc   :  { %v714_v36 = vsel %vm708_vm6, %v695_v34, %v697_v29  ;;  %v715_v9 = vsel %vm708_vm6, %v6027_v1, %v695_v34 }
  0xfd   :  { %v773_v10 = vmul.f32 %v6318_v6, %v715_v9  ;;  %v774_v58 = vmul.f32 %v6322_v8, %v714_v36 }
  0xff   :  { %v4781_v38 = vpack.c.bf16 %v773_v10, %v676_v7  ;;  %v6359_v14 = vpop.permute.xlu1 %700  ;;  %v699_v11 = vpop.permute.xlu0 %698  ;;  %v4779_v44 = vpack.c.bf16 %v774_v58, %v677_v56  ;;  %v6371_v58 = vld [vmem:[%s9879_s25 + $0x48] sm:$0xff] }
 0x100   :  { %v712_v1 = vsel %vm708_vm6, %v699_v11, %v6359_v14  ;;  %v713_v21 = vsel %vm708_vm6, %v697_v29, %v699_v11  ;;  %v6376_v11 = vld [vmem:[%s9879_s25 + $0x40] sm:$0xff] }
 0x101   :  { %v775_v34 = vmul.f32 %v6338_v5, %v713_v21  ;;  %v776_v36 = vmul.f32 %v6355_v31, %v712_v1  ;;  %4780 = vmatprep.subr.bf16.mxu0 %v4779_v44  ;;  %v6384_v44 = vrot.slane %v6371_v58, %v5700_v17 }
 0x102   :  { %4782 = vmatpush1.bf16.msra.mxu0 %v4781_v38  ;;  %v6396_v38 = vld [vmem:[%s9879_s25 + $0x58] sm:$0xff] }
 0x103   :  { %v4797_v20 = vpack.c.bf16 %v775_v34, %v678_v22  ;;  %v119_v42 = vpop.permute.xlu1 %118  ;;  %v117_v10 = vpop.permute.xlu0 %116  ;;  %v4795_v7 = vpack.c.bf16 %v776_v36, %v679_v53  ;;  %v6380_v22 = vrot.slane %v6371_v58, %v5697_v16  ;;  %9945 = vst [vmem:[#allocation65_spill] sm:$0xff] %v6384_v44  ;;  %v6391_v53 = vld [vmem:[%s9879_s25 + $0x50] sm:$0xff]  ;;  %v6400_v34 = vrot.slane %v6376_v11, %v5697_v16  ;;  %s10016_s25 = sld [smem:[#allocation128_spill]] }
 0x104   :  { %v129_v29 = vsel %vm126_vm0, %v117_v10, %v119_v42  ;;  %v6404_v36 = vrot.slane %v6376_v11, %v5700_v17  ;;  %v6423_v5 = vrot.slane %v6391_v53, %v5697_v16  ;;  %v130_v39 = vsel %vm126_vm0, %v6071_v3, %v117_v10 }
 0x105   :  { %4796 = vmatprep.subr.bf16.mxu1 %v4795_v7  ;;  %9944 = vst [vmem:[#allocation64_spill] sm:$0xff] %v6380_v22  ;;  %9946 = vst [vmem:[#allocation66_spill] sm:$0xff] %v6400_v34  ;;  %v6410_v7 = vrot.slane %v6079_v4, %v6074_v46  ;;  %v196_v8 = vmul.f32 %v6380_v22, %v129_v29  ;;  %v6427_v4 = vrot.slane %v6396_v38, %v5697_v16 }
 0x106   :  { %4798 = vmatpush1.bf16.msra.mxu1 %v4797_v20  ;;  %9947 = vst [vmem:[#allocation67_spill] sm:$0xff] %v6404_v36  ;;  %9950 = vst [vmem:[#allocation70_spill] sm:$0xff] %v6423_v5  ;;  %v6431_v29 = vrot.slane %v6396_v38, %v5700_v17  ;;  %v6444_v16 = vrot.slane %v6089_v45, %v6074_v46  ;;  %v6448_v22 = vrot.slane %v6096_v55, %v6074_v46 }
 0x107   :  { %v216_v56 = vpop.permute.xlu1 %215  ;;  %v121_v9 = vpop.permute.xlu0 %120  ;;  %9948 = vst [vmem:[#allocation68_spill] sm:$0xff] %v6410_v7  ;;  %9951 = vst [vmem:[#allocation71_spill] sm:$0xff] %v6427_v4 }
 0x108   :  { %v227_v6 = vsel %vm223_vm1, %v6091_v43, %v216_v56  ;;  %9952 = vst [vmem:[#allocation72_spill] sm:$0xff] %v6431_v29  ;;  %v6435_v43 = vrot.slane %v6391_v53, %v5700_v17  ;;  %9954 = vst [vmem:[#allocation74_spill] sm:$0xff] %v6444_v16 }
 0x109   :  { %9955 = vst [vmem:[#allocation75_spill] sm:$0xff] %v6448_v22  ;;  %v292_v17 = vmul.f32 %v6404_v36, %v227_v6  ;;  %v195_v6 = vmul.f32 %v6400_v34, %v130_v39 }
 0x10a   :  { %9953 = vst [vmem:[#allocation73_spill] sm:$0xff] %v6435_v43 }
 0x10b   :  { %v220_v1 = vpop.permute.xlu1 %219  ;;  %v218_v21 = vpop.permute.xlu0 %217 }
 0x10c   :  { %v226_v20 = vsel %vm223_vm1, %v216_v56, %v218_v21  ;;  %v128_v56 = vsel %vm126_vm0, %v119_v42, %v121_v9  ;;  %v224_v26 = vsel %vm223_vm1, %v220_v1, %v5792_v49  ;;  %v225_v45 = vsel %vm223_vm1, %v218_v21, %v220_v1 }
 0x10d   :  { %v293_v24 = vmul.f32 %v6384_v44, %v226_v20  ;;  %v127_v49 = vsel %vm126_vm0, %v121_v9, %v5794_v50  ;;  %v197_v36 = vmul.f32 %v6423_v5, %v128_v56  ;;  %v295_v30 = vmul.f32 %v6431_v29, %v224_v26 }
 0x10e   :  { %v294_v1 = vmul.f32 %v6435_v43, %v225_v45  ;;  %v198_v50 = vmul.f32 %v6427_v4, %v127_v49  ;;  %v6502_v45 = vrot.slane %v6396_v38, %v5814_v61  ;;  %v6515_v49 = vrot.slane %v6371_v58, %v5821_v62 }
 0x10f   :  { %v794_v20 = vpop.permute.xlu1 %793  ;;  %v792_v44 = vpop.permute.xlu0 %791  ;;  %v4799_v31 = vpack.c.bf16 %v293_v24, %v196_v8 }
 0x110   :  { %v811_v3 = vsel %vm805_vm7, %v792_v44, %v794_v20  ;;  %v812_v42 = vsel %vm805_vm7, %v6175_v35, %v792_v44  ;;  %v4801_v44 = vpack.c.bf16 %v292_v17, %v195_v6  ;;  %v4815_v56 = vpack.c.bf16 %v295_v30, %v198_v50  ;;  %9959 = vst [vmem:[#allocation79_spill] sm:$0xff] %v6502_v45 }
 0x111   :  { %v870_v10 = vmul.f32 %v6410_v7, %v812_v42  ;;  %v871_v55 = vmul.f32 %v6419_v28, %v811_v3  ;;  %v4817_v17 = vpack.c.bf16 %v294_v1, %v197_v36  ;;  %v6492_v3 = vrot.slane %v6391_v53, %v5814_v61  ;;  %9961 = vst [vmem:[#allocation81_spill] sm:$0xff] %v6515_v49 }
 0x112   :  { %v6498_v36 = vrot.slane %v6376_v11, %v5821_v62  ;;  %v6511_v6 = vrot.slane %v6396_v38, %v5821_v62  ;;  %v6530_v1 = vrot.slane %v6376_v11, %v5899_v60 }
 0x113   :  { %v6469_v27 = vpop.permute.xlu1 %797  ;;  %1047 = vmatprep.subr.mxu0 %v871_v55  ;;  %v796_v35 = vpop.permute.xlu0 %795  ;;  %9957 = vst [vmem:[#allocation77_spill] sm:$0xff] %v6492_v3 }
 0x114   :  { %v809_v24 = vsel %vm805_vm7, %v796_v35, %v6469_v27  ;;  %v810_v8 = vsel %vm805_vm7, %v794_v20, %v796_v35  ;;  %1048 = vmatpush1.msra.mxu0 %v870_v10  ;;  %9958 = vst [vmem:[#allocation78_spill] sm:$0xff] %v6498_v36  ;;  %9960 = vst [vmem:[#allocation80_spill] sm:$0xff] %v6511_v6  ;;  %v6519_v35 = vrot.slane %v6391_v53, %v5821_v62 }
 0x115   :  { %v872_v9 = vmul.f32 %v6444_v16, %v810_v8  ;;  %4629 = vmatmul.mubr.msk.f32.vlgmr.msra.gmra.mrb[2].mxu0 %vm885_vm8, %v6192_v23  ;;  %4800 = vmatprep.subr.bf16.mxu0 %v4799_v31  ;;  %v873_v26 = vmul.f32 %v6448_v22, %v809_v24  ;;  %v6488_v31 = vrot.slane %v6371_v58, %v5814_v61 }
 0x116   :  { %4802 = vmatpush1.bf16.msra.mxu0 %v4801_v44  ;;  %1237 = vmatprep.mubr.f32.mxu0 %v9924_v48  ;;  %9962 = vst [vmem:[#allocation82_spill] sm:$0xff] %v6519_v35  ;;  %v6523_v44 = vrot.slane %v6376_v11, %v5814_v61  ;;  %9964 = vst [vmem:[#allocation84_spill] sm:$0xff] %v6530_v1  ;;  %v6539_v61 = vrot.slane %v6371_v58, %v5899_v60 }
 0x117   :  { %v315_v21 = vpop.permute.xlu1 %314  ;;  %1118 = vmatprep.subr.mxu1 %v873_v26  ;;  %v313_v39 = vpop.permute.xlu0 %312  ;;  %9956 = vst [vmem:[#allocation76_spill] sm:$0xff] %v6488_v31 }
 0x118   :  { %1119 = vmatpush1.msra.mxu1 %v872_v9  ;;  %v323_v30 = vsel %vm320_vm2, %v313_v39, %v315_v21  ;;  %9963 = vst [vmem:[#allocation83_spill] sm:$0xff] %v6523_v44  ;;  %v324_v24 = vsel %vm320_vm2, %v6206_v2, %v313_v39  ;;  %9965 = vst [vmem:[#allocation85_spill] sm:$0xff] %v6539_v61 }
 0x119   :  { %4630 = vmatmul.mubr.msk.f32.vlgmr.msra.gmra.mrb[2].mxu1 %vm885_vm8, %v6192_v23  ;;  %4816 = vmatprep.subr.bf16.mxu1 %v4815_v56  ;;  %v390_v8 = vmul.f32 %v6488_v31, %v323_v30  ;;  %v389_v30 = vmul.f32 %v6523_v44, %v324_v24 }
 0x11a   :  { %4818 = vmatpush1.bf16.msra.mxu1 %v4817_v17  ;;  %1308 = vmatprep.mubr.f32.mxu1 %v9924_v48 }
 0x11b   :  { %v410_v20 = vpop.permute.xlu1 %409  ;;  %v317_v42 = vpop.permute.xlu0 %316 }
 0x11c   :  { %v322_v10 = vsel %vm320_vm2, %v315_v21, %v317_v42  ;;  %v421_v55 = vsel %vm417_vm3, %v6259_v54, %v410_v20  ;;  %v321_v54 = vsel %vm320_vm2, %v317_v42, %v5903_v25 }
 0x11d   :  { %v391_v62 = vmul.f32 %v6492_v3, %v322_v10  ;;  %v486_v25 = vmul.f32 %v6498_v36, %v421_v55  ;;  %v392_v39 = vmul.f32 %v6502_v45, %v321_v54  ;;  %v6561_v54 = vrot.slane %v6396_v38, %v5899_v60 }
 0x11f   :  { %v414_v50 = vpop.permute.xlu1 %413  ;;  %v412_v9 = vpop.permute.xlu0 %411  ;;  %v4805_v34 = vpack.c.bf16 %v486_v25, %v389_v30  ;;  %9966 = vst [vmem:[#allocation86_spill] sm:$0xff] %v6561_v54 }
 0x120   :  { %v418_v26 = vsel %vm417_vm3, %v414_v50, %v5901_v13  ;;  %v419_v21 = vsel %vm417_vm3, %v412_v9, %v414_v50  ;;  %v420_v2 = vsel %vm417_vm3, %v410_v20, %v412_v9 }
 0x121   :  { %v489_v56 = vmul.f32 %v6511_v6, %v418_v26  ;;  %v487_v17 = vmul.f32 %v6515_v49, %v420_v2  ;;  %v488_v42 = vmul.f32 %v6519_v35, %v419_v21  ;;  %v6581_v2 = vrot.slane %v6371_v58, %v5969_v0  ;;  %v9992_v49 = vld [vmem:[#allocation6_spill] sm:$0xff]  ;;  %v10010_v35 = vld [vmem:[#allocation27_spill] sm:$0xff] }
 0x123   :  { %v4821_v10 = vpack.c.bf16 %v488_v42, %v391_v62  ;;  %v511_v55 = vpop.permute.xlu1 %510  ;;  %v509_v36 = vpop.permute.xlu0 %508  ;;  %v4803_v13 = vpack.c.bf16 %v487_v17, %v390_v8  ;;  %v4819_v31 = vpack.c.bf16 %v489_v56, %v392_v39  ;;  %v6567_v8 = vrot.slane %v6391_v53, %v5899_v60  ;;  %9968 = vst [vmem:[#allocation88_spill] sm:$0xff] %v6581_v2  ;;  %v5382_v39 = vld [vmem:[%s9877_s27 + $0x58] sm:$0xff]  ;;  %s9981_s27 = smov 111  }
 0x124   :  { %v516_v50 = vsel %vm514_vm4, %v509_v36, %v511_v55  ;;  %v517_v20 = vsel %vm514_vm4, %v6292_v33, %v509_v36  ;;  %v6590_v17 = vrot.slane %v6376_v11, %v5969_v0  ;;  %v6598_v42 = vrot.slane %v6371_v58, %v5976_v59 }
 0x125   :  { %v583_v9 = vmul.f32 %v6530_v1, %v517_v20  ;;  %v584_v24 = vmul.f32 %v6539_v61, %v516_v50  ;;  %4804 = vmatprep.subr.bf16.mxu0 %v4803_v13  ;;  %4820 = vmatprep.subr.bf16.mxu1 %v4819_v31  ;;  %9967 = vst [vmem:[#allocation87_spill] sm:$0xff] %v6567_v8 }
 0x126   :  { %4806 = vmatpush1.bf16.msra.mxu0 %v4805_v34  ;;  %4822 = vmatpush1.bf16.msra.mxu1 %v4821_v10  ;;  %9969 = vst [vmem:[#allocation89_spill] sm:$0xff] %v6590_v17  ;;  %9971 = vst [vmem:[#allocation91_spill] sm:$0xff] %v6598_v42  ;;  %v6605_v10 = vrot.slane %v6396_v38, %v5969_v0 }
 0x127   :  { %v4809_v62 = vpack.c.bf16 %v583_v9, %v5688_v12  ;;  %v606_v25 = vpop.permute.xlu1 %605  ;;  %v513_v33 = vpop.permute.xlu0 %512  ;;  %v4807_v36 = vpack.c.bf16 %v584_v24, %v5811_v57 }
 0x128   :  { %v515_v26 = vsel %vm514_vm4, %v511_v55, %v513_v33  ;;  %v526_v21 = vsel %vm514_vm4, %v513_v33, %v5955_v47  ;;  %v614_v30 = vsel %vm611_vm5, %v6308_v37, %v606_v25  ;;  %9972 = vst [vmem:[#allocation92_spill] sm:$0xff] %v6605_v10  ;;  %v6609_v55 = vrot.slane %v6391_v53, %v5969_v0 }
 0x129   :  { %v585_v31 = vmul.f32 %v6567_v8, %v515_v26  ;;  %v586_v60 = vmul.f32 %v6561_v54, %v526_v21  ;;  %4808 = vmatprep.subr.bf16.mxu0 %v4807_v36  ;;  %v680_v0 = vmul.f32 %v6590_v17, %v614_v30  ;;  %v6628_v36 = vrot.slane %v6391_v53, %v5976_v59 }
 0x12a   :  { %4810 = vmatpush1.bf16.msra.mxu0 %v4809_v62  ;;  %9973 = vst [vmem:[#allocation93_spill] sm:$0xff] %v6609_v55  ;;  %v6621_v62 = vrot.slane %v6396_v38, %v5976_v59  ;;  %v6648_v30 = vrot.slane %v6396_v38, %v6074_v46 }
 0x12b   :  { %v4825_v34 = vpack.c.bf16 %v585_v31, %v5826_v63  ;;  %v610_v12 = vpop.permute.xlu1 %609  ;;  %v608_v57 = vpop.permute.xlu0 %607  ;;  %v4823_v56 = vpack.c.bf16 %v586_v60, %v5382_v39  ;;  %v6594_v63 = vrot.slane %v6376_v11, %v5976_v59  ;;  %9975 = vst [vmem:[#allocation95_spill] sm:$0xff] %v6628_v36  ;;  %v9976_v39 = vld [vmem:[#allocation31_spill] sm:$0xff]  ;;  %v6641_v59 = vrot.slane %v6371_v58, %v6074_v46 }
 0x12c   :  { %v613_v47 = vsel %vm611_vm5, %v606_v25, %v608_v57  ;;  %v612_v9 = vsel %vm611_vm5, %v608_v57, %v610_v12  ;;  %9974 = vst [vmem:[#allocation94_spill] sm:$0xff] %v6621_v62  ;;  %v623_v26 = vsel %vm611_vm5, %v610_v12, %v6025_v51  ;;  %9978 = vst [vmem:[#allocation96_spill] sm:$0xff] %v6648_v30 }
 0x12d   :  { %4824 = vmatprep.subr.bf16.mxu1 %v4823_v56  ;;  %9970 = vst [vmem:[#allocation90_spill] sm:$0xff] %v6594_v63  ;;  %v681_v13 = vmul.f32 %v6581_v2, %v613_v47  ;;  %9977 = vst [vmem:[#allocation31_spill] sm:$0xff] %v6641_v59  ;;  %v683_v47 = vmul.f32 %v6605_v10, %v623_v26  ;;  %v6656_v58 = vrot.slane %v6391_v53, %v6074_v46 }
 0x12e   :  { %4826 = vmatpush1.bf16.msra.mxu1 %v4825_v34 }
 0x12f   :  { %v705_v50 = vpop.permute.xlu1 %704  ;;  %v703_v20 = vpop.permute.xlu0 %702  ;;  %9980 = vst [vmem:[#allocation98_spill] sm:$0xff] %v6656_v58 }
 0x130   :  { %v710_v24 = vsel %vm708_vm6, %v703_v20, %v705_v50  ;;  %v711_v37 = vsel %vm708_vm6, %v6359_v14, %v703_v20  ;;  %v682_v14 = vmul.f32 %v6609_v55, %v612_v9  ;;  %v9995_v55 = vld [vmem:[#allocation3_spill] sm:$0xff] }
 0x131   :  { %v777_v25 = vmul.f32 %v6594_v63, %v711_v37  ;;  %v778_v33 = vmul.f32 %v6598_v42, %v710_v24 }
 0x133   :  { %v4813_v21 = vpack.c.bf16 %v777_v25, %v680_v0  ;;  %v800_v31 = vpop.permute.xlu1 %799  ;;  %v707_v60 = vpop.permute.xlu0 %706  ;;  %v4811_v34 = vpack.c.bf16 %v778_v33, %v681_v13  ;;  %v6652_v13 = vrot.slane %v6376_v11, %v6074_v46 }
 0x134   :  { %v709_v57 = vsel %vm708_vm6, %v705_v50, %v707_v60  ;;  %v720_v56 = vsel %vm708_vm6, %v707_v60, %v9976_v39  ;;  %v808_v50 = vsel %vm805_vm7, %v6469_v27, %v800_v31 }
 0x135   :  { %v779_v51 = vmul.f32 %v6628_v36, %v709_v57  ;;  %v780_v12 = vmul.f32 %v6621_v62, %v720_v56  ;;  %4812 = vmatprep.subr.bf16.mxu0 %v4811_v34  ;;  %9979 = vst [vmem:[#allocation97_spill] sm:$0xff] %v6652_v13  ;;  %v874_v27 = vmul.f32 %v6652_v13, %v808_v50  ;;  %v1712_v36 = vld [vmem:[%s10008_s7] sm:$0xff] }
 0x136   :  { %4814 = vmatpush1.bf16.msra.mxu0 %v4813_v21 }
 0x137   :  { %v4829_v20 = vpack.c.bf16 %v779_v51, %v682_v14  ;;  %v804_v9 = vpop.permute.xlu1 %803  ;;  %v802_v24 = vpop.permute.xlu0 %801  ;;  %v4827_v37 = vpack.c.bf16 %v780_v12, %v683_v47 }
 0x138   :  { %v817_v38 = vsel %vm805_vm7, %v804_v9, %v6173_v19  ;;  %v806_v11 = vsel %vm805_vm7, %v802_v24, %v804_v9  ;;  %v807_v0 = vsel %vm805_vm7, %v800_v31, %v802_v24 }
 0x139   :  { %4828 = vmatprep.subr.bf16.mxu1 %v4827_v37  ;;  %v875_v46 = vmul.f32 %v6641_v59, %v807_v0  ;;  %v877_v53 = vmul.f32 %v6648_v30, %v817_v38  ;;  %v876_v25 = vmul.f32 %v6656_v58, %v806_v11 }
 0x13a   :  { %4830 = vmatpush1.bf16.msra.mxu1 %v4829_v20 }
 0x13b   :  { %1189 = vmatprep.subr.mxu0 %v875_v46  ;;  %1260 = vmatprep.subr.mxu1 %v877_v53 }
 0x13c   :  { %1190 = vmatpush1.msra.mxu0 %v874_v27 }
 0x13d   :  { %4631 = vmatmul.mubr.msk.f32.vlgmr.msra.gmra.mrb[4].mxu0 %vm885_vm8, %v6192_v23 }
 0x13e   :  { %1261 = vmatpush1.msra.mxu1 %v876_v25  ;;  %1785 = vmatprep.mubr.f32.mxu0 %v9924_v48 }
 0x13f   :  { %4632 = vmatmul.mubr.msk.f32.vlgmr.msra.gmra.mrb[4].mxu1 %vm885_vm8, %v6192_v23 }
 0x140   :  { %1856 = vmatprep.mubr.f32.mxu1 %v9924_v48 }
 0x148   :  { %v6678_v19 = vpop.permute.xlu0 %882 }
 0x1af   :  { %v955_v33 = vpop.f32.mrb[0].mxu0 }
 0x1b0   :  { %v957_v26 = vpop.f32.mrb[1].mxu0  ;;  %v1026_v14 = vpop.f32.mrb[0].mxu1  ;;  %v956_v23 = vadd.f32 %v955_v33, %v6678_v19 }
 0x1b1   :  { %v1028_v21 = vpop.f32.mrb[1].mxu1  ;;  %v1027_v31 = vadd.f32 %v1026_v14, %v6678_v19  ;;  %v958_v56 = vadd.f32 %v957_v26, %v6678_v19 }
 0x1b2   :  { %v6696_v34 = vmax.f32 %v956_v23, 0.0  ;;  %v1029_v57 = vadd.f32 %v1028_v21, %v6678_v19 }
 0x1b3   :  { %v6681_v60 = vmax.f32 %v1027_v31, 0.0  ;;  %v6726_v47 = vmax.f32 %v958_v56, 0.0 }
 0x1b4   :  { %v6715_v39 = vmax.f32 %v1029_v57, 0.0 }
 0x1b5   :  { %1379 = vrot.lane.b32.xlu0 %v6681_v60, %s5384_s2  ;;  %1331 = vrot.lane.b32.xlu1 %v6681_v60, %s5383_s6 }
 0x1b9   :  { %1427 = vrot.lane.b32.xlu0 %v6681_v60, %s5385_s8  ;;  %1571 = vrot.lane.b32.xlu1 %v6681_v60, %s5388_s9 }
 0x1bd   :  { %1475 = vrot.lane.b32.xlu0 %v6681_v60, %s5386_s4  ;;  %1667 = vrot.lane.b32.xlu1 %v6681_v60, %s9981_s27 }
 0x1c1   :  { %1523 = vrot.lane.b32.xlu0 %v6681_v60, %s9982_s5  ;;  %1375 = vrot.lane.b32.xlu1 %v6696_v34, %s5384_s2 }
 0x1c5   :  { %1619 = vrot.lane.b32.xlu0 %v6681_v60, %s9983_s26  ;;  %1423 = vrot.lane.b32.xlu1 %v6696_v34, %s5385_s8 }
 0x1c9   :  { %1615 = vrot.lane.b32.xlu1 %v6696_v34, %s9983_s26  ;;  %1327 = vrot.lane.b32.xlu0 %v6696_v34, %s5383_s6 }
 0x1cd   :  { %1663 = vrot.lane.b32.xlu1 %v6696_v34, %s9981_s27  ;;  %1471 = vrot.lane.b32.xlu0 %v6696_v34, %s5386_s4 }
 0x1d1   :  { %1333 = vrot.lane.b32.xlu1 %v6715_v39, %s5383_s6  ;;  %1519 = vrot.lane.b32.xlu0 %v6696_v34, %s9982_s5 }
 0x1d5   :  { %1381 = vrot.lane.b32.xlu1 %v6715_v39, %s5384_s2  ;;  %1567 = vrot.lane.b32.xlu0 %v6696_v34, %s5388_s9 }
 0x1d9   :  { %1377 = vrot.lane.b32.xlu1 %v6726_v47, %s5384_s2  ;;  %1329 = vrot.lane.b32.xlu0 %v6726_v47, %s5383_s6 }
 0x1dd   :  { %1429 = vrot.lane.b32.xlu1 %v6715_v39, %s5385_s8  ;;  %1425 = vrot.lane.b32.xlu0 %v6726_v47, %s5385_s8 }
 0x1e1   :  { %1477 = vrot.lane.b32.xlu1 %v6715_v39, %s5386_s4  ;;  %1525 = vrot.lane.b32.xlu0 %v6715_v39, %s9982_s5 }
 0x1e5   :  { %1473 = vrot.lane.b32.xlu1 %v6726_v47, %s5386_s4  ;;  %1569 = vrot.lane.b32.xlu0 %v6726_v47, %s5388_s9 }
 0x1e8   :  { %v1097_v51 = vpop.f32.mrb[2].mxu0 }
 0x1e9   :  { %v1098_v12 = vadd.f32 %v1097_v51, %v6678_v19  ;;  %v1099_v50 = vpop.f32.mrb[3].mxu0  ;;  %1573 = vrot.lane.b32.xlu1 %v6715_v39, %s5388_s9 }
 0x1ea   :  { %v1100_v25 = vadd.f32 %v1099_v50, %v6678_v19 }
 0x1eb   :  { %v6747_v20 = vmax.f32 %v1098_v12, 0.0 }
 0x1ec   :  { %v1168_v9 = vpop.f32.mrb[2].mxu1  ;;  %v6800_v26 = vmax.f32 %v1100_v25, 0.0 }
 0x1ed   :  { %9984 = vst [vmem:[#allocation99_spill] sm:$0xff] %v6747_v20  ;;  %v1170_v24 = vpop.f32.mrb[3].mxu1  ;;  %1621 = vrot.lane.b32.xlu1 %v6715_v39, %s9983_s26  ;;  %1575 = vrot.lane.b32.xlu0 %v6747_v20, %s5388_s9  ;;  %v1169_v37 = vadd.f32 %v1168_v9, %v6678_v19 }
 0x1ee   :  { %v1171_v11 = vadd.f32 %v1170_v24, %v6678_v19  ;;  %9985 = vst [vmem:[#allocation100_spill] sm:$0xff] %v6800_v26 }
 0x1ef   :  { %v6762_v38 = vmax.f32 %v1169_v37, 0.0 }
 0x1f0   :  { %v6789_v0 = vmax.f32 %v1171_v11, 0.0 }
 0x1f1   :  { %1669 = vrot.lane.b32.xlu1 %v6715_v39, %s9981_s27  ;;  %1623 = vrot.lane.b32.xlu0 %v6747_v20, %s9983_s26 }
 0x1f5   :  { %1521 = vrot.lane.b32.xlu1 %v6726_v47, %s9982_s5  ;;  %1671 = vrot.lane.b32.xlu0 %v6747_v20, %s9981_s27 }
 0x1f9   :  { %1617 = vrot.lane.b32.xlu1 %v6726_v47, %s9983_s26  ;;  %1435 = vrot.lane.b32.xlu0 %v6762_v38, %s5385_s8 }
 0x1fd   :  { %1665 = vrot.lane.b32.xlu1 %v6726_v47, %s9981_s27  ;;  %1483 = vrot.lane.b32.xlu0 %v6762_v38, %s5386_s4 }
 0x201   :  { %1527 = vrot.lane.b32.xlu1 %v6747_v20, %s9982_s5  ;;  %1531 = vrot.lane.b32.xlu0 %v6762_v38, %s9982_s5 }
 0x205   :  { %1339 = vrot.lane.b32.xlu1 %v6762_v38, %s5383_s6  ;;  %1627 = vrot.lane.b32.xlu0 %v6762_v38, %s9983_s26 }
 0x209   :  { %1387 = vrot.lane.b32.xlu1 %v6762_v38, %s5384_s2  ;;  %1335 = vrot.lane.b32.xlu0 %v6747_v20, %s5383_s6 }
 0x20d   :  { %1579 = vrot.lane.b32.xlu1 %v6762_v38, %s5388_s9  ;;  %1431 = vrot.lane.b32.xlu0 %v6747_v20, %s5385_s8 }
 0x210   :  { %v1239_v46 = vpop.f32.mrb[4].mxu0 }
 0x211   :  { %v1241_v53 = vpop.f32.mrb[5].mxu0  ;;  %1675 = vrot.lane.b32.xlu1 %v6762_v38, %s9981_s27  ;;  %1341 = vrot.lane.b32.xlu0 %v6789_v0, %s5383_s6  ;;  %v1240_v14 = vadd.f32 %v1239_v46, %v6678_v19 }
 0x212   :  { %v1310_v27 = vpop.f32.mrb[4].mxu1 }
 0x213   :  { %v1312_v33 = vpop.f32.mrb[5].mxu1  ;;  %v6815_v21 = vmax.f32 %v1240_v14, 0.0  ;;  %v1311_v31 = vadd.f32 %v1310_v27, %v6678_v19 }
 0x214   :  { %v1313_v11 = vadd.f32 %v1312_v33, %v6678_v19 }
 0x215   :  { %1383 = vrot.lane.b32.xlu1 %v6747_v20, %s5384_s2  ;;  %1389 = vrot.lane.b32.xlu0 %v6789_v0, %s5384_s2  ;;  %9986 = vst [vmem:[#allocation101_spill] sm:$0xff] %v6815_v21  ;;  %v6826_v56 = vmax.f32 %v1311_v31, 0.0 }
 0x216   :  { %v6861_v25 = vmax.f32 %v1313_v11, 0.0  ;;  %v1242_v11 = vadd.f32 %v1241_v53, %v6678_v19  ;;  %v9991_v53 = vld [vmem:[#allocation5_spill] sm:$0xff] }
 0x217   :  { %9987 = vst [vmem:[#allocation102_spill] sm:$0xff] %v6826_v56 }
 0x218   :  { %9988 = vst [vmem:[#allocation103_spill] sm:$0xff] %v6861_v25  ;;  %v6891_v42 = vmax.f32 %v1242_v11, 0.0 }
 0x219   :  { %1337 = vrot.lane.b32.xlu1 %v6800_v26, %s5383_s6  ;;  %1385 = vrot.lane.b32.xlu0 %v6800_v26, %s5384_s2 }
 0x21a   :  { %9990 = vst [vmem:[#allocation105_spill] sm:$0xff] %v6891_v42 }
 0x21d   :  { %1437 = vrot.lane.b32.xlu1 %v6789_v0, %s5385_s8  ;;  %1433 = vrot.lane.b32.xlu0 %v6800_v26, %s5385_s8 }
 0x221   :  { %1485 = vrot.lane.b32.xlu1 %v6789_v0, %s5386_s4  ;;  %1533 = vrot.lane.b32.xlu0 %v6789_v0, %s9982_s5 }
 0x225   :  { %1481 = vrot.lane.b32.xlu1 %v6800_v26, %s5386_s4  ;;  %1583 = vrot.lane.b32.xlu0 %v6815_v21, %s5388_s9 }
 0x227   :  { %v1380_v23 = vpop.permute.xlu0 %1379  ;;  %v1332_v57 = vpop.permute.xlu1 %1331 }
 0x229   :  { %1581 = vrot.lane.b32.xlu1 %v6789_v0, %s5388_s9  ;;  %1631 = vrot.lane.b32.xlu0 %v6815_v21, %s9983_s26 }
 0x22b   :  { %v6828_v51 = vpop.permute.xlu0 %1427  ;;  %v6830_v12 = vpop.permute.xlu1 %1571 }
 0x22d   :  { %1629 = vrot.lane.b32.xlu1 %v6789_v0, %s9983_s26  ;;  %1395 = vrot.lane.b32.xlu0 %v6826_v56, %s5384_s2 }
 0x22f   :  { %v6836_v50 = vpop.permute.xlu0 %1475  ;;  %v6838_v9 = vpop.permute.xlu1 %1667 }
 0x231   :  { %1677 = vrot.lane.b32.xlu1 %v6789_v0, %s9981_s27  ;;  %1679 = vrot.lane.b32.xlu0 %v6815_v21, %s9981_s27 }
 0x233   :  { %v6844_v24 = vpop.permute.xlu0 %1523  ;;  %v6846_v37 = vpop.permute.xlu1 %1375 }
 0x235   :  { %1535 = vrot.lane.b32.xlu1 %v6815_v21, %s9982_s5  ;;  %1443 = vrot.lane.b32.xlu0 %v6826_v56, %s5385_s8 }
 0x237   :  { %v6853_v46 = vpop.permute.xlu0 %1619  ;;  %v6855_v27 = vpop.permute.xlu1 %1423 }
 0x239   :  { %1347 = vrot.lane.b32.xlu1 %v6826_v56, %s5383_s6  ;;  %1539 = vrot.lane.b32.xlu0 %v6826_v56, %s9982_s5 }
 0x23b   :  { %v6863_v14 = vpop.permute.xlu1 %1615  ;;  %v6865_v31 = vpop.permute.xlu0 %1327 }
 0x23d   :  { %1491 = vrot.lane.b32.xlu1 %v6826_v56, %s5386_s4  ;;  %1349 = vrot.lane.b32.xlu0 %v6861_v25, %s5383_s6 }
 0x23f   :  { %v6871_v33 = vpop.permute.xlu1 %1663  ;;  %v6873_v13 = vpop.permute.xlu0 %1471 }
 0x241   :  { %1397 = vrot.lane.b32.xlu1 %v6861_v25, %s5384_s2  ;;  %1587 = vrot.lane.b32.xlu0 %v6826_v56, %s5388_s9 }
 0x243   :  { %v6880_v59 = vpop.permute.xlu1 %1333  ;;  %v6882_v63 = vpop.permute.xlu0 %1519 }
 0x244   :  { %9989 = vst [vmem:[#allocation104_spill] sm:$0xff] %v6880_v59  ;;  %v1359_v17 = vsel %vm126_vm0, %v1332_v57, %v6880_v59 }
 0x245   :  { %1445 = vrot.lane.b32.xlu1 %v6861_v25, %s5385_s8  ;;  %1493 = vrot.lane.b32.xlu0 %v6861_v25, %s5386_s4  ;;  %v1366_v61 = vmul.f32 %v1359_v17, %v9991_v53 }
 0x247   :  { %v6893_v2 = vpop.permute.xlu1 %1381  ;;  %v6895_v1 = vpop.permute.xlu0 %1567 }
 0x248   :  { %v1407_v19 = vsel %vm223_vm1, %v1380_v23, %v6893_v2 }
 0x249   :  { %v1414_v44 = vmul.f32 %v1407_v19, %v9992_v49  ;;  %1479 = vrot.lane.b32.xlu1 %v6747_v20, %s5386_s4  ;;  %1393 = vrot.lane.b32.xlu0 %v6891_v42, %s5384_s2  ;;  %v9993_v49 = vld [vmem:[#allocation4_spill] sm:$0xff] }
 0x24a   :  { %v9994_v20 = vld [vmem:[#allocation8_spill] sm:$0xff] }
 0x24b   :  { %v1378_v11 = vpop.permute.xlu1 %1377  ;;  %v1330_v7 = vpop.permute.xlu0 %1329  ;;  %v4847_v28 = vpack.c.bf16 %v1414_v44, %v1366_v61  ;;  %v9996_v61 = vld [vmem:[#allocation7_spill] sm:$0xff] }
 0x24c   :  { %v1408_v58 = vsel %vm223_vm1, %v1378_v11, %v1380_v23  ;;  %v1409_v30 = vsel %vm223_vm1, %v6846_v37, %v1378_v11  ;;  %v1360_v17 = vsel %vm126_vm0, %v1330_v7, %v1332_v57  ;;  %v1361_v19 = vsel %vm126_vm0, %v6865_v31, %v1330_v7 }
 0x24d   :  { %v1412_v53 = vmul.f32 %v1409_v30, %v9993_v49  ;;  %v1413_v10 = vmul.f32 %v1408_v58, %v9994_v20  ;;  %v1364_v44 = vmul.f32 %v1361_v19, %v9995_v55  ;;  %v1365_v62 = vmul.f32 %v1360_v17, %v9996_v61  ;;  %1345 = vrot.lane.b32.xlu1 %v6891_v42, %s5383_s6  ;;  %v10002_v20 = vld [vmem:[#allocation15_spill] sm:$0xff] }
 0x24e   :  { %4848 = vmatprep.subr.bf16.mxu1 %v4847_v28  ;;  %1441 = vrot.lane.b32.xlu0 %v6891_v42, %s5385_s8 }
 0x24f   :  { %v4849_v23 = vpack.c.bf16 %v1413_v10, %v1365_v62  ;;  %v6924_v57 = vpop.permute.xlu1 %1429  ;;  %v6926_v11 = vpop.permute.xlu0 %1425  ;;  %v4831_v7 = vpack.c.bf16 %v1412_v53, %v1364_v44  ;;  %v9999_v62 = vld [vmem:[#allocation14_spill] sm:$0xff]  ;;  %v10000_v53 = vld [vmem:[#allocation16_spill] sm:$0xff] }
 0x250   :  { %9997 = vst [vmem:[#allocation106_spill] sm:$0xff] %v6924_v57  ;;  %v1455_v30 = vsel %vm320_vm2, %v6828_v51, %v6924_v57  ;;  %v1456_v44 = vsel %vm320_vm2, %v6926_v11, %v6828_v51 }
 0x251   :  { %1489 = vrot.lane.b32.xlu1 %v6891_v42, %s5386_s4  ;;  %4832 = vmatprep.subr.bf16.mxu0 %v4831_v7  ;;  %v1462_v58 = vmul.f32 %v1455_v30, %v9999_v62 }
 0x252   :  { %1529 = vrot.lane.b32.xlu0 %v6800_v26, %s9982_s5  ;;  %4850 = vmatpush1.bf16.msra.mxu1 %v4849_v23 }
 0x253   :  { %v6936_v28 = vpop.permute.xlu1 %1477  ;;  %v1526_v19 = vpop.permute.xlu0 %1525 }
 0x254   :  { %9998 = vst [vmem:[#allocation107_spill] sm:$0xff] %v6936_v28  ;;  %v1503_v10 = vsel %vm417_vm3, %v6836_v50, %v6936_v28  ;;  %v1551_v55 = vsel %vm514_vm4, %v6844_v24, %v1526_v19  ;;  %v10011_v28 = vld [vmem:[#allocation21_spill] sm:$0xff] }
 0x255   :  { %v1510_v17 = vmul.f32 %v1503_v10, %v10000_v53  ;;  %1635 = vrot.lane.b32.xlu1 %v6826_v56, %s9983_s26  ;;  %v10001_v10 = vld [vmem:[#allocation13_spill] sm:$0xff] }
 0x256   :  { %1541 = vrot.lane.b32.xlu0 %v6861_v25, %s9982_s5  ;;  %v1461_v62 = vmul.f32 %v1456_v44, %v10001_v10 }
 0x257   :  { %v6952_v23 = vpop.permute.xlu1 %1473  ;;  %v4851_v7 = vpack.c.bf16 %v1510_v17, %v1462_v58  ;;  %v6964_v61 = vpop.permute.xlu0 %1569 }
 0x258   :  { %v1504_v30 = vsel %vm417_vm3, %v6952_v23, %v6836_v50 }
 0x259   :  { %v1509_v49 = vmul.f32 %v1504_v30, %v10002_v20  ;;  %1637 = vrot.lane.b32.xlu1 %v6861_v25, %s9983_s26  ;;  %4852 = vmatprep.subr.bf16.mxu1 %v4851_v7 }
 0x25a   :  { %1589 = vrot.lane.b32.xlu0 %v6861_v25, %s5388_s9 }
 0x25b   :  { %v4853_v51 = vpack.c.bf16 %v1509_v49, %v1461_v62  ;;  %v1574_v58 = vpop.permute.xlu1 %1573 }
 0x25d   :  { %1685 = vrot.lane.b32.xlu1 %v6861_v25, %s9981_s27  ;;  %4854 = vmatpush1.bf16.msra.mxu1 %v4853_v51  ;;  %v10009_v25 = vld [vmem:[#allocation20_spill] sm:$0xff] }
 0x25e   :  { %1683 = vrot.lane.b32.xlu0 %v6826_v56, %s9981_s27  ;;  %v1557_v56 = vmul.f32 %v1551_v55, %v10009_v25  ;;  %v1599_v55 = vsel %vm611_vm5, %v6830_v12, %v1574_v58  ;;  %v10012_v25 = vld [vmem:[#allocation25_spill] sm:$0xff] }
 0x25f   :  { %v1622_v50 = vpop.permute.xlu1 %1621  ;;  %v6970_v17 = vpop.permute.xlu0 %1575 }
 0x260   :  { %10003 = vst [vmem:[#allocation108_spill] sm:$0xff] %v6970_v17  ;;  %v1598_v54 = vsel %vm611_vm5, %v1574_v58, %v6970_v17  ;;  %v1647_v8 = vsel %vm708_vm6, %v6853_v46, %v1622_v50 }
 0x261   :  { %1577 = vrot.lane.b32.xlu1 %v6800_v26, %s5388_s9  ;;  %v1606_v17 = vmul.f32 %v1598_v54, %v10012_v25 }
 0x262   :  { %1625 = vrot.lane.b32.xlu0 %v6800_v26, %s9983_s26 }
 0x263   :  { %v1670_v49 = vpop.permute.xlu1 %1669  ;;  %v6976_v62 = vpop.permute.xlu0 %1623 }
 0x264   :  { %10004 = vst [vmem:[#allocation109_spill] sm:$0xff] %v6976_v62  ;;  %v1646_v53 = vsel %vm708_vm6, %v1622_v50, %v6976_v62  ;;  %v4857_v50 = vpack.c.bf16 %v1557_v56, %v6681_v60  ;;  %v1695_v60 = vsel %vm805_vm7, %v6838_v9, %v1670_v49  ;;  %v7060_v56 = vld [vmem:[%s10016_s25] sm:$0xff] }
 0x265   :  { %1673 = vrot.lane.b32.xlu1 %v6800_v26, %s9981_s27  ;;  %v1654_v3 = vmul.f32 %v1646_v53, %v10010_v35  ;;  %v10013_v53 = vld [vmem:[#allocation26_spill] sm:$0xff] }
 0x266   :  { %1343 = vrot.lane.b32.xlu0 %v6815_v21, %s5383_s6  ;;  %v1653_v35 = vmul.f32 %v1647_v8, %v10013_v53  ;;  %v10021_v53 = vld [vmem:[#allocation39_spill] sm:$0xff] }
 0x267   :  { %v6982_v44 = vpop.permute.xlu1 %1521  ;;  %v6984_v7 = vpop.permute.xlu0 %1671 }
 0x268   :  { %10005 = vst [vmem:[#allocation110_spill] sm:$0xff] %v6984_v7 }
 0x269   :  { %1391 = vrot.lane.b32.xlu1 %v6815_v21, %s5384_s2 }
 0x26a   :  { %1439 = vrot.lane.b32.xlu0 %v6815_v21, %s5385_s8 }
 0x26b   :  { %v6990_v30 = vpop.permute.xlu1 %1617  ;;  %v6992_v51 = vpop.permute.xlu0 %1435 }
 0x26d   :  { %1487 = vrot.lane.b32.xlu1 %v6815_v21, %s5386_s4 }
 0x26e   :  { %1537 = vrot.lane.b32.xlu0 %v6891_v42, %s9982_s5 }
 0x26f   :  { %v6998_v20 = vpop.permute.xlu1 %1665  ;;  %v7000_v10 = vpop.permute.xlu0 %1483 }
 0x271   :  { %1585 = vrot.lane.b32.xlu1 %v6891_v42, %s5388_s9 }
 0x272   :  { %1633 = vrot.lane.b32.xlu0 %v6891_v42, %s9983_s26 }
 0x273   :  { %v7012_v21 = vpop.permute.xlu1 %1527  ;;  %v7014_v26 = vpop.permute.xlu0 %1531 }
 0x274   :  { %10006 = vst [vmem:[#allocation111_spill] sm:$0xff] %v7012_v21  ;;  %10007 = vst [vmem:[#allocation112_spill] sm:$0xff] %v7014_v26  ;;  %v1550_v62 = vsel %vm514_vm4, %v1526_v19, %v7012_v21 }
 0x275   :  { %v1558_v57 = vmul.f32 %v1550_v62, %v10011_v28  ;;  %1681 = vrot.lane.b32.xlu1 %v6891_v42, %s9981_s27  ;;  %v4859_v62 = vpack.c.bf16 %v1654_v3, %v1606_v17  ;;  %v10014_v28 = vld [vmem:[#allocation28_spill] sm:$0xff] }
 0x276   :  { %1715 = vperm.xlu0 %5379, %v1712_v36   ;;  %v1605_v42 = vmul.f32 %v1599_v55, %v10014_v28  ;;  %v1694_v36 = vsel %vm805_vm7, %v1670_v49, %v6984_v7  ;;  %v10020_v28 = vld [vmem:[#allocation35_spill] sm:$0xff] }
 0x277   :  { %v1340_v59 = vpop.permute.xlu1 %1339  ;;  %v7037_v19 = vpop.permute.xlu0 %1627  ;;  %v4855_v21 = vpack.c.bf16 %v1558_v57, %v6715_v39  ;;  %v1702_v8 = vmul.f32 %v1694_v36, %v6156_v52  ;;  %v10033_v7 = vld [vmem:[#allocation55_spill] sm:$0xff] }
 0x278   :  { %v4861_v25 = vpack.c.bf16 %v1653_v35, %v1605_v42 }
 0x279   :  { %4856 = vmatprep.subr.bf16.mxu1 %v4855_v21  ;;  %v1701_v21 = vmul.f32 %v1695_v60, %v6145_v32 }
 0x27a   :  { %4858 = vmatpush1.bf16.msra.mxu1 %v4857_v50  ;;  %v10019_v50 = vld [vmem:[#allocation40_spill] sm:$0xff] }
 0x27b   :  { %v1388_v58 = vpop.permute.xlu1 %1387  ;;  %4860 = vmatprep.subr.bf16.mxu1 %v4859_v62  ;;  %v7046_v54 = vpop.permute.xlu0 %1335 }
 0x27e   :  { %4862 = vmatpush1.bf16.msra.mxu1 %v4861_v25 }
 0x27f   :  { %v7052_v3 = vpop.permute.xlu1 %1579  ;;  %1808 = vmatprep.subr.mxu1 %v1702_v8  ;;  %v7054_v39 = vpop.permute.xlu0 %1431 }
 0x280   :  { %10015 = vst [vmem:[#allocation113_spill] sm:$0xff] %v7054_v39  ;;  %v10035_v39 = vld [vmem:[#allocation62_spill] sm:$0xff] }
 0x282   :  { %1809 = vmatpush1.msra.mxu1 %v1701_v21 }
 0x283   :  { %v7062_v35 = vpop.permute.xlu1 %1675  ;;  %4634 = vmatmul.mubr.msk.f32.vlgmr.msra.gmra.mrb[6].mxu1 %vm885_vm8, %v7060_v56  ;;  %v7066_v42 = vpop.permute.xlu0 %1341 }
 0x284   :  { %10017 = vst [vmem:[#allocation114_spill] sm:$0xff] %v7066_v42  ;;  %1998 = vmatprep.mubr.f32.mxu1 %v9924_v48  ;;  %v1355_v25 = vsel %vm126_vm0, %v1340_v59, %v7066_v42 }
 0x285   :  { %v1370_v55 = vmul.f32 %v1355_v25, %v6121_v18 }
 0x287   :  { %v7072_v57 = vpop.permute.xlu1 %1383  ;;  %v7074_v17 = vpop.permute.xlu0 %1389 }
 0x288   :  { %10018 = vst [vmem:[#allocation115_spill] sm:$0xff] %v7074_v17  ;;  %v1403_v49 = vsel %vm223_vm1, %v1388_v58, %v7074_v17 }
 0x289   :  { %v1418_v62 = vmul.f32 %v1403_v49, %v10019_v50 }
 0x28b   :  { %v7081_v36 = vpop.permute.xlu1 %1337  ;;  %v7083_v60 = vpop.permute.xlu0 %1385  ;;  %v4879_v8 = vpack.c.bf16 %v1418_v62, %v1370_v55 }
 0x28c   :  { %v1356_v21 = vsel %vm126_vm0, %v7081_v36, %v1340_v59  ;;  %v1404_v32 = vsel %vm223_vm1, %v7083_v60, %v1388_v58 }
 0x28d   :  { %v1369_v52 = vmul.f32 %v1356_v21, %v10020_v28  ;;  %v1417_v17 = vmul.f32 %v1404_v32, %v10021_v53  ;;  %4880 = vmatprep.subr.bf16.mxu1 %v4879_v8  ;;  %v10027_v28 = vld [vmem:[#allocation48_spill] sm:$0xff] }
 0x28f   :  { %v4881_v25 = vpack.c.bf16 %v1417_v17, %v1369_v52  ;;  %v7093_v49 = vpop.permute.xlu1 %1437  ;;  %v7095_v50 = vpop.permute.xlu0 %1433 }
 0x290   :  { %10022 = vst [vmem:[#allocation116_spill] sm:$0xff] %v7093_v49  ;;  %10023 = vst [vmem:[#allocation117_spill] sm:$0xff] %v7095_v50  ;;  %v1451_v59 = vsel %vm320_vm2, %v6992_v51, %v7093_v49  ;;  %v1452_v17 = vsel %vm320_vm2, %v7095_v50, %v6992_v51 }
 0x291   :  { %4882 = vmatpush1.bf16.msra.mxu1 %v4881_v25  ;;  %v1466_v52 = vmul.f32 %v1451_v59, %v6234_v41  ;;  %v1465_v18 = vmul.f32 %v1452_v17, %v10027_v28  ;;  %v10028_v59 = vld [vmem:[#allocation50_spill] sm:$0xff]  ;;  %v10032_v28 = vld [vmem:[#allocation63_spill] sm:$0xff] }
 0x293   :  { %v7101_v55 = vpop.permute.xlu1 %1485  ;;  %v1534_v62 = vpop.permute.xlu0 %1533 }
 0x294   :  { %10024 = vst [vmem:[#allocation118_spill] sm:$0xff] %v7101_v55  ;;  %v1499_v32 = vsel %vm417_vm3, %v7000_v10, %v7101_v55 }
 0x295   :  { %v1514_v58 = vmul.f32 %v1499_v32, %v6255_v40 }
 0x297   :  { %v7113_v8 = vpop.permute.xlu1 %1481  ;;  %v7115_v21 = vpop.permute.xlu0 %1583  ;;  %v4883_v25 = vpack.c.bf16 %v1514_v58, %v1466_v52 }
 0x298   :  { %10025 = vst [vmem:[#allocation119_spill] sm:$0xff] %v7113_v8  ;;  %10026 = vst [vmem:[#allocation120_spill] sm:$0xff] %v7115_v21  ;;  %v1500_v53 = vsel %vm417_vm3, %v7113_v8, %v7000_v10  ;;  %v1547_v10 = vsel %vm514_vm4, %v7014_v26, %v1534_v62 }
 0x299   :  { %v1513_v41 = vmul.f32 %v1500_v53, %v10028_v59  ;;  %4884 = vmatprep.subr.bf16.mxu1 %v4883_v25 }
 0x29b   :  { %v4885_v32 = vpack.c.bf16 %v1513_v41, %v1465_v18  ;;  %v1582_v40 = vpop.permute.xlu1 %1581  ;;  %v7123_v55 = vpop.permute.xlu0 %1631  ;;  %v10031_v41 = vld [vmem:[#allocation54_spill] sm:$0xff] }
 0x29c   :  { %10029 = vst [vmem:[#allocation121_spill] sm:$0xff] %v7123_v55  ;;  %v1561_v17 = vmul.f32 %v1547_v10, %v10031_v41  ;;  %v1594_v25 = vsel %vm611_vm5, %v1582_v40, %v7115_v21  ;;  %v1595_v10 = vsel %vm611_vm5, %v7052_v3, %v1582_v40  ;;  %v10034_v41 = vld [vmem:[#allocation61_spill] sm:$0xff] }
 0x29d   :  { %4886 = vmatpush1.bf16.msra.mxu1 %v4885_v32  ;;  %v1610_v50 = vmul.f32 %v1594_v25, %v10034_v41  ;;  %v1505_v25 = vsel %vm417_vm3, %v6873_v13, %v6952_v23 }
 0x29f   :  { %v1630_v51 = vpop.permute.xlu1 %1629  ;;  %v7125_v49 = vpop.permute.xlu0 %1395 }
 0x2a0   :  { %v1642_v53 = vsel %vm708_vm6, %v1630_v51, %v7123_v55  ;;  %v1643_v59 = vsel %vm708_vm6, %v7037_v19, %v1630_v51 }
 0x2a1   :  { %v1658_v55 = vmul.f32 %v1642_v53, %v10032_v28  ;;  %v1657_v51 = vmul.f32 %v1643_v59, %v10035_v39  ;;  %v10036_v28 = vld [vmem:[#allocation60_spill] sm:$0xff] }
 0x2a2   :  { %v10037_v59 = vld [vmem:[#allocation12_spill] sm:$0xff] }
 0x2a3   :  { %v1678_v42 = vpop.permute.xlu1 %1677  ;;  %v7127_v52 = vpop.permute.xlu0 %1679  ;;  %v4891_v53 = vpack.c.bf16 %v1658_v55, %v1610_v50 }
 0x2a4   :  { %v1690_v40 = vsel %vm805_vm7, %v1678_v42, %v7127_v52  ;;  %v1691_v50 = vsel %vm805_vm7, %v7062_v35, %v1678_v42  ;;  %v1552_v42 = vsel %vm514_vm4, %v6982_v44, %v6844_v24 }
 0x2a5   :  { %v1706_v55 = vmul.f32 %v1690_v40, %v6448_v22  ;;  %v10039_v40 = vld [vmem:[#allocation9_spill] sm:$0xff]  ;;  %v10041_v22 = vld [vmem:[#allocation19_spill] sm:$0xff] }
 0x2a7   :  { %v7135_v58 = vpop.permute.xlu1 %1535  ;;  %v7137_v18 = vpop.permute.xlu0 %1443 }
 0x2a8   :  { %10030 = vst [vmem:[#allocation122_spill] sm:$0xff] %v7135_v58  ;;  %v1546_v32 = vsel %vm514_vm4, %v1534_v62, %v7135_v58  ;;  %v4889_v58 = vpack.c.bf16 %v1561_v17, %v6762_v38 }
 0x2a9   :  { %v1562_v26 = vmul.f32 %v1546_v32, %v10033_v7  ;;  %v1609_v32 = vmul.f32 %v1595_v10, %v10036_v28  ;;  %v10038_v10 = vld [vmem:[#allocation11_spill] sm:$0xff] }
 0x2ab   :  { %v7155_v8 = vpop.permute.xlu1 %1347  ;;  %v7157_v21 = vpop.permute.xlu0 %1539  ;;  %v4887_v62 = vpack.c.bf16 %v1562_v26, %v6789_v0  ;;  %v1457_v0 = vsel %vm320_vm2, %v6855_v27, %v6926_v11  ;;  %v4893_v26 = vpack.c.bf16 %v1657_v51, %v1609_v32 }
 0x2ac   :  { %v1460_v11 = vmul.f32 %v1457_v0, %v10038_v10  ;;  %v10040_v0 = vld [vmem:[#allocation10_spill] sm:$0xff] }
 0x2ad   :  { %4888 = vmatprep.subr.bf16.mxu1 %v4887_v62 }
 0x2ae   :  { %4890 = vmatpush1.bf16.msra.mxu1 %v4889_v58  ;;  %v1508_v58 = vmul.f32 %v1505_v25, %v10037_v59 }
 0x2af   :  { %v7170_v41 = vpop.permute.xlu1 %1491  ;;  %4892 = vmatprep.subr.bf16.mxu1 %v4891_v53  ;;  %v1350_v38 = vpop.permute.xlu0 %1349  ;;  %v1705_v53 = vmul.f32 %v1691_v50, %v6444_v16  ;;  %v1553_v50 = vsel %vm514_vm4, %v6882_v63, %v6982_v44  ;;  %v1556_v16 = vmul.f32 %v1552_v42, %v10041_v22 }
 0x2b0   :  { %v1351_v23 = vsel %vm126_vm0, %v7155_v8, %v1350_v38  ;;  %v1362_v17 = vsel %vm126_vm0, %v1350_v38, %v6865_v31  ;;  %v4835_v24 = vpack.c.bf16 %v1508_v58, %v1460_v11  ;;  %v1649_v58 = vsel %vm708_vm6, %v6863_v14, %v6990_v30 }
 0x2b1   :  { %v1363_v25 = vmul.f32 %v1362_v17, %v10039_v40  ;;  %v1374_v38 = vmul.f32 %v1351_v23, %v6427_v4  ;;  %v1648_v17 = vsel %vm708_vm6, %v6990_v30, %v6853_v46  ;;  %v1600_v46 = vsel %vm611_vm5, %v6964_v61, %v6830_v12  ;;  %v10044_v30 = vld [vmem:[#allocation22_spill] sm:$0xff]  ;;  %v10047_v12 = vld [vmem:[#allocation29_spill] sm:$0xff] }
 0x2b2   :  { %4894 = vmatpush1.bf16.msra.mxu1 %v4893_v26 }
 0x2b3   :  { %v1398_v62 = vpop.permute.xlu1 %1397  ;;  %1950 = vmatprep.subr.mxu1 %v1706_v55  ;;  %v7188_v51 = vpop.permute.xlu0 %1587 }
 0x2b4   :  { %v1399_v32 = vsel %vm223_vm1, %v7125_v49, %v1398_v62  ;;  %v1410_v31 = vsel %vm223_vm1, %v1398_v62, %v6846_v37  ;;  %v10042_v62 = vld [vmem:[#allocation18_spill] sm:$0xff] }
 0x2b5   :  { %v1411_v26 = vmul.f32 %v1410_v31, %v10040_v0  ;;  %v1422_v55 = vmul.f32 %v1399_v32, %v6431_v29  ;;  %v1555_v31 = vmul.f32 %v1553_v50, %v10044_v30  ;;  %v10048_v29 = vld [vmem:[#allocation23_spill] sm:$0xff] }
 0x2b6   :  { %1951 = vmatpush1.msra.mxu1 %v1705_v53  ;;  %v10043_v53 = vld [vmem:[#allocation17_spill] sm:$0xff]  ;;  %v1604_v28 = vmul.f32 %v1600_v46, %v10048_v29 }
 0x2b7   :  { %v4833_v39 = vpack.c.bf16 %v1411_v26, %v1363_v25  ;;  %v1446_v7 = vpop.permute.xlu1 %1445  ;;  %4636 = vmatmul.mubr.msk.f32.vlgmr.msra.gmra.mrb[8].mxu1 %vm885_vm8, %v7060_v56  ;;  %v1494_v37 = vpop.permute.xlu0 %1493  ;;  %v4911_v23 = vpack.c.bf16 %v1422_v55, %v1374_v38  ;;  %v10046_v38 = vld [vmem:[#allocation24_spill] sm:$0xff]  ;;  %v4841_v50 = vpack.c.bf16 %v1555_v31, %v6696_v34  ;;  %v1357_v34 = vsel %vm126_vm0, %v7046_v54, %v7081_v36 }
 0x2b8   :  { %v1458_v44 = vsel %vm320_vm2, %v1446_v7, %v6855_v27  ;;  %v1506_v11 = vsel %vm417_vm3, %v1494_v37, %v6873_v13  ;;  %2140 = vmatprep.mubr.f32.mxu1 %v9924_v48  ;;  %v1601_v27 = vsel %vm611_vm5, %v6895_v1, %v6964_v61  ;;  %v10045_v13 = vld [vmem:[#allocation30_spill] sm:$0xff]  ;;  %v1652_v26 = vmul.f32 %v1648_v17, %v10046_v38 }
 0x2b9   :  { %v1459_v42 = vmul.f32 %v1458_v44, %v10042_v62  ;;  %v1507_v32 = vmul.f32 %v1506_v11, %v10043_v53  ;;  %4834 = vmatpush1.bf16.msra.mxu0 %v4833_v39  ;;  %4912 = vmatprep.subr.bf16.mxu1 %v4911_v23  ;;  %v1651_v25 = vmul.f32 %v1649_v58, %v10045_v13 }
 0x2ba   :  { %4836 = vmatprep.subr.bf16.mxu0 %v4835_v24  ;;  %v4839_v11 = vpack.c.bf16 %v1556_v16, %v6726_v47  ;;  %v1603_v4 = vmul.f32 %v1601_v27, %v10047_v12  ;;  %v1447_v61 = vsel %vm320_vm2, %v7137_v18, %v1446_v7  ;;  %v1495_v24 = vsel %vm417_vm3, %v7170_v41, %v1494_v37  ;;  %v10052_v27 = vld [vmem:[#allocation106_spill] sm:$0xff] }
 0x2bb   :  { %v4837_v55 = vpack.c.bf16 %v1507_v32, %v1459_v42  ;;  %v1480_v39 = vpop.permute.xlu1 %1479  ;;  %v7240_v44 = vpop.permute.xlu0 %1393  ;;  %v1696_v16 = vsel %vm805_vm7, %v6998_v20, %v6838_v9  ;;  %v1406_v7 = vsel %vm223_vm1, %v6893_v2, %v7072_v57  ;;  %v4843_v9 = vpack.c.bf16 %v1652_v26, %v1604_v28  ;;  %v10050_v32 = vld [vmem:[#allocation104_spill] sm:$0xff] }
 0x2bc   :  { %v1400_v47 = vsel %vm223_vm1, %v7240_v44, %v7125_v49  ;;  %v4845_v23 = vpack.c.bf16 %v1651_v25, %v1603_v4  ;;  %v1405_v49 = vsel %vm223_vm1, %v7072_v57, %v7083_v60  ;;  %v1470_v4 = vmul.f32 %v1447_v61, %v6502_v45  ;;  %v10049_v60 = vld [vmem:[#allocation32_spill] sm:$0xff]  ;;  %v10053_v25 = vld [vmem:[#allocation119_spill] sm:$0xff]  ;;  %v10055_v61 = vld [vmem:[#allocation34_spill] sm:$0xff] }
 0x2bd   :  { %4838 = vmatpush1.bf16.msra.mxu0 %v4837_v55  ;;  %v1518_v17 = vmul.f32 %v1495_v24, %v6511_v6  ;;  %v1697_v28 = vsel %vm805_vm7, %v6871_v33, %v6998_v20  ;;  %v1421_v36 = vmul.f32 %v1400_v47, %v6435_v43  ;;  %v1700_v42 = vmul.f32 %v1696_v16, %v10049_v60  ;;  %v10054_v55 = vld [vmem:[#allocation36_spill] sm:$0xff]  ;;  %v10061_v43 = vld [vmem:[#allocation82_spill] sm:$0xff]  ;;  %v10063_v6 = vld [vmem:[#allocation33_spill] sm:$0xff] }
 0x2be   :  { %4840 = vmatprep.subr.bf16.mxu0 %v4839_v11  ;;  %v1358_v46 = vsel %vm126_vm0, %v10050_v32, %v7046_v54  ;;  %v1501_v20 = vsel %vm417_vm3, %v1480_v39, %v10053_v25  ;;  %v1415_v11 = vmul.f32 %v1406_v7, %v10054_v55  ;;  %v1368_v24 = vmul.f32 %v1357_v34, %v10055_v61  ;;  %v10056_v54 = vld [vmem:[#allocation38_spill] sm:$0xff]  ;;  %v10142_v61 = vld [vmem:[#allocation3_spill] sm:$0xff] }
 0x2bf   :  { %v7268_v37 = vpop.permute.xlu1 %1345  ;;  %v4915_v34 = vpack.c.bf16 %v1518_v17, %v1470_v4  ;;  %v1367_v45 = vmul.f32 %v1358_v46, %v10063_v6  ;;  %v10065_v55 = vld [vmem:[#allocation46_spill] sm:$0xff]  ;;  %v10066_v4 = vld [vmem:[#allocation112_spill] sm:$0xff] }
 0x2c0   :  { %v1352_v2 = vsel %vm126_vm0, %v7268_v37, %v7155_v8  ;;  %v7280_v58 = vpop.permute.xlu0 %1441  ;;  %v10051_v8 = vld [vmem:[#allocation113_spill] sm:$0xff] }
 0x2c1   :  { %v1373_v57 = vmul.f32 %v1352_v2, %v6423_v5  ;;  %4842 = vmatpush1.bf16.msra.mxu0 %v4841_v50  ;;  %v1454_v31 = vsel %vm320_vm2, %v10052_v27, %v10051_v8  ;;  %v1448_v26 = vsel %vm320_vm2, %v7280_v58, %v7137_v18  ;;  %v1416_v50 = vmul.f32 %v1405_v49, %v10056_v54  ;;  %v10057_v2 = vld [vmem:[#allocation117_spill] sm:$0xff]  ;;  %v10058_v27 = vld [vmem:[#allocation107_spill] sm:$0xff] }
 0x2c2   :  { %4844 = vmatprep.subr.bf16.mxu0 %v4843_v9  ;;  %v1453_v32 = vsel %vm320_vm2, %v10051_v8, %v10057_v2  ;;  %v1502_v25 = vsel %vm417_vm3, %v10058_v27, %v1480_v39  ;;  %v10059_v9 = vld [vmem:[#allocation47_spill] sm:$0xff]  ;;  %v10062_v8 = vld [vmem:[#allocation41_spill] sm:$0xff]  ;;  %v10064_v39 = vld [vmem:[#allocation44_spill] sm:$0xff] }
 0x2c3   :  { %v4913_v16 = vpack.c.bf16 %v1421_v36, %v1373_v57  ;;  %v7307_v47 = vpop.permute.xlu1 %1489  ;;  %v1512_v49 = vmul.f32 %v1501_v20, %v10059_v9  ;;  %v10060_v36 = vld [vmem:[#allocation77_spill] sm:$0xff]  ;;  %v1699_v2 = vmul.f32 %v1697_v28, %v10062_v8  ;;  %v1464_v27 = vmul.f32 %v1453_v32, %v10064_v39  ;;  %v10145_v8 = vld [vmem:[#allocation8_spill] sm:$0xff] }
 0x2c4   :  { %v1496_v18 = vsel %vm417_vm3, %v7307_v47, %v7170_v41  ;;  %v1530_v7 = vpop.permute.xlu0 %1529  ;;  %v1469_v57 = vmul.f32 %v1448_v26, %v10060_v36  ;;  %v1511_v41 = vmul.f32 %v1502_v25, %v10065_v55  ;;  %v10067_v26 = vld [vmem:[#allocation45_spill] sm:$0xff]  ;;  %v4863_v46 = vpack.c.bf16 %v1416_v50, %v1368_v24  ;;  %v10072_v50 = vld [vmem:[#allocation52_spill] sm:$0xff] }
 0x2c5   :  { %v1517_v5 = vmul.f32 %v1496_v18, %v10061_v43  ;;  %4846 = vmatpush1.bf16.msra.mxu0 %v4845_v23  ;;  %4914 = vmatpush1.bf16.msra.mxu1 %v4913_v16  ;;  %v1548_v17 = vsel %vm514_vm4, %v1530_v7, %v10066_v4  ;;  %v1463_v23 = vmul.f32 %v1454_v31, %v10067_v26  ;;  %v10068_v18 = vld [vmem:[#allocation111_spill] sm:$0xff]  ;;  %v10141_v26 = vld [vmem:[#allocation16_spill] sm:$0xff] }
 0x2c6   :  { %1737 = vmatprep.subr.mxu0 %v1700_v42  ;;  %4916 = vmatprep.subr.bf16.mxu1 %v4915_v34  ;;  %v4865_v16 = vpack.c.bf16 %v1415_v11, %v1367_v45  ;;  %v1549_v28 = vsel %vm514_vm4, %v10068_v18, %v1530_v7  ;;  %v4867_v25 = vpack.c.bf16 %v1512_v49, %v1464_v27  ;;  %v10069_v34 = vld [vmem:[#allocation53_spill] sm:$0xff]  ;;  %v10070_v45 = vld [vmem:[#allocation87_spill] sm:$0xff] }
 0x2c7   :  { %v4917_v54 = vpack.c.bf16 %v1517_v5, %v1469_v57  ;;  %v7330_v20 = vpop.permute.xlu1 %1635  ;;  %v1560_v31 = vmul.f32 %v1548_v17, %v10069_v34  ;;  %v10071_v57 = vld [vmem:[#allocation86_spill] sm:$0xff]  ;;  %v4869_v24 = vpack.c.bf16 %v1511_v41, %v1463_v23  ;;  %v1559_v7 = vmul.f32 %v1549_v28, %v10072_v50  ;;  %v10074_v17 = vld [vmem:[#allocation103_spill] sm:$0xff] }
 0x2c8   :  { %v1542_v42 = vpop.permute.xlu0 %1541  ;;  %v10075_v23 = vld [vmem:[#allocation95_spill] sm:$0xff] }
 0x2c9   :  { %v1543_v32 = vsel %vm514_vm4, %v7157_v21, %v1542_v42  ;;  %v1554_v5 = vsel %vm514_vm4, %v1542_v42, %v6882_v63  ;;  %1738 = vmatpush1.msra.mxu0 %v1699_v2  ;;  %4918 = vmatpush1.bf16.msra.mxu1 %v4917_v54  ;;  %v10073_v63 = vld [vmem:[#allocation102_spill] sm:$0xff] }
 0x2ca   :  { %v1565_v11 = vmul.f32 %v1543_v32, %v10070_v45  ;;  %v1566_v4 = vmul.f32 %v1554_v5, %v10071_v57  ;;  %4633 = vmatmul.mubr.msk.f32.vlgmr.msra.gmra.mrb[6].mxu0 %vm885_vm8, %v7060_v56  ;;  %4864 = vmatprep.subr.bf16.mxu0 %v4863_v46  ;;  %v10076_v42 = vld [vmem:[#allocation94_spill] sm:$0xff]  ;;  %v10077_v5 = vld [vmem:[#allocation93_spill] sm:$0xff] }
 0x2cb   :  { %v1638_v18 = vpop.permute.xlu1 %1637  ;;  %4866 = vmatpush1.bf16.msra.mxu0 %v4865_v16  ;;  %1927 = vmatprep.mubr.f32.mxu0 %v9924_v48 }
 0x2cc   :  { %v4921_v54 = vpack.c.bf16 %v1565_v11, %v10073_v63  ;;  %v1639_v49 = vsel %vm708_vm6, %v7330_v20, %v1638_v18  ;;  %v1650_v2 = vsel %vm708_vm6, %v1638_v18, %v6863_v14  ;;  %v1590_v27 = vpop.permute.xlu0 %1589  ;;  %4868 = vmatprep.subr.bf16.mxu0 %v4867_v25  ;;  %v4919_v41 = vpack.c.bf16 %v1566_v4, %v10074_v17  ;;  %v10078_v63 = vld [vmem:[#allocation92_spill] sm:$0xff] }
 0x2cd   :  { %v1661_v28 = vmul.f32 %v1639_v49, %v10075_v23  ;;  %v1662_v16 = vmul.f32 %v1650_v2, %v10076_v42  ;;  %v1591_v46 = vsel %vm611_vm5, %v7188_v51, %v1590_v27  ;;  %v1602_v32 = vsel %vm611_vm5, %v1590_v27, %v6895_v1  ;;  %v10079_v25 = vld [vmem:[#allocation100_spill] sm:$0xff]  ;;  %v10080_v1 = vld [vmem:[#allocation99_spill] sm:$0xff] }
 0x2ce   :  { %v1613_v11 = vmul.f32 %v1591_v46, %v10077_v5  ;;  %v1614_v14 = vmul.f32 %v1602_v32, %v10078_v63  ;;  %4920 = vmatprep.subr.bf16.mxu1 %v4919_v41  ;;  %v4871_v18 = vpack.c.bf16 %v1560_v31, %v10079_v25  ;;  %v4873_v27 = vpack.c.bf16 %v1559_v7, %v10080_v1  ;;  %v10081_v46 = vld [vmem:[#allocation96_spill] sm:$0xff]  ;;  %v10088_v1 = vld [vmem:[#allocation59_spill] sm:$0xff] }
 0x2cf   :  { %4922 = vmatpush1.bf16.msra.mxu1 %v4921_v54  ;;  %v1686_v4 = vpop.permute.xlu1 %1685  ;;  %4870 = vmatpush1.bf16.msra.mxu0 %v4869_v24  ;;  %v10082_v54 = vld [vmem:[#allocation98_spill] sm:$0xff]  ;;  %v10083_v32 = vld [vmem:[#allocation108_spill] sm:$0xff]  ;;  %v10099_v5 = vld [vmem:[#allocation83_spill] sm:$0xff] }
 0x2d0   :  { %v4925_v49 = vpack.c.bf16 %v1661_v28, %v1613_v11  ;;  %v1698_v2 = vsel %vm805_vm7, %v1686_v4, %v6871_v33  ;;  %v7371_v17 = vpop.permute.xlu0 %1683  ;;  %4872 = vmatprep.subr.bf16.mxu0 %v4871_v18  ;;  %v4923_v42 = vpack.c.bf16 %v1662_v16, %v1614_v14  ;;  %v10084_v11 = vld [vmem:[#allocation57_spill] sm:$0xff]  ;;  %v10085_v25 = vld [vmem:[#allocation56_spill] sm:$0xff] }
 0x2d1   :  { %v1687_v41 = vsel %vm805_vm7, %v7371_v17, %v1686_v4  ;;  %v1710_v31 = vmul.f32 %v1698_v2, %v10081_v46  ;;  %v10086_v4 = vld [vmem:[#allocation109_spill] sm:$0xff]  ;;  %v10087_v2 = vld [vmem:[#allocation58_spill] sm:$0xff] }
 0x2d2   :  { %4924 = vmatprep.subr.bf16.mxu1 %v4923_v42  ;;  %v1709_v28 = vmul.f32 %v1687_v41, %v10082_v54  ;;  %v10094_v54 = vld [vmem:[#allocation64_spill] sm:$0xff] }
 0x2d3   :  { %4926 = vmatpush1.bf16.msra.mxu1 %v4925_v49  ;;  %v1578_v24 = vpop.permute.xlu1 %1577  ;;  %4874 = vmatpush1.bf16.msra.mxu0 %v4873_v27 }
 0x2d4   :  { %v1596_v33 = vsel %vm611_vm5, %v1578_v24, %v7052_v3  ;;  %v1597_v7 = vsel %vm611_vm5, %v10083_v32, %v1578_v24  ;;  %2092 = vmatprep.subr.mxu1 %v1710_v31  ;;  %v1626_v16 = vpop.permute.xlu0 %1625 }
 0x2d5   :  { %v1607_v14 = vmul.f32 %v1597_v7, %v10084_v11  ;;  %v1608_v18 = vmul.f32 %v1596_v33, %v10085_v25  ;;  %v1644_v42 = vsel %vm708_vm6, %v1626_v16, %v7037_v19  ;;  %v1645_v49 = vsel %vm708_vm6, %v10086_v4, %v1626_v16  ;;  %v10089_v33 = vld [vmem:[#allocation110_spill] sm:$0xff] }
 0x2d6   :  { %v1655_v3 = vmul.f32 %v1645_v49, %v10087_v2  ;;  %v1656_v27 = vmul.f32 %v1644_v42, %v10088_v1  ;;  %v10091_v42 = vld [vmem:[#allocation69_spill] sm:$0xff] }
 0x2d7   :  { %2093 = vmatpush1.msra.mxu1 %v1709_v28  ;;  %v1674_v41 = vpop.permute.xlu1 %1673  ;;  %v10090_v28 = vld [vmem:[#allocation114_spill] sm:$0xff] }
 0x2d8   :  { %v4877_v31 = vpack.c.bf16 %v1655_v3, %v1607_v14  ;;  %v1692_v24 = vsel %vm805_vm7, %v1674_v41, %v7062_v35  ;;  %v1693_v32 = vsel %vm805_vm7, %v10089_v33, %v1674_v41  ;;  %4638 = vmatmul.mubr.msk.f32.vlgmr.msra.gmra.mrb[10].mxu1 %vm885_vm8, %v7060_v56  ;;  %v1344_v19 = vpop.permute.xlu0 %1343  ;;  %v4875_v7 = vpack.c.bf16 %v1656_v27, %v1608_v18  ;;  %v10092_v35 = vld [vmem:[#allocation68_spill] sm:$0xff]  ;;  %v10093_v41 = vld [vmem:[#allocation66_spill] sm:$0xff] }
 0x2d9   :  { %v1353_v16 = vsel %vm126_vm0, %v1344_v19, %v7268_v37  ;;  %v1354_v14 = vsel %vm126_vm0, %v10090_v28, %v1344_v19  ;;  %v1704_v4 = vmul.f32 %v1692_v24, %v10091_v42  ;;  %v1703_v49 = vmul.f32 %v1693_v32, %v10092_v35  ;;  %v10095_v37 = vld [vmem:[#allocation115_spill] sm:$0xff]  ;;  %v10097_v28 = vld [vmem:[#allocation65_spill] sm:$0xff] }
 0x2da   :  { %4876 = vmatprep.subr.bf16.mxu0 %v4875_v7  ;;  %v1371_v33 = vmul.f32 %v1354_v14, %v10093_v41  ;;  %v1372_v46 = vmul.f32 %v1353_v16, %v10094_v54  ;;  %v10096_v24 = vld [vmem:[#allocation67_spill] sm:$0xff]  ;;  %v10098_v14 = vld [vmem:[#allocation116_spill] sm:$0xff] }
 0x2db   :  { %4878 = vmatpush1.bf16.msra.mxu0 %v4877_v31  ;;  %v1392_v3 = vpop.permute.xlu1 %1391 }
 0x2dc   :  { %v1401_v18 = vsel %vm223_vm1, %v1392_v3, %v7240_v44  ;;  %v1402_v27 = vsel %vm223_vm1, %v10095_v37, %v1392_v3  ;;  %1879 = vmatprep.subr.mxu0 %v1704_v4  ;;  %v1440_v19 = vpop.permute.xlu0 %1439  ;;  %v10100_v4 = vld [vmem:[#allocation76_spill] sm:$0xff] }
 0x2dd   :  { %v1419_v7 = vmul.f32 %v1402_v27, %v10096_v24  ;;  %v1420_v32 = vmul.f32 %v1401_v18, %v10097_v28  ;;  %v1449_v31 = vsel %vm320_vm2, %v1440_v19, %v7280_v58  ;;  %v1450_v16 = vsel %vm320_vm2, %v10098_v14, %v1440_v19  ;;  %v10101_v27 = vld [vmem:[#allocation118_spill] sm:$0xff]  ;;  %v10105_v14 = vld [vmem:[#allocation85_spill] sm:$0xff] }
 0x2de   :  { %v1467_v3 = vmul.f32 %v1450_v16, %v10099_v5  ;;  %v1468_v37 = vmul.f32 %v1449_v31, %v10100_v4  ;;  %v10104_v31 = vld [vmem:[#allocation122_spill] sm:$0xff] }
 0x2df   :  { %v4897_v23 = vpack.c.bf16 %v1419_v7, %v1371_v33  ;;  %1880 = vmatpush1.msra.mxu0 %v1703_v49  ;;  %v1488_v44 = vpop.permute.xlu1 %1487  ;;  %v4895_v63 = vpack.c.bf16 %v1420_v32, %v1372_v46  ;;  %v10102_v33 = vld [vmem:[#allocation78_spill] sm:$0xff]  ;;  %v10103_v7 = vld [vmem:[#allocation81_spill] sm:$0xff] }
 0x2e0   :  { %v1497_v18 = vsel %vm417_vm3, %v1488_v44, %v7307_v47  ;;  %v1498_v58 = vsel %vm417_vm3, %v10101_v27, %v1488_v44  ;;  %4635 = vmatmul.mubr.msk.f32.vlgmr.msra.gmra.mrb[8].mxu0 %vm885_vm8, %v7060_v56  ;;  %v1538_v19 = vpop.permute.xlu0 %1537 }
 0x2e1   :  { %v1515_v49 = vmul.f32 %v1498_v58, %v10102_v33  ;;  %v1516_v46 = vmul.f32 %v1497_v18, %v10103_v7  ;;  %v1544_v32 = vsel %vm514_vm4, %v1538_v19, %v7157_v21  ;;  %v1545_v47 = vsel %vm514_vm4, %v10104_v31, %v1538_v19  ;;  %4896 = vmatprep.subr.bf16.mxu0 %v4895_v63  ;;  %v10106_v58 = vld [vmem:[#allocation84_spill] sm:$0xff] }
 0x2e2   :  { %v1564_v16 = vmul.f32 %v1544_v32, %v10105_v14  ;;  %4898 = vmatpush1.bf16.msra.mxu0 %v4897_v23  ;;  %2069 = vmatprep.mubr.f32.mxu0 %v9924_v48  ;;  %v1563_v43 = vmul.f32 %v1545_v47, %v10106_v58  ;;  %v10107_v21 = vld [vmem:[#allocation120_spill] sm:$0xff]  ;;  %v10111_v32 = vld [vmem:[#allocation91_spill] sm:$0xff]  ;;  %v10113_v48 = vld [vmem:[#allocation89_spill] sm:$0xff] }
 0x2e3   :  { %v4901_v44 = vpack.c.bf16 %v1515_v49, %v1467_v3  ;;  %v1586_v27 = vpop.permute.xlu1 %1585  ;;  %v4899_v45 = vpack.c.bf16 %v1516_v46, %v1468_v37  ;;  %v10108_v63 = vld [vmem:[#allocation88_spill] sm:$0xff]  ;;  %v10109_v3 = vld [vmem:[#allocation121_spill] sm:$0xff] }
 0x2e4   :  { %v1592_v18 = vsel %vm611_vm5, %v1586_v27, %v7188_v51  ;;  %v1593_v7 = vsel %vm611_vm5, %v10107_v21, %v1586_v27  ;;  %v1634_v19 = vpop.permute.xlu0 %1633  ;;  %v10110_v49 = vld [vmem:[#allocation105_spill] sm:$0xff] }
 0x2e5   :  { %v1612_v31 = vmul.f32 %v1592_v18, %v10108_v63  ;;  %v1640_v23 = vsel %vm708_vm6, %v1634_v19, %v7330_v20  ;;  %v1641_v37 = vsel %vm708_vm6, %v10109_v3, %v1634_v19  ;;  %4900 = vmatprep.subr.bf16.mxu0 %v4899_v45  ;;  %v4903_v46 = vpack.c.bf16 %v1564_v16, %v10110_v49  ;;  %v10112_v27 = vld [vmem:[#allocation101_spill] sm:$0xff]  ;;  %v10114_v63 = vld [vmem:[#allocation90_spill] sm:$0xff] }
 0x2e6   :  { %v1660_v51 = vmul.f32 %v1640_v23, %v10111_v32  ;;  %4902 = vmatpush1.bf16.msra.mxu0 %v4901_v44  ;;  %v4905_v21 = vpack.c.bf16 %v1563_v43, %v10112_v27  ;;  %v1611_v18 = vmul.f32 %v1593_v7, %v10113_v48  ;;  %v1659_v14 = vmul.f32 %v1641_v37, %v10114_v63  ;;  %v10115_v44 = vld [vmem:[#allocation31_spill] sm:$0xff]  ;;  %v10116_v43 = vld [vmem:[#allocation97_spill] sm:$0xff]  ;;  %v10124_v32 = vld [vmem:[#allocation6_spill] sm:$0xff] }
 0x2e7   :  { %v1682_v47 = vpop.permute.xlu1 %1681  ;;  %4904 = vmatprep.subr.bf16.mxu0 %v4903_v46 }
 0x2e8   :  { %v4907_v58 = vpack.c.bf16 %v1660_v51, %v1612_v31  ;;  %v1688_v20 = vsel %vm805_vm7, %v1682_v47, %v7371_v17  ;;  %v4909_v45 = vpack.c.bf16 %v1659_v14, %v1611_v18  ;;  %v1689_v16 = vsel %vm805_vm7, %v7127_v52, %v1682_v47 }
 0x2e9   :  { %v1708_v19 = vmul.f32 %v1688_v20, %v10115_v44  ;;  %v1707_v7 = vmul.f32 %v1689_v16, %v10116_v43  ;;  %v10123_v43 = vld [vmem:[#allocation5_spill] sm:$0xff] }
 0x2ea   :  { %4906 = vmatpush1.bf16.msra.mxu0 %v4905_v21 }
 0x2eb   :  { %4908 = vmatprep.subr.bf16.mxu0 %v4907_v58 }
 0x2ee   :  { %4910 = vmatpush1.bf16.msra.mxu0 %v4909_v45 }
 0x2ef   :  { %2021 = vmatprep.subr.mxu0 %v1708_v19 }
 0x2f2   :  { %2022 = vmatpush1.msra.mxu0 %v1707_v7 }
 0x2f3   :  { %4637 = vmatmul.mubr.msk.f32.vlgmr.msra.gmra.mrb[10].mxu0 %vm885_vm8, %v7060_v56 }
 0x2f5   :  { %v7476_v31 = vpop.permute.xlu0 %1715 }
 0x356   :  { %v1858_v17 = vpop.f32.mrb[6].mxu1 }
 0x357   :  { %v1859_v58 = vadd.f32 %v1858_v17, %v7476_v31  ;;  %v1860_v14 = vpop.f32.mrb[7].mxu1 }
 0x358   :  { %v1861_v52 = vadd.f32 %v1860_v14, %v7476_v31 }
 0x359   :  { %v7479_v23 = vmax.f32 %v1859_v58, 0.0 }
 0x35a   :  { %v7486_v3 = vmax.f32 %v1861_v52, 0.0 }
 0x35b   :  { %2355 = vrot.lane.b32.xlu0 %v7479_v23, %s9982_s5  ;;  %2163 = vrot.lane.b32.xlu1 %v7479_v23, %s5383_s6 }
 0x35f   :  { %2165 = vrot.lane.b32.xlu0 %v7486_v3, %s5383_s6  ;;  %2211 = vrot.lane.b32.xlu1 %v7479_v23, %s5384_s2 }
 0x363   :  { %2213 = vrot.lane.b32.xlu0 %v7486_v3, %s5384_s2  ;;  %2259 = vrot.lane.b32.xlu1 %v7479_v23, %s5385_s8 }
 0x367   :  { %2261 = vrot.lane.b32.xlu0 %v7486_v3, %s5385_s8  ;;  %2307 = vrot.lane.b32.xlu1 %v7479_v23, %s5386_s4 }
 0x36b   :  { %2309 = vrot.lane.b32.xlu0 %v7486_v3, %s5386_s4  ;;  %2403 = vrot.lane.b32.xlu1 %v7479_v23, %s5388_s9 }
 0x36f   :  { %2405 = vrot.lane.b32.xlu0 %v7486_v3, %s5388_s9  ;;  %2451 = vrot.lane.b32.xlu1 %v7479_v23, %s9983_s26 }
 0x373   :  { %2453 = vrot.lane.b32.xlu0 %v7486_v3, %s9983_s26  ;;  %2499 = vrot.lane.b32.xlu1 %v7479_v23, %s9981_s27 }
 0x377   :  { %2501 = vrot.lane.b32.xlu0 %v7486_v3, %s9981_s27  ;;  %2357 = vrot.lane.b32.xlu1 %v7486_v3, %s9982_s5 }
 0x38a   :  { %v2000_v56 = vpop.f32.mrb[8].mxu1 }
 0x38b   :  { %v2001_v37 = vadd.f32 %v2000_v56, %v7476_v31  ;;  %v2002_v49 = vpop.f32.mrb[9].mxu1 }
 0x38c   :  { %v2003_v51 = vadd.f32 %v2002_v49, %v7476_v31 }
 0x38d   :  { %v7517_v46 = vmax.f32 %v2001_v37, 0.0 }
 0x38e   :  { %v7532_v47 = vmax.f32 %v2003_v51, 0.0 }
 0x38f   :  { %10117 = vst [vmem:[#allocation104_spill] sm:$0xff] %v7517_v46  ;;  %2171 = vrot.lane.b32.xlu0 %v7517_v46, %s5383_s6  ;;  %2219 = vrot.lane.b32.xlu1 %v7517_v46, %s5384_s2 }
 0x390   :  { %10118 = vst [vmem:[#allocation113_spill] sm:$0xff] %v7532_v47 }
 0x393   :  { %2363 = vrot.lane.b32.xlu0 %v7517_v46, %s9982_s5  ;;  %2267 = vrot.lane.b32.xlu1 %v7517_v46, %s5385_s8 }
 0x397   :  { %2411 = vrot.lane.b32.xlu0 %v7517_v46, %s5388_s9  ;;  %2315 = vrot.lane.b32.xlu1 %v7517_v46, %s5386_s4 }
 0x39b   :  { %2459 = vrot.lane.b32.xlu0 %v7517_v46, %s9983_s26  ;;  %2173 = vrot.lane.b32.xlu1 %v7532_v47, %s5383_s6 }
 0x39d   :  { %v1787_v27 = vpop.f32.mrb[6].mxu0 }
 0x39e   :  { %v1789_v21 = vpop.f32.mrb[7].mxu0  ;;  %v1788_v18 = vadd.f32 %v1787_v27, %v7476_v31 }
 0x39f   :  { %2507 = vrot.lane.b32.xlu0 %v7517_v46, %s9981_s27  ;;  %2365 = vrot.lane.b32.xlu1 %v7532_v47, %s9982_s5  ;;  %v1790_v19 = vadd.f32 %v1789_v21, %v7476_v31 }
 0x3a0   :  { %v7555_v16 = vmax.f32 %v1788_v18, 0.0 }
 0x3a1   :  { %v7566_v58 = vmax.f32 %v1790_v19, 0.0 }
 0x3a3   :  { %2221 = vrot.lane.b32.xlu0 %v7532_v47, %s5384_s2  ;;  %2413 = vrot.lane.b32.xlu1 %v7532_v47, %s5388_s9 }
 0x3a7   :  { %2269 = vrot.lane.b32.xlu0 %v7532_v47, %s5385_s8  ;;  %2461 = vrot.lane.b32.xlu1 %v7532_v47, %s9983_s26 }
 0x3ab   :  { %v2142_v20 = vpop.f32.mrb[10].mxu1  ;;  %2317 = vrot.lane.b32.xlu0 %v7532_v47, %s5386_s4  ;;  %2509 = vrot.lane.b32.xlu1 %v7532_v47, %s9981_s27 }
 0x3ac   :  { %v2144_v45 = vpop.f32.mrb[11].mxu1  ;;  %v2143_v14 = vadd.f32 %v2142_v20, %v7476_v31 }
 0x3ad   :  { %v2145_v27 = vadd.f32 %v2144_v45, %v7476_v31 }
 0x3ae   :  { %v7591_v37 = vmax.f32 %v2143_v14, 0.0 }
 0x3af   :  { %2399 = vrot.lane.b32.xlu0 %v7555_v16, %s5388_s9  ;;  %2159 = vrot.lane.b32.xlu1 %v7555_v16, %s5383_s6  ;;  %v7616_v20 = vmax.f32 %v2145_v27, 0.0 }
 0x3b0   :  { %10119 = vst [vmem:[#allocation106_spill] sm:$0xff] %v7591_v37 }
 0x3b1   :  { %10121 = vst [vmem:[#allocation117_spill] sm:$0xff] %v7616_v20 }
 0x3b3   :  { %v1929_v7 = vpop.f32.mrb[8].mxu0  ;;  %2495 = vrot.lane.b32.xlu0 %v7555_v16, %s9981_s27  ;;  %2207 = vrot.lane.b32.xlu1 %v7555_v16, %s5384_s2 }
 0x3b4   :  { %v1931_v17 = vpop.f32.mrb[9].mxu0  ;;  %v1930_v48 = vadd.f32 %v1929_v7, %v7476_v31 }
 0x3b7   :  { %2161 = vrot.lane.b32.xlu0 %v7566_v58, %s5383_s6  ;;  %2255 = vrot.lane.b32.xlu1 %v7555_v16, %s5385_s8 }
 0x3bb   :  { %2209 = vrot.lane.b32.xlu0 %v7566_v58, %s5384_s2  ;;  %2303 = vrot.lane.b32.xlu1 %v7555_v16, %s5386_s4 }
 0x3bf   :  { %2257 = vrot.lane.b32.xlu0 %v7566_v58, %s5385_s8  ;;  %2351 = vrot.lane.b32.xlu1 %v7555_v16, %s9982_s5 }
 0x3c3   :  { %2305 = vrot.lane.b32.xlu0 %v7566_v58, %s5386_s4  ;;  %2447 = vrot.lane.b32.xlu1 %v7555_v16, %s9983_s26 }
 0x3c6   :  { %v2071_v52 = vpop.f32.mrb[10].mxu0 }
 0x3c7   :  { %v7585_v56 = vpop.f32.mrb[11].mxu0  ;;  %2401 = vrot.lane.b32.xlu0 %v7566_v58, %s5388_s9  ;;  %2353 = vrot.lane.b32.xlu1 %v7566_v58, %s9982_s5 }
 0x3c8   :  { %v2074_v1 = vadd.f32 %v7585_v56, %v7476_v31 }
 0x3cb   :  { %2449 = vrot.lane.b32.xlu0 %v7566_v58, %s9983_s26  ;;  %2179 = vrot.lane.b32.xlu1 %v7591_v37, %s5383_s6 }
 0x3cd   :  { %v7597_v49 = vpop.permute.xlu0 %2355  ;;  %v7599_v51 = vpop.permute.xlu1 %2163 }
 0x3cf   :  { %2497 = vrot.lane.b32.xlu0 %v7566_v58, %s9981_s27  ;;  %2275 = vrot.lane.b32.xlu1 %v7591_v37, %s5385_s8 }
 0x3d1   :  { %v7606_v21 = vpop.permute.xlu0 %2165  ;;  %v7618_v19 = vpop.permute.xlu1 %2211 }
 0x3d2   :  { %10120 = vst [vmem:[#allocation119_spill] sm:$0xff] %v7606_v21  ;;  %v2191_v18 = vsel %vm126_vm0, %v7599_v51, %v7606_v21 }
 0x3d3   :  { %2227 = vrot.lane.b32.xlu0 %v7591_v37, %s5384_s2  ;;  %2419 = vrot.lane.b32.xlu1 %v7591_v37, %s5388_s9  ;;  %v2198_v44 = vmul.f32 %v2191_v18, %v10123_v43  ;;  %v7643_v18 = vmax.f32 %v1930_v48, 0.0 }
 0x3d5   :  { %v7620_v14 = vpop.permute.xlu0 %2213  ;;  %v7637_v36 = vpop.permute.xlu1 %2259  ;;  %10125 = vst [vmem:[#allocation112_spill] sm:$0xff] %v7643_v18 }
 0x3d6   :  { %10122 = vst [vmem:[#allocation107_spill] sm:$0xff] %v7620_v14  ;;  %v2239_v45 = vsel %vm223_vm1, %v7618_v19, %v7620_v14  ;;  %v10143_v14 = vld [vmem:[#allocation7_spill] sm:$0xff] }
 0x3d7   :  { %v2246_v63 = vmul.f32 %v2239_v45, %v10124_v32  ;;  %2323 = vrot.lane.b32.xlu0 %v7591_v37, %s5386_s4  ;;  %2181 = vrot.lane.b32.xlu1 %v7616_v20, %s5383_s6  ;;  %v1932_v45 = vadd.f32 %v1931_v17, %v7476_v31 }
 0x3d9   :  { %v4979_v27 = vpack.c.bf16 %v2246_v63, %v2198_v44  ;;  %v7649_v63 = vpop.permute.xlu0 %2261  ;;  %v7651_v44 = vpop.permute.xlu1 %2307 }
 0x3da   :  { %10126 = vst [vmem:[#allocation111_spill] sm:$0xff] %v7649_v63  ;;  %v2287_v55 = vsel %vm320_vm2, %v7637_v36, %v7649_v63  ;;  %v10144_v63 = vld [vmem:[#allocation4_spill] sm:$0xff] }
 0x3db   :  { %4980 = vmatprep.subr.bf16.mxu1 %v4979_v27  ;;  %2371 = vrot.lane.b32.xlu0 %v7591_v37, %s9982_s5  ;;  %v7670_v27 = vmax.f32 %v1932_v45, 0.0  ;;  %v2072_v45 = vadd.f32 %v2071_v52, %v7476_v31 }
 0x3dc   :  { %2277 = vrot.lane.b32.xlu1 %v7616_v20, %s5385_s8 }
 0x3dd   :  { %v7657_v7 = vpop.permute.xlu0 %2309  ;;  %v7659_v48 = vpop.permute.xlu1 %2403  ;;  %10128 = vst [vmem:[#allocation103_spill] sm:$0xff] %v7670_v27  ;;  %v7693_v5 = vmax.f32 %v2072_v45, 0.0 }
 0x3de   :  { %10127 = vst [vmem:[#allocation102_spill] sm:$0xff] %v7657_v7  ;;  %v2335_v47 = vsel %vm417_vm3, %v7651_v44, %v7657_v7 }
 0x3df   :  { %2229 = vrot.lane.b32.xlu0 %v7616_v20, %s5384_s2  ;;  %10129 = vst [vmem:[#allocation100_spill] sm:$0xff] %v7693_v5 }
 0x3e0   :  { %2373 = vrot.lane.b32.xlu1 %v7616_v20, %s9982_s5 }
 0x3e1   :  { %v7672_v32 = vpop.permute.xlu0 %2405  ;;  %v7674_v43 = vpop.permute.xlu1 %2451 }
 0x3e3   :  { %2325 = vrot.lane.b32.xlu0 %v7616_v20, %s5386_s4 }
 0x3e4   :  { %2407 = vrot.lane.b32.xlu1 %v7643_v18, %s5388_s9 }
 0x3e5   :  { %v7680_v4 = vpop.permute.xlu0 %2453  ;;  %v7682_v17 = vpop.permute.xlu1 %2499 }
 0x3e7   :  { %2421 = vrot.lane.b32.xlu0 %v7616_v20, %s5388_s9 }
 0x3e8   :  { %2455 = vrot.lane.b32.xlu1 %v7643_v18, %s9983_s26 }
 0x3e9   :  { %v7695_v33 = vpop.permute.xlu0 %2501  ;;  %v7697_v28 = vpop.permute.xlu1 %2357 }
 0x3eb   :  { %2359 = vrot.lane.b32.xlu0 %v7643_v18, %s9982_s5 }
 0x3ec   :  { %2503 = vrot.lane.b32.xlu1 %v7643_v18, %s9981_s27 }
 0x3ef   :  { %2167 = vrot.lane.b32.xlu0 %v7643_v18, %s5383_s6 }
 0x3f0   :  { %2215 = vrot.lane.b32.xlu1 %v7643_v18, %s5384_s2 }
 0x3f3   :  { %2217 = vrot.lane.b32.xlu0 %v7670_v27, %s5384_s2 }
 0x3f4   :  { %2263 = vrot.lane.b32.xlu1 %v7643_v18, %s5385_s8 }
 0x3f7   :  { %2265 = vrot.lane.b32.xlu0 %v7670_v27, %s5385_s8 }
 0x3f8   :  { %2311 = vrot.lane.b32.xlu1 %v7643_v18, %s5386_s4  ;;  %v7745_v18 = vmax.f32 %v2074_v1, 0.0 }
 0x3fa   :  { %10135 = vst [vmem:[#allocation115_spill] sm:$0xff] %v7745_v18 }
 0x3fb   :  { %2313 = vrot.lane.b32.xlu0 %v7670_v27, %s5386_s4 }
 0x3fc   :  { %2169 = vrot.lane.b32.xlu1 %v7670_v27, %s5383_s6 }
 0x3ff   :  { %2367 = vrot.lane.b32.xlu0 %v7693_v5, %s9982_s5 }
 0x400   :  { %2361 = vrot.lane.b32.xlu1 %v7670_v27, %s9982_s5 }
 0x401   :  { %v7703_v57 = vpop.permute.xlu0 %2171  ;;  %v7705_v52 = vpop.permute.xlu1 %2219 }
 0x403   :  { %2415 = vrot.lane.b32.xlu0 %v7693_v5, %s5388_s9 }
 0x404   :  { %2409 = vrot.lane.b32.xlu1 %v7670_v27, %s5388_s9 }
 0x405   :  { %v7711_v45 = vpop.permute.xlu0 %2363  ;;  %v7713_v54 = vpop.permute.xlu1 %2267 }
 0x406   :  { %10130 = vst [vmem:[#allocation99_spill] sm:$0xff] %v7711_v45  ;;  %v10146_v45 = vld [vmem:[#allocation14_spill] sm:$0xff] }
 0x407   :  { %2463 = vrot.lane.b32.xlu0 %v7693_v5, %s9983_s26 }
 0x408   :  { %2457 = vrot.lane.b32.xlu1 %v7670_v27, %s9983_s26 }
 0x409   :  { %v7719_v41 = vpop.permute.xlu0 %2411  ;;  %v7721_v24 = vpop.permute.xlu1 %2315 }
 0x40a   :  { %10131 = vst [vmem:[#allocation108_spill] sm:$0xff] %v7721_v24 }
 0x40b   :  { %2511 = vrot.lane.b32.xlu0 %v7693_v5, %s9981_s27 }
 0x40c   :  { %2505 = vrot.lane.b32.xlu1 %v7670_v27, %s9981_s27 }
 0x40d   :  { %v7727_v42 = vpop.permute.xlu0 %2459  ;;  %v7729_v35 = vpop.permute.xlu1 %2173 }
 0x40e   :  { %10132 = vst [vmem:[#allocation109_spill] sm:$0xff] %v7727_v42  ;;  %v2544_v42 = vld [vmem:[%s10138_s10 + $0x8] sm:$0xff] }
 0x40f   :  { %2223 = vrot.lane.b32.xlu0 %v7693_v5, %s5384_s2  ;;  %4639 = vmatprep.mubr.msk.f32.mxu0 %vm2551_vm9, %v2544_v42 }
 0x410   :  { %2175 = vrot.lane.b32.xlu1 %v7693_v5, %s5383_s6  ;;  %4640 = vmatprep.mubr.msk.f32.mxu1 %vm2551_vm9, %v2544_v42 }
 0x411   :  { %v7737_v2 = vpop.permute.xlu0 %2507  ;;  %v7739_v50 = vpop.permute.xlu1 %2365 }
 0x412   :  { %10133 = vst [vmem:[#allocation110_spill] sm:$0xff] %v7737_v2  ;;  %10134 = vst [vmem:[#allocation114_spill] sm:$0xff] %v7739_v50  ;;  %v2294_v50 = vmul.f32 %v2287_v55, %v10146_v45 }
 0x413   :  { %2319 = vrot.lane.b32.xlu0 %v7693_v5, %s5386_s4 }
 0x414   :  { %2271 = vrot.lane.b32.xlu1 %v7693_v5, %s5385_s8 }
 0x415   :  { %v7747_v11 = vpop.permute.xlu0 %2221  ;;  %v7749_v34 = vpop.permute.xlu1 %2413 }
 0x417   :  { %2177 = vrot.lane.b32.xlu0 %v7745_v18, %s5383_s6 }
 0x418   :  { %2225 = vrot.lane.b32.xlu1 %v7745_v18, %s5384_s2 }
 0x419   :  { %v7755_v31 = vpop.permute.xlu0 %2269  ;;  %v7757_v56 = vpop.permute.xlu1 %2461 }
 0x41a   :  { %10136 = vst [vmem:[#allocation116_spill] sm:$0xff] %v7757_v56 }
 0x41b   :  { %2273 = vrot.lane.b32.xlu0 %v7745_v18, %s5385_s8 }
 0x41c   :  { %2321 = vrot.lane.b32.xlu1 %v7745_v18, %s5386_s4 }
 0x41d   :  { %v7763_v1 = vpop.permute.xlu0 %2317  ;;  %v7765_v5 = vpop.permute.xlu1 %2509 }
 0x41e   :  { %10137 = vst [vmem:[#allocation118_spill] sm:$0xff] %v7765_v5 }
 0x41f   :  { %2467 = vrot.lane.b32.xlu0 %v7591_v37, %s9983_s26 }
 0x420   :  { %2369 = vrot.lane.b32.xlu1 %v7745_v18, %s9982_s5 }
 0x421   :  { %v7771_v46 = vpop.permute.xlu0 %2399  ;;  %v7773_v2 = vpop.permute.xlu1 %2159 }
 0x423   :  { %2417 = vrot.lane.b32.xlu0 %v7745_v18, %s5388_s9 }
 0x424   :  { %2465 = vrot.lane.b32.xlu1 %v7745_v18, %s9983_s26 }
 0x425   :  { %v7784_v5 = vpop.permute.xlu0 %2495  ;;  %v2208_v56 = vpop.permute.xlu1 %2207 }
 0x426   :  { %10139 = vst [vmem:[#allocation122_spill] sm:$0xff] %v7784_v5 }
 0x427   :  { %2513 = vrot.lane.b32.xlu0 %v7745_v18, %s9981_s27 }
 0x428   :  { %2469 = vrot.lane.b32.xlu1 %v7616_v20, %s9983_s26 }
 0x429   :  { %v2162_v27 = vpop.permute.xlu0 %2161  ;;  %v2256_v25 = vpop.permute.xlu1 %2255 }
 0x42a   :  { %v2192_v42 = vsel %vm126_vm0, %v2162_v27, %v7599_v51  ;;  %v2193_v18 = vsel %vm126_vm0, %v7773_v2, %v2162_v27  ;;  %v2342_v51 = vmul.f32 %v2335_v47, %v10141_v26 }
 0x42b   :  { %2517 = vrot.lane.b32.xlu0 %v7616_v20, %s9981_s27  ;;  %v2545_v20 = vld [vmem:[%s10140_s28] sm:$0xff]  ;;  %v2196_v39 = vmul.f32 %v2193_v18, %v10142_v61  ;;  %v2197_v6 = vmul.f32 %v2192_v42, %v10143_v14 }
 0x42c   :  { %2515 = vrot.lane.b32.xlu1 %v7591_v37, %s9981_s27 }
 0x42d   :  { %v2210_v9 = vpop.permute.xlu0 %2209  ;;  %v2304_v7 = vpop.permute.xlu1 %2303 }
 0x42e   :  { %v2240_v27 = vsel %vm223_vm1, %v2210_v9, %v7618_v19  ;;  %v2241_v37 = vsel %vm223_vm1, %v2208_v56, %v2210_v9  ;;  %v4983_v19 = vpack.c.bf16 %v2342_v51, %v2294_v50 }
 0x42f   :  { %v2244_v60 = vmul.f32 %v2241_v37, %v10144_v63  ;;  %v2245_v21 = vmul.f32 %v2240_v27, %v10145_v8 }
 0x430   :  { %2548 = vperm.xlu1 %5380, %v2545_v20   ;;  %v10148_v20 = vld [vmem:[#allocation15_spill] sm:$0xff] }
 0x431   :  { %v4981_v5 = vpack.c.bf16 %v2245_v21, %v2197_v6  ;;  %v2258_v47 = vpop.permute.xlu0 %2257  ;;  %v7822_v26 = vpop.permute.xlu1 %2351  ;;  %v4927_v24 = vpack.c.bf16 %v2244_v60, %v2196_v39  ;;  %v10147_v6 = vld [vmem:[#allocation13_spill] sm:$0xff] }
 0x432   :  { %v2288_v9 = vsel %vm320_vm2, %v2258_v47, %v7637_v36 }
 0x433   :  { %4928 = vmatprep.subr.bf16.mxu0 %v4927_v24  ;;  %4982 = vmatpush1.bf16.msra.mxu1 %v4981_v5  ;;  %v2293_v21 = vmul.f32 %v2288_v9, %v10147_v6  ;;  %v2289_v6 = vsel %vm320_vm2, %v2256_v25, %v2258_v47 }
 0x434   :  { %4984 = vmatprep.subr.bf16.mxu1 %v4983_v19  ;;  %v2292_v47 = vmul.f32 %v2289_v6, %v10038_v10 }
 0x435   :  { %v2306_v18 = vpop.permute.xlu0 %2305  ;;  %v7827_v37 = vpop.permute.xlu1 %2447 }
 0x436   :  { %v2336_v55 = vsel %vm417_vm3, %v2306_v18, %v7651_v44 }
 0x437   :  { %v2341_v42 = vmul.f32 %v2336_v55, %v10148_v20 }
 0x439   :  { %v4985_v60 = vpack.c.bf16 %v2341_v42, %v2293_v21  ;;  %v2402_v39 = vpop.permute.xlu0 %2401  ;;  %v2354_v50 = vpop.permute.xlu1 %2353  ;;  %v2337_v42 = vsel %vm417_vm3, %v2304_v7, %v2306_v18 }
 0x43a   :  { %v2340_v20 = vmul.f32 %v2337_v42, %v10037_v59  ;;  %v2384_v18 = vsel %vm514_vm4, %v2354_v50, %v7597_v49 }
 0x43b   :  { %4986 = vmatpush1.bf16.msra.mxu1 %v4985_v60 }
 0x43c   :  { %v4931_v6 = vpack.c.bf16 %v2340_v20, %v2292_v47 }
 0x43d   :  { %v2450_v5 = vpop.permute.xlu0 %2449  ;;  %v7834_v24 = vpop.permute.xlu1 %2179 }
 0x43e   :  { %v2481_v20 = vsel %vm708_vm6, %v7827_v37, %v2450_v5 }
 0x441   :  { %v7836_v36 = vpop.permute.xlu0 %2497  ;;  %v7838_v51 = vpop.permute.xlu1 %2275 }
 0x445   :  { %v7840_v27 = vpop.permute.xlu0 %2227  ;;  %v7842_v19 = vpop.permute.xlu1 %2419 }
 0x446   :  { %10149 = vst [vmem:[#allocation120_spill] sm:$0xff] %v7842_v19  ;;  %v2388_v19 = vmul.f32 %v2384_v18, %v10041_v22 }
 0x449   :  { %v7844_v44 = vpop.permute.xlu0 %2323  ;;  %v7846_v9 = vpop.permute.xlu1 %2181 }
 0x44a   :  { %v2194_v60 = vsel %vm126_vm0, %v7846_v9, %v7773_v2 }
 0x44b   :  { %v2195_v63 = vmul.f32 %v2194_v60, %v10039_v40 }
 0x44d   :  { %v7848_v55 = vpop.permute.xlu0 %2371 }
 0x44e   :  { %v7850_v21 = vpop.permute.xlu1 %2277 }
 0x44f   :  { %v2290_v42 = vsel %vm320_vm2, %v7850_v21, %v2256_v25  ;;  %v2480_v25 = vsel %vm708_vm6, %v2450_v5, %v7674_v43 }
 0x450   :  { %v2484_v47 = vmul.f32 %v2480_v25, %v10046_v38 }
 0x451   :  { %v7860_v45 = vpop.permute.xlu0 %2229 }
 0x452   :  { %v2242_v14 = vsel %vm223_vm1, %v7860_v45, %v2208_v56  ;;  %v7866_v8 = vpop.permute.xlu1 %2373  ;;  %v2385_v56 = vsel %vm514_vm4, %v7822_v26, %v2354_v50  ;;  %v2432_v50 = vsel %vm611_vm5, %v2402_v39, %v7659_v48 }
 0x453   :  { %v2243_v2 = vmul.f32 %v2242_v14, %v10040_v0  ;;  %v2387_v18 = vmul.f32 %v2385_v56, %v10044_v30  ;;  %v2433_v56 = vsel %vm611_vm5, %v7771_v46, %v2402_v39 }
 0x455   :  { %v4929_v59 = vpack.c.bf16 %v2243_v2, %v2195_v63  ;;  %v7877_v61 = vpop.permute.xlu0 %2325  ;;  %v2291_v63 = vmul.f32 %v2290_v42, %v10042_v62  ;;  %v10170_v62 = vld [vmem:[#allocation111_spill] sm:$0xff] }
 0x456   :  { %v2338_v60 = vsel %vm417_vm3, %v7877_v61, %v2304_v7  ;;  %v7886_v14 = vpop.permute.xlu1 %2407 }
 0x457   :  { %v2339_v2 = vmul.f32 %v2338_v60, %v10043_v53  ;;  %4930 = vmatpush1.bf16.msra.mxu0 %v4929_v59  ;;  %v4935_v59 = vpack.c.bf16 %v2388_v19, %v7566_v58  ;;  %v2383_v60 = vsel %vm514_vm4, %v7597_v49, %v7697_v28  ;;  %v4937_v58 = vpack.c.bf16 %v2387_v18, %v7555_v16  ;;  %v10150_v49 = vld [vmem:[#allocation20_spill] sm:$0xff] }
 0x458   :  { %4932 = vmatprep.subr.bf16.mxu0 %v4931_v6  ;;  %v2436_v6 = vmul.f32 %v2432_v50, %v10048_v29  ;;  %v2483_v19 = vmul.f32 %v2481_v20, %v10045_v13  ;;  %v2430_v39 = vsel %vm611_vm5, %v7672_v32, %v7886_v14  ;;  %v2479_v16 = vsel %vm708_vm6, %v7674_v43, %v7680_v4  ;;  %v10151_v20 = vld [vmem:[#allocation27_spill] sm:$0xff] }
 0x459   :  { %v4933_v7 = vpack.c.bf16 %v2339_v2, %v2291_v63  ;;  %v7897_v22 = vpop.permute.xlu0 %2421  ;;  %v2389_v63 = vmul.f32 %v2383_v60, %v10150_v49  ;;  %v2435_v18 = vmul.f32 %v2433_v56, %v10047_v12  ;;  %v10152_v60 = vld [vmem:[#allocation21_spill] sm:$0xff]  ;;  %v10155_v13 = vld [vmem:[#allocation43_spill] sm:$0xff]  ;;  %v10169_v49 = vld [vmem:[#allocation32_spill] sm:$0xff] }
 0x45a   :  { %v7903_v42 = vpop.permute.xlu1 %2455 }
 0x45b   :  { %4934 = vmatpush1.bf16.msra.mxu0 %v4933_v7  ;;  %v2478_v5 = vsel %vm708_vm6, %v7680_v4, %v7903_v42  ;;  %v4939_v7 = vpack.c.bf16 %v2484_v47, %v2436_v6  ;;  %v2431_v47 = vsel %vm611_vm5, %v7659_v48, %v7672_v32  ;;  %v4941_v6 = vpack.c.bf16 %v2483_v19, %v2435_v18  ;;  %v10153_v4 = vld [vmem:[#allocation25_spill] sm:$0xff]  ;;  %v10156_v48 = vld [vmem:[#allocation28_spill] sm:$0xff] }
 0x45c   :  { %4936 = vmatprep.subr.bf16.mxu0 %v4935_v59  ;;  %v2486_v59 = vmul.f32 %v2478_v5, %v10151_v20  ;;  %v2438_v43 = vmul.f32 %v2430_v39, %v10153_v4  ;;  %v10154_v20 = vld [vmem:[#allocation26_spill] sm:$0xff]  ;;  %v2437_v19 = vmul.f32 %v2431_v47, %v10156_v48  ;;  %v10157_v39 = vld [vmem:[#allocation37_spill] sm:$0xff] }
 0x45d   :  { %v7920_v25 = vpop.permute.xlu0 %2359  ;;  %v10158_v47 = vld [vmem:[#allocation49_spill] sm:$0xff] }
 0x45e   :  { %v2382_v2 = vsel %vm514_vm4, %v7697_v28, %v7920_v25  ;;  %v7931_v50 = vpop.permute.xlu1 %2503  ;;  %v4991_v32 = vpack.c.bf16 %v2486_v59, %v2438_v43  ;;  %v2235_v59 = vsel %vm223_vm1, %v7705_v52, %v7747_v11 }
 0x45f   :  { %v2390_v38 = vmul.f32 %v2382_v2, %v10152_v60  ;;  %4938 = vmatpush1.bf16.msra.mxu0 %v4937_v58  ;;  %v2526_v28 = vsel %vm805_vm7, %v7695_v33, %v7931_v50  ;;  %v2485_v2 = vmul.f32 %v2479_v16, %v10154_v20  ;;  %v4989_v58 = vpack.c.bf16 %v2389_v63, %v7479_v23 }
 0x460   :  { %4940 = vmatprep.subr.bf16.mxu0 %v4939_v7  ;;  %v2187_v7 = vsel %vm126_vm0, %v7703_v57, %v7729_v35  ;;  %v2534_v12 = vmul.f32 %v2526_v28, %v10155_v13  ;;  %v2283_v23 = vsel %vm320_vm2, %v7713_v54, %v7755_v31  ;;  %v2527_v28 = vsel %vm805_vm7, %v7682_v17, %v7695_v33  ;;  %v10165_v13 = vld [vmem:[#allocation119_spill] sm:$0xff] }
 0x461   :  { %v2168_v56 = vpop.permute.xlu0 %2167  ;;  %v4987_v5 = vpack.c.bf16 %v2390_v38, %v7486_v3  ;;  %v2202_v38 = vmul.f32 %v2187_v7, %v10157_v39  ;;  %v4993_v16 = vpack.c.bf16 %v2485_v2, %v2437_v19  ;;  %v10160_v7 = vld [vmem:[#allocation40_spill] sm:$0xff]  ;;  %v2528_v33 = vsel %vm805_vm7, %v7836_v36, %v7682_v17  ;;  %v10161_v19 = vld [vmem:[#allocation122_spill] sm:$0xff]  ;;  %v10167_v17 = vld [vmem:[#allocation51_spill] sm:$0xff] }
 0x462   :  { %v2216_v29 = vpop.permute.xlu1 %2215  ;;  %v2529_v39 = vsel %vm805_vm7, %v10161_v19, %v7836_v36  ;;  %v2532_v30 = vmul.f32 %v2528_v33, %v10169_v49  ;;  %v10172_v33 = vld [vmem:[#allocation107_spill] sm:$0xff] }
 0x463   :  { %4942 = vmatpush1.bf16.msra.mxu0 %v4941_v6  ;;  %4988 = vmatprep.subr.bf16.mxu1 %v4987_v5  ;;  %v4995_v18 = vpack.c.bf16 %v2202_v38, %v2534_v12  ;;  %v2298_v6 = vmul.f32 %v2283_v23, %v10158_v47  ;;  %v2427_v12 = vsel %vm611_vm5, %v7719_v41, %v7749_v34  ;;  %v10159_v5 = vld [vmem:[#allocation108_spill] sm:$0xff]  ;;  %v10162_v38 = vld [vmem:[#allocation42_spill] sm:$0xff] }
 0x464   :  { %4990 = vmatpush1.bf16.msra.mxu1 %v4989_v58  ;;  %v2331_v2 = vsel %vm417_vm3, %v10159_v5, %v7763_v1  ;;  %v10163_v23 = vld [vmem:[#allocation114_spill] sm:$0xff] }
 0x465   :  { %v2218_v3 = vpop.permute.xlu0 %2217  ;;  %4992 = vmatprep.subr.bf16.mxu1 %v4991_v32  ;;  %v2250_v32 = vmul.f32 %v2235_v59, %v10160_v7  ;;  %v2190_v59 = vsel %vm126_vm0, %v10165_v13, %v2168_v56  ;;  %v10166_v7 = vld [vmem:[#allocation60_spill] sm:$0xff]  ;;  %v2346_v4 = vmul.f32 %v2331_v2, %v10167_v17 }
 0x466   :  { %v2264_v63 = vpop.permute.xlu1 %2263  ;;  %v7998_v20 = vmul.f32 %v2427_v12, %v10166_v7  ;;  %v2237_v53 = vsel %vm223_vm1, %v2216_v29, %v2218_v3  ;;  %v10171_v7 = vld [vmem:[#allocation33_spill] sm:$0xff]  ;;  %v10173_v17 = vld [vmem:[#allocation44_spill] sm:$0xff] }
 0x467   :  { %v4999_v60 = vpack.c.bf16 %v2298_v6, %v2250_v32  ;;  %v2286_v13 = vsel %vm320_vm2, %v10170_v62, %v2264_v63  ;;  %v2199_v10 = vmul.f32 %v2190_v59, %v10171_v7  ;;  %v10175_v59 = vld [vmem:[#allocation35_spill] sm:$0xff] }
 0x468   :  { %4994 = vmatpush1.bf16.msra.mxu1 %v4993_v16  ;;  %v2533_v16 = vmul.f32 %v2527_v28, %v10162_v38  ;;  %v10168_v28 = vld [vmem:[#allocation41_spill] sm:$0xff] }
 0x469   :  { %v2266_v43 = vpop.permute.xlu0 %2265  ;;  %4996 = vmatprep.subr.bf16.mxu1 %v4995_v18  ;;  %v10164_v18 = vld [vmem:[#allocation99_spill] sm:$0xff]  ;;  %v2531_v38 = vmul.f32 %v2529_v39, %v10168_v28  ;;  %v2238_v39 = vsel %vm223_vm1, %v10172_v33, %v2216_v29  ;;  %v10178_v29 = vld [vmem:[#allocation48_spill] sm:$0xff] }
 0x46a   :  { %v2312_v58 = vpop.permute.xlu1 %2311  ;;  %v2379_v47 = vsel %vm514_vm4, %v10164_v18, %v10163_v23  ;;  %v2285_v48 = vsel %vm320_vm2, %v2264_v63, %v2266_v43  ;;  %v2284_v2 = vsel %vm320_vm2, %v2266_v43, %v7713_v54  ;;  %v10174_v63 = vld [vmem:[#allocation34_spill] sm:$0xff]  ;;  %v2236_v54 = vsel %vm223_vm1, %v2218_v3, %v7705_v52  ;;  %v10180_v52 = vld [vmem:[#allocation36_spill] sm:$0xff] }
 0x46b   :  { %v2296_v62 = vmul.f32 %v2285_v48, %v10173_v17  ;;  %v10176_v43 = vld [vmem:[#allocation38_spill] sm:$0xff]  ;;  %v2297_v33 = vmul.f32 %v2284_v2, %v10178_v29  ;;  %v2247_v3 = vmul.f32 %v2238_v39, %v10180_v52  ;;  %v10181_v2 = vld [vmem:[#allocation39_spill] sm:$0xff]  ;;  %v10191_v52 = vld [vmem:[#allocation116_spill] sm:$0xff] }
 0x46c   :  { %v2248_v28 = vmul.f32 %v2237_v53, %v10176_v43  ;;  %v10179_v48 = vld [vmem:[#allocation102_spill] sm:$0xff]  ;;  %v2249_v43 = vmul.f32 %v2236_v54, %v10181_v2 }
 0x46d   :  { %v2314_v36 = vpop.permute.xlu0 %2313  ;;  %v10185_v39 = vld [vmem:[#allocation50_spill] sm:$0xff] }
 0x46e   :  { %v2170_v12 = vpop.permute.xlu1 %2169  ;;  %v2332_v53 = vsel %vm417_vm3, %v2314_v36, %v10159_v5  ;;  %v10184_v5 = vld [vmem:[#allocation113_spill] sm:$0xff] }
 0x46f   :  { %v2188_v6 = vsel %vm126_vm0, %v2170_v12, %v7703_v57  ;;  %v2189_v32 = vsel %vm126_vm0, %v2168_v56, %v2170_v12  ;;  %v10177_v57 = vld [vmem:[#allocation45_spill] sm:$0xff]  ;;  %v2333_v56 = vsel %vm417_vm3, %v2312_v58, %v2314_v36  ;;  %v5001_v36 = vpack.c.bf16 %v2297_v33, %v2249_v43  ;;  %v10188_v33 = vld [vmem:[#allocation54_spill] sm:$0xff]  ;;  %v10195_v43 = vld [vmem:[#allocation104_spill] sm:$0xff] }
 0x470   :  { %v2200_v49 = vmul.f32 %v2189_v32, %v10174_v63  ;;  %v2201_v7 = vmul.f32 %v2188_v6, %v10175_v59  ;;  %v2295_v0 = vmul.f32 %v2286_v13, %v10177_v57  ;;  %v2334_v32 = vsel %vm417_vm3, %v10179_v48, %v2312_v58  ;;  %v10182_v57 = vld [vmem:[#allocation47_spill] sm:$0xff] }
 0x471   :  { %v8032_v12 = vpop.permute.xlu0 %2367  ;;  %v4945_v59 = vpack.c.bf16 %v2199_v10, %v2531_v38  ;;  %v2344_v29 = vmul.f32 %v2333_v56, %v10182_v57  ;;  %v4947_v58 = vpack.c.bf16 %v2296_v62, %v2248_v28  ;;  %v10183_v10 = vld [vmem:[#allocation46_spill] sm:$0xff]  ;;  %v10187_v28 = vld [vmem:[#allocation61_spill] sm:$0xff] }
 0x472   :  { %v4997_v6 = vpack.c.bf16 %v2201_v7, %v2533_v16  ;;  %v2362_v17 = vpop.permute.xlu1 %2361  ;;  %v4943_v63 = vpack.c.bf16 %v2200_v49, %v2532_v30  ;;  %v2378_v13 = vsel %vm514_vm4, %v10163_v23, %v8032_v12  ;;  %v4949_v30 = vpack.c.bf16 %v2295_v0, %v2247_v3  ;;  %v10186_v23 = vld [vmem:[#allocation55_spill] sm:$0xff]  ;;  %v10192_v3 = vld [vmem:[#allocation109_spill] sm:$0xff] }
 0x473   :  { %v2343_v49 = vmul.f32 %v2334_v32, %v10183_v10  ;;  %v5003_v16 = vpack.c.bf16 %v10184_v5, %v2346_v4  ;;  %v2345_v7 = vmul.f32 %v2332_v53, %v10185_v39  ;;  %v2394_v48 = vmul.f32 %v2378_v13, %v10186_v23  ;;  %v10194_v13 = vld [vmem:[#allocation110_spill] sm:$0xff]  ;;  %v10197_v10 = vld [vmem:[#allocation57_spill] sm:$0xff] }
 0x474   :  { %4944 = vmatprep.subr.bf16.mxu0 %v4943_v63  ;;  %4998 = vmatpush1.bf16.msra.mxu1 %v4997_v6  ;;  %v2393_v32 = vmul.f32 %v2379_v47, %v10188_v33  ;;  %v10189_v6 = vld [vmem:[#allocation56_spill] sm:$0xff]  ;;  %v10190_v63 = vld [vmem:[#allocation103_spill] sm:$0xff]  ;;  %v10193_v47 = vld [vmem:[#allocation118_spill] sm:$0xff] }
 0x475   :  { %4946 = vmatpush1.bf16.msra.mxu0 %v4945_v59  ;;  %5000 = vmatprep.subr.bf16.mxu1 %v4999_v60  ;;  %v8049_v38 = vpop.permute.xlu0 %2415  ;;  %v2380_v60 = vsel %vm514_vm4, %v2362_v17, %v10164_v18  ;;  %v4951_v59 = vpack.c.bf16 %v10190_v63, %v2344_v29  ;;  %v2475_v18 = vsel %vm708_vm6, %v10192_v3, %v10191_v52  ;;  %v10196_v29 = vld [vmem:[#allocation53_spill] sm:$0xff]  ;;  %v10199_v39 = vld [vmem:[#allocation62_spill] sm:$0xff]  ;;  %v10204_v63 = vld [vmem:[#allocation75_spill] sm:$0xff] }
 0x476   :  { %v2426_v54 = vsel %vm611_vm5, %v7749_v34, %v8049_v38  ;;  %4948 = vmatprep.subr.bf16.mxu0 %v4947_v58  ;;  %v2410_v0 = vpop.permute.xlu1 %2409  ;;  %v2523_v2 = vsel %vm805_vm7, %v10194_v13, %v10193_v47  ;;  %v5005_v57 = vpack.c.bf16 %v10195_v43, %v2345_v7  ;;  %v2392_v58 = vmul.f32 %v2380_v60, %v10196_v29  ;;  %v10201_v60 = vld [vmem:[#allocation74_spill] sm:$0xff]  ;;  %v10208_v43 = vld [vmem:[#allocation69_spill] sm:$0xff]  ;;  %v10209_v29 = vld [vmem:[#allocation71_spill] sm:$0xff] }
 0x477   :  { %v2442_v62 = vmul.f32 %v2426_v54, %v10187_v28  ;;  %v2428_v4 = vsel %vm611_vm5, %v2410_v0, %v7719_v41  ;;  %v2429_v56 = vsel %vm611_vm5, %v7886_v14, %v2410_v0  ;;  %v2381_v41 = vsel %vm514_vm4, %v7920_v25, %v2362_v17 }
 0x478   :  { %v2440_v34 = vmul.f32 %v2428_v4, %v10189_v6  ;;  %5002 = vmatpush1.bf16.msra.mxu1 %v5001_v36  ;;  %v2439_v5 = vmul.f32 %v2429_v56, %v10197_v10  ;;  %v5009_v25 = vpack.c.bf16 %v7998_v20, %v2393_v32  ;;  %v2231_v17 = vsel %vm223_vm1, %v7840_v27, %v7860_v45  ;;  %v10202_v4 = vld [vmem:[#allocation72_spill] sm:$0xff] }
 0x479   :  { %4950 = vmatpush1.bf16.msra.mxu0 %v4949_v30  ;;  %5004 = vmatprep.subr.bf16.mxu1 %v5003_v16  ;;  %v8078_v53 = vpop.permute.xlu0 %2463  ;;  %v5007_v14 = vpack.c.bf16 %v2442_v62, %v2394_v48  ;;  %v10198_v30 = vld [vmem:[#allocation112_spill] sm:$0xff]  ;;  %v2489_v23 = vmul.f32 %v2475_v18, %v10199_v39  ;;  %v2537_v20 = vmul.f32 %v2523_v2, %v10201_v60 }
 0x47a   :  { %4952 = vmatprep.subr.bf16.mxu0 %v4951_v59  ;;  %v2458_v36 = vpop.permute.xlu1 %2457  ;;  %v4953_v16 = vpack.c.bf16 %v10198_v30, %v2343_v49  ;;  %v10200_v48 = vld [vmem:[#allocation52_spill] sm:$0xff]  ;;  %v2474_v7 = vsel %vm708_vm6, %v10191_v52, %v8078_v53  ;;  %v4955_v0 = vpack.c.bf16 %v2440_v34, %v2392_v58  ;;  %v2183_v62 = vsel %vm126_vm0, %v7834_v24, %v7846_v9 }
 0x47b   :  { %v2391_v54 = vmul.f32 %v2381_v41, %v10200_v48  ;;  %v2476_v28 = vsel %vm708_vm6, %v2458_v36, %v10192_v3  ;;  %v2477_v45 = vsel %vm708_vm6, %v7903_v42, %v2458_v36  ;;  %v2254_v56 = vmul.f32 %v2231_v17, %v10202_v4  ;;  %v10203_v42 = vld [vmem:[#allocation63_spill] sm:$0xff]  ;;  %v10205_v3 = vld [vmem:[#allocation58_spill] sm:$0xff]  ;;  %v10207_v2 = vld [vmem:[#allocation68_spill] sm:$0xff] }
 0x47c   :  { %5006 = vmatpush1.bf16.msra.mxu1 %v5005_v57  ;;  %v2490_v34 = vmul.f32 %v2474_v7, %v10203_v42  ;;  %v2487_v18 = vmul.f32 %v2477_v45, %v10205_v3  ;;  %v10206_v41 = vld [vmem:[#allocation59_spill] sm:$0xff]  ;;  %v2206_v58 = vmul.f32 %v2183_v62, %v10209_v29  ;;  %v5013_v36 = vpack.c.bf16 %v2537_v20, %v2489_v23  ;;  %v10213_v4 = vld [vmem:[#allocation66_spill] sm:$0xff]  ;;  %v10214_v42 = vld [vmem:[#allocation64_spill] sm:$0xff] }
 0x47d   :  { %4954 = vmatpush1.bf16.msra.mxu0 %v4953_v16  ;;  %5008 = vmatprep.subr.bf16.mxu1 %v5007_v14  ;;  %v8106_v49 = vpop.permute.xlu0 %2511  ;;  %v4957_v33 = vpack.c.bf16 %v2439_v5, %v2391_v54  ;;  %v2488_v14 = vmul.f32 %v2476_v28, %v10206_v41  ;;  %v2279_v16 = vsel %vm320_vm2, %v7838_v51, %v7850_v21  ;;  %v10210_v7 = vld [vmem:[#allocation79_spill] sm:$0xff]  ;;  %v5393_v21 = vmov 1983009808   ;;  %v10211_v28 = vld [vmem:[#allocation80_spill] sm:$0xff]  ;;  %v10217_v3 = vld [vmem:[#allocation65_spill] sm:$0xff] }
 0x47e   :  { %v2522_v32 = vsel %vm805_vm7, %v10193_v47, %v8106_v49  ;;  %4956 = vmatprep.subr.bf16.mxu0 %v4955_v0  ;;  %v2506_v6 = vpop.permute.xlu1 %2505  ;;  %v2327_v39 = vsel %vm417_vm3, %v7844_v44, %v7877_v61  ;;  %v2302_v0 = vmul.f32 %v2279_v16, %v10210_v7  ;;  %v2706_v60 = vunpack.c.l.s4 %v5393_v21  ;;  %v10212_v45 = vld [vmem:[#allocation67_spill] sm:$0xff]  ;;  %v10218_v41 = vld [vmem:[#allocation73_spill] sm:$0xff] }
 0x47f   :  { %v2538_v59 = vmul.f32 %v2522_v32, %v10204_v63  ;;  %v2524_v52 = vsel %vm805_vm7, %v2506_v6, %v10194_v13  ;;  %v2525_v9 = vsel %vm805_vm7, %v7931_v50, %v2506_v6  ;;  %v5015_v50 = vpack.c.bf16 %v2254_v56, %v2206_v58  ;;  %v10215_v63 = vld [vmem:[#allocation70_spill] sm:$0xff] }
 0x480   :  { %v2535_v47 = vmul.f32 %v2525_v9, %v10207_v2  ;;  %v2536_v57 = vmul.f32 %v2524_v52, %v10208_v43  ;;  %5010 = vmatpush1.bf16.msra.mxu1 %v5009_v25  ;;  %v2386_v20 = vsel %vm514_vm4, %v7866_v8, %v7822_v26  ;;  %v2350_v61 = vmul.f32 %v2327_v39, %v10211_v28 }
 0x481   :  { %4958 = vmatpush1.bf16.msra.mxu0 %v4957_v33  ;;  %v2224_v10 = vpop.permute.xlu0 %2223  ;;  %v5011_v5 = vpack.c.bf16 %v2538_v59, %v2490_v34  ;;  %v2707_v28 = vunpack.c.0.s8 %v2706_v60  ;;  %v10229_v60 = vld [vmem:[#allocation106_spill] sm:$0xff] }
 0x482   :  { %v4961_v13 = vpack.c.bf16 %v2535_v47, %v2487_v18  ;;  %v2176_v17 = vpop.permute.xlu1 %2175  ;;  %v4959_v30 = vpack.c.bf16 %v2536_v57, %v2488_v14  ;;  %v2234_v23 = vsel %vm223_vm1, %v7747_v11, %v2224_v10  ;;  %v10219_v47 = vld [vmem:[#allocation78_spill] sm:$0xff]  ;;  %v10220_v57 = vld [vmem:[#allocation83_spill] sm:$0xff]  ;;  %v5019_v58 = vpack.c.bf16 %v2350_v61, %v2302_v0 }
 0x483   :  { %5012 = vmatprep.subr.bf16.mxu1 %v5011_v5  ;;  %v2186_v48 = vsel %vm126_vm0, %v7729_v35, %v2176_v17  ;;  %v2251_v62 = vmul.f32 %v2234_v23, %v10212_v45  ;;  %v10224_v0 = vld [vmem:[#allocation82_spill] sm:$0xff] }
 0x484   :  { %4960 = vmatprep.subr.bf16.mxu0 %v4959_v30  ;;  %5014 = vmatpush1.bf16.msra.mxu1 %v5013_v36  ;;  %v2203_v11 = vmul.f32 %v2186_v48, %v10213_v4  ;;  %v10223_v48 = vld [vmem:[#allocation81_spill] sm:$0xff] }
 0x485   :  { %4962 = vmatpush1.bf16.msra.mxu0 %v4961_v13  ;;  %v2320_v25 = vpop.permute.xlu0 %2319  ;;  %5016 = vmatprep.subr.bf16.mxu1 %v5015_v50  ;;  %v10222_v50 = vld [vmem:[#allocation77_spill] sm:$0xff] }
 0x486   :  { %v2272_v54 = vpop.permute.xlu1 %2271  ;;  %v2330_v35 = vsel %vm417_vm3, %v7763_v1, %v2320_v25  ;;  %v4965_v2 = vpack.c.bf16 %v2251_v62, %v2203_v11  ;;  %v10226_v11 = vld [vmem:[#allocation117_spill] sm:$0xff] }
 0x487   :  { %v2282_v33 = vsel %vm320_vm2, %v7755_v31, %v2272_v54  ;;  %v2375_v31 = vsel %vm514_vm4, %v7848_v55, %v7866_v8  ;;  %v2347_v43 = vmul.f32 %v2330_v35, %v10219_v47  ;;  %v10227_v35 = vld [vmem:[#allocation84_spill] sm:$0xff] }
 0x488   :  { %v2299_v29 = vmul.f32 %v2282_v33, %v10220_v57 }
 0x489   :  { %v2178_v56 = vpop.permute.xlu0 %2177 }
 0x48a   :  { %v2184_v32 = vsel %vm126_vm0, %v2178_v56, %v7834_v24  ;;  %v2185_v26 = vsel %vm126_vm0, %v2176_v17, %v2178_v56  ;;  %v2226_v6 = vpop.permute.xlu1 %2225  ;;  %v10216_v24 = vld [vmem:[#allocation86_spill] sm:$0xff]  ;;  %v10221_v17 = vld [vmem:[#allocation76_spill] sm:$0xff]  ;;  %v4969_v4 = vpack.c.bf16 %v2347_v43, %v2299_v29  ;;  %v10237_v29 = vld [vmem:[#allocation91_spill] sm:$0xff] }
 0x48b   :  { %v2204_v34 = vmul.f32 %v2185_v26, %v10214_v42  ;;  %v2205_v59 = vmul.f32 %v2184_v32, %v10215_v63  ;;  %v2232_v1 = vsel %vm223_vm1, %v2226_v6, %v7840_v27  ;;  %v2233_v52 = vsel %vm223_vm1, %v2224_v10, %v2226_v6  ;;  %v10228_v32 = vld [vmem:[#allocation85_spill] sm:$0xff]  ;;  %v10236_v43 = vld [vmem:[#allocation90_spill] sm:$0xff] }
 0x48c   :  { %v2398_v9 = vmul.f32 %v2386_v20, %v10216_v24  ;;  %v2252_v18 = vmul.f32 %v2233_v52, %v10217_v3  ;;  %v2253_v14 = vmul.f32 %v2232_v1, %v10218_v41  ;;  %v10232_v1 = vld [vmem:[#allocation120_spill] sm:$0xff]  ;;  %v10233_v24 = vld [vmem:[#allocation115_spill] sm:$0xff]  ;;  %v10234_v3 = vld [vmem:[#allocation89_spill] sm:$0xff] }
 0x48d   :  { %v2274_v27 = vpop.permute.xlu0 %2273  ;;  %v10235_v41 = vld [vmem:[#allocation88_spill] sm:$0xff] }
 0x48e   :  { %v5017_v5 = vpack.c.bf16 %v2253_v14, %v2205_v59  ;;  %v2280_v10 = vsel %vm320_vm2, %v2274_v27, %v7838_v51  ;;  %v2281_v8 = vsel %vm320_vm2, %v2272_v54, %v2274_v27  ;;  %v2322_v36 = vpop.permute.xlu1 %2321  ;;  %v4963_v13 = vpack.c.bf16 %v2252_v18, %v2204_v34  ;;  %v10225_v54 = vld [vmem:[#allocation87_spill] sm:$0xff]  ;;  %v10230_v34 = vld [vmem:[#allocation2_spill] sm:$0xff] }
 0x48f   :  { %v2300_v30 = vmul.f32 %v2281_v8, %v10221_v17  ;;  %v2301_v16 = vmul.f32 %v2280_v10, %v10222_v50  ;;  %v2328_v39 = vsel %vm417_vm3, %v2322_v36, %v7844_v44  ;;  %v2329_v23 = vsel %vm417_vm3, %v2320_v25, %v2322_v36 }
 0x490   :  { %v2348_v7 = vmul.f32 %v2329_v23, %v10223_v48  ;;  %v2349_v51 = vmul.f32 %v2328_v39, %v10224_v0  ;;  %4964 = vmatprep.subr.bf16.mxu0 %v4963_v13  ;;  %5018 = vmatpush1.bf16.msra.mxu1 %v5017_v5  ;;  %v2397_v21 = vmul.f32 %v2375_v31, %v10225_v54  ;;  %v10240_v23 = vld [vmem:[#allocation92_spill] sm:$0xff] }
 0x491   :  { %4966 = vmatpush1.bf16.msra.mxu0 %v4965_v2  ;;  %5020 = vmatprep.subr.bf16.mxu1 %v5019_v58  ;;  %v2468_v20 = vpop.permute.xlu0 %2467  ;;  %v5023_v56 = vpack.c.bf16 %v2398_v9, %v10226_v11  ;;  %v2710_v63 = vsub.s32 %v2707_v28, %v10230_v34  ;;  %v2423_v58 = vsel %vm611_vm5, %v10232_v1, %v7897_v22 }
 0x492   :  { %v5021_v61 = vpack.c.bf16 %v2349_v51, %v2301_v16  ;;  %v2370_v45 = vpop.permute.xlu1 %2369  ;;  %v4967_v62 = vpack.c.bf16 %v2348_v7, %v2300_v30  ;;  %v5025_v6 = vpack.c.bf16 %v2397_v21, %v10229_v60  ;;  %v10239_v16 = vld [vmem:[#allocation93_spill] sm:$0xff]  ;;  %v10241_v7 = vld [vmem:[#allocation95_spill] sm:$0xff]  ;;  %v2701_v60 = vld [vmem:[%s9583_s1] sm:$0xff] }
 0x493   :  { %v2376_v44 = vsel %vm514_vm4, %v2370_v45, %v7848_v55  ;;  %v2377_v25 = vsel %vm514_vm4, %v8032_v12, %v2370_v45  ;;  %v10231_v55 = vld [vmem:[#allocation100_spill] sm:$0xff]  ;;  %v2445_v39 = vmul.f32 %v2423_v58, %v10239_v16 }
 0x494   :  { %v2395_v33 = vmul.f32 %v2377_v25, %v10227_v35  ;;  %v2396_v26 = vmul.f32 %v2376_v44, %v10228_v32  ;;  %4968 = vmatprep.subr.bf16.mxu0 %v4967_v62  ;;  %5022 = vmatpush1.bf16.msra.mxu1 %v5021_v61  ;;  %v10243_v45 = vld [vmem:[#allocation96_spill] sm:$0xff]  ;;  %v10244_v25 = vld [vmem:[#allocation31_spill] sm:$0xff] }
 0x495   :  { %4970 = vmatpush1.bf16.msra.mxu0 %v4969_v4  ;;  %5024 = vmatprep.subr.bf16.mxu1 %v5023_v56  ;;  %v2418_v42 = vpop.permute.xlu0 %2417  ;;  %v10245_v56 = vld [vmem:[#allocation97_spill] sm:$0xff] }
 0x496   :  { %v4973_v59 = vpack.c.bf16 %v2395_v33, %v10231_v55  ;;  %v2424_v12 = vsel %vm611_vm5, %v2418_v42, %v10232_v1  ;;  %v2425_v52 = vsel %vm611_vm5, %v8049_v38, %v2418_v42  ;;  %v2466_v31 = vpop.permute.xlu1 %2465  ;;  %v4971_v9 = vpack.c.bf16 %v2396_v26, %v10233_v24  ;;  %v2702_v38 = vld [vmem:[%s10238_s0] sm:$0xff] }
 0x497   :  { %v2443_v18 = vmul.f32 %v2425_v52, %v10234_v3  ;;  %v2444_v14 = vmul.f32 %v2424_v12, %v10235_v41  ;;  %v2472_v2 = vsel %vm708_vm6, %v2466_v31, %v2468_v20  ;;  %v2473_v47 = vsel %vm708_vm6, %v8078_v53, %v2466_v31  ;;  %v10246_v33 = vld [vmem:[#allocation98_spill] sm:$0xff] }
 0x498   :  { %v2491_v57 = vmul.f32 %v2473_v47, %v10236_v43  ;;  %v2492_v27 = vmul.f32 %v2472_v2, %v10237_v29  ;;  %4972 = vmatprep.subr.bf16.mxu0 %v4971_v9  ;;  %5026 = vmatpush1.bf16.msra.mxu1 %v5025_v6  ;;  %v2434_v53 = vsel %vm611_vm5, %v7897_v22, %v7771_v46  ;;  %v10242_v46 = vld [vmem:[#allocation94_spill] sm:$0xff]  ;;  %v10247_v6 = vmov 0.0  }
 0x499   :  { %4974 = vmatpush1.bf16.msra.mxu0 %v4973_v59  ;;  %v2514_v5 = vpop.permute.xlu0 %2513  ;;  %v2711_v30 = vrot.slane %v2702_v38, %v2710_v63  ;;  %v2704_v50 = vcombine.high %v2702_v38, %v2702_v38  ;;  %v2446_v48 = vmul.f32 %v2434_v53, %v10240_v23  ;;  %v3038_v43 = vld [vmem:[%s9584_s12] sm:$0xff] }
 0x49a   :  { %v4977_v10 = vpack.c.bf16 %v2491_v57, %v2443_v18  ;;  %v2470_v8 = vpop.permute.xlu1 %2469  ;;  %v4975_v36 = vpack.c.bf16 %v2492_v27, %v2444_v14  ;;  %v2521_v54 = vsel %vm805_vm7, %v8106_v49, %v2514_v5  ;;  %v3037_v57 = vld [vmem:[%s9585_s11 + $0x8] sm:$0xff] }
 0x49b   :  { %v2471_v13 = vsel %vm708_vm6, %v2468_v20, %v2470_v8  ;;  %v2482_v17 = vsel %vm708_vm6, %v2470_v8, %v7827_v37  ;;  %v2718_v4 = vrot.slane %v2704_v50, %v2710_v63  ;;  %v2719_v49 = vcombine.high %v2711_v30, %v2711_v30 }
 0x49c   :  { %v2493_v22 = vmul.f32 %v2471_v13, %v10241_v7  ;;  %v2494_v0 = vmul.f32 %v2482_v17, %v10242_v46  ;;  %4976 = vmatprep.subr.bf16.mxu0 %v4975_v36  ;;  %v2539_v35 = vmul.f32 %v2521_v54, %v10245_v56  ;;  %v10248_v36 = vld [vmem:[#allocation3_spill] sm:$0xff]  ;;  %v10249_v17 = vld [vmem:[#allocation4_spill] sm:$0xff] }
 0x49d   :  { %4978 = vmatpush1.bf16.msra.mxu0 %v4977_v10  ;;  %v2518_v51 = vpop.permute.xlu0 %2517  ;;  %v2720_v26 = vcombine.high %v2718_v4, %v2718_v4  ;;  %v10250_v46 = vld [vmem:[#allocation8_spill] sm:$0xff] }
 0x49e   :  { %v5029_v21 = vpack.c.bf16 %v2493_v22, %v2445_v39  ;;  %v2530_v37 = vsel %vm805_vm7, %v2518_v51, %v10161_v19  ;;  %v2516_v20 = vpop.permute.xlu1 %2515  ;;  %v5027_v28 = vpack.c.bf16 %v2494_v0, %v2446_v48  ;;  %v2543_v19 = vld [vmem:[%s10138_s10] sm:$0xff] }
 0x49f   :  { %v2520_v61 = vsel %vm805_vm7, %v2514_v5, %v2516_v20  ;;  %v2542_v62 = vmul.f32 %v2530_v37, %v10243_v45  ;;  %v2519_v44 = vsel %vm805_vm7, %v2516_v20, %v2518_v51  ;;  %v10251_v37 = vld [vmem:[#allocation5_spill] sm:$0xff]  ;;  %v10253_v45 = vld [vmem:[#allocation6_spill] sm:$0xff] }
 0x4a0   :  { %5028 = vmatprep.subr.bf16.mxu1 %v5027_v28  ;;  %v2540_v11 = vmul.f32 %v2520_v61, %v10244_v25  ;;  %v2541_v32 = vmul.f32 %v2519_v44, %v10246_v33  ;;  %v10252_v28 = vld [vmem:[#allocation10_spill] sm:$0xff] }
 0x4a1   :  { %5030 = vmatpush1.bf16.msra.mxu1 %v5029_v21 }
 0x4a2   :  { %2607 = vmatprep.subr.mxu0 %v2540_v11  ;;  %2678 = vmatprep.subr.mxu1 %v2542_v62 }
 0x4a3   :  { %2608 = vmatpush1.msra.mxu0 %v2539_v35 }
 0x4a4   :  { %2620 = vmatmul.mubr.f32.vlgmr.msra.gmra.mrb[12].mxu0 %v2543_v19  ;;  %4641 = vmatprep.subr.msk.mxu0 %vm2725_vm10, %v2719_v49 }
 0x4a5   :  { %2679 = vmatpush1.msra.mxu1 %v2541_v32  ;;  %4642 = vmatpush1.msk.msra.mxu0 %vm2725_vm10, %v2711_v30 }
 0x4a6   :  { %2691 = vmatmul.mubr.f32.vlgmr.msra.gmra.mrb[12].mxu1 %v2543_v19  ;;  %2798 = vmatprep.mubr.f32.mxu0 %v10247_v6 }
 0x4a7   :  { %4644 = vmatprep.subr.msk.mxu1 %vm2725_vm10, %v2720_v26  ;;  %2869 = vmatprep.mubr.f32.mxu1 %v10247_v6 }
 0x4a8   :  { %4643 = vmatmul.mubr.msk.f32.vlgmr.msra.gmra.mrb[14].mxu0 %vm2721_vm11, %v2701_v60  ;;  %4645 = vmatpush1.msk.msra.mxu1 %vm2725_vm10, %v2718_v4  ;;  %v10254_v4 = vld [vmem:[#allocation7_spill] sm:$0xff] }
 0x4a9   :  { %4647 = vmatprep.mubr.msk.f32.mxu0 %vm3044_vm12, %v3037_v57 }
 0x4aa   :  { %4646 = vmatmul.mubr.msk.f32.vlgmr.msra.gmra.mrb[14].mxu1 %vm2721_vm11, %v2701_v60 }
 0x4ab   :  { %4648 = vmatprep.mubr.msk.f32.mxu1 %vm3044_vm12, %v3037_v57 }
 0x4af   :  { %v2549_v42 = vpop.permute.xlu1 %2548 }
 0x577   :  { %v2621_v34 = vpop.f32.mrb[12].mxu0 }
 0x578   :  { %v2622_v63 = vadd.f32 %v2621_v34, %v2549_v42  ;;  %v2623_v55 = vpop.f32.mrb[13].mxu0  ;;  %v10255_v34 = vld [vmem:[#allocation11_spill] sm:$0xff] }
 0x579   :  { %v2624_v59 = vadd.f32 %v2623_v55, %v2549_v42  ;;  %v2692_v1 = vpop.f32.mrb[12].mxu1  ;;  %v10256_v55 = vld [vmem:[#allocation12_spill] sm:$0xff] }
 0x57a   :  { %v8270_v12 = vmax.f32 %v2622_v63, 0.0  ;;  %v2693_v52 = vadd.f32 %v2692_v1, %v2549_v42  ;;  %v2694_v31 = vpop.f32.mrb[13].mxu1 }
 0x57b   :  { %v8272_v24 = vmax.f32 %v2624_v59, 0.0  ;;  %v2695_v9 = vadd.f32 %v2694_v31, %v2549_v42  ;;  %v8322_v41 = vpop.f32.mrb[14].mxu0 }
 0x57c   :  { %2876 = vrot.lane.b32.xlu0 %v8270_v12, %s5383_s6  ;;  %v8278_v3 = vmax.f32 %v2693_v52, 0.0  ;;  %v8326_v14 = vpop.f32.mrb[15].mxu0 }
 0x57d   :  { %2878 = vrot.lane.b32.xlu1 %v8272_v24, %s5383_s6  ;;  %v8280_v18 = vmax.f32 %v2695_v9, 0.0  ;;  %v8330_v2 = vpop.f32.mrb[14].mxu1 }
 0x57e   :  { %v8334_v47 = vpop.f32.mrb[15].mxu1 }
 0x580   :  { %2880 = vrot.lane.b32.xlu0 %v8278_v3, %s5383_s6 }
 0x581   :  { %2882 = vrot.lane.b32.xlu1 %v8280_v18, %s5383_s6 }
 0x584   :  { %2892 = vrot.lane.b32.xlu0 %v8270_v12, %s5384_s2 }
 0x585   :  { %2894 = vrot.lane.b32.xlu1 %v8272_v24, %s5384_s2 }
 0x588   :  { %2896 = vrot.lane.b32.xlu0 %v8278_v3, %s5384_s2 }
 0x589   :  { %2898 = vrot.lane.b32.xlu1 %v8280_v18, %s5384_s2 }
 0x58c   :  { %2908 = vrot.lane.b32.xlu0 %v8270_v12, %s5385_s8 }
 0x58d   :  { %2910 = vrot.lane.b32.xlu1 %v8272_v24, %s5385_s8 }
 0x590   :  { %2912 = vrot.lane.b32.xlu0 %v8278_v3, %s5385_s8 }
 0x591   :  { %2914 = vrot.lane.b32.xlu1 %v8280_v18, %s5385_s8 }
 0x594   :  { %2924 = vrot.lane.b32.xlu0 %v8270_v12, %s5386_s4 }
 0x595   :  { %2926 = vrot.lane.b32.xlu1 %v8272_v24, %s5386_s4 }
 0x598   :  { %2928 = vrot.lane.b32.xlu0 %v8278_v3, %s5386_s4 }
 0x599   :  { %2930 = vrot.lane.b32.xlu1 %v8280_v18, %s5386_s4 }
 0x59c   :  { %2940 = vrot.lane.b32.xlu0 %v8270_v12, %s9982_s5 }
 0x59d   :  { %2942 = vrot.lane.b32.xlu1 %v8272_v24, %s9982_s5 }
 0x5a0   :  { %2944 = vrot.lane.b32.xlu0 %v8278_v3, %s9982_s5 }
 0x5a1   :  { %2946 = vrot.lane.b32.xlu1 %v8280_v18, %s9982_s5 }
 0x5a4   :  { %2956 = vrot.lane.b32.xlu0 %v8270_v12, %s5388_s9 }
 0x5a5   :  { %2958 = vrot.lane.b32.xlu1 %v8272_v24, %s5388_s9 }
 0x5a8   :  { %2960 = vrot.lane.b32.xlu0 %v8278_v3, %s5388_s9 }
 0x5a9   :  { %2962 = vrot.lane.b32.xlu1 %v8280_v18, %s5388_s9 }
 0x5ac   :  { %2972 = vrot.lane.b32.xlu0 %v8270_v12, %s9983_s26 }
 0x5ad   :  { %2974 = vrot.lane.b32.xlu1 %v8272_v24, %s9983_s26 }
 0x5b0   :  { %2976 = vrot.lane.b32.xlu0 %v8278_v3, %s9983_s26 }
 0x5b1   :  { %2978 = vrot.lane.b32.xlu1 %v8280_v18, %s9983_s26 }
 0x5b4   :  { %2988 = vrot.lane.b32.xlu0 %v8270_v12, %s9981_s27 }
 0x5b5   :  { %2990 = vrot.lane.b32.xlu1 %v8272_v24, %s9981_s27 }
 0x5b8   :  { %2992 = vrot.lane.b32.xlu0 %v8278_v3, %s9981_s27 }
 0x5b9   :  { %2994 = vrot.lane.b32.xlu1 %v8280_v18, %s9981_s27 }
 0x5bc   :  { %3041 = vperm.xlu0 %5379, %v3038_v43  }
 0x5ee   :  { %v2877_v29 = vpop.permute.xlu0 %2876 }
 0x5ef   :  { %v2879_v27 = vpop.permute.xlu1 %2878 }
 0x5f0   :  { %v2886_v53 = vsel %vm126_vm0, %v2877_v29, %v2879_v27 }
 0x5f1   :  { %v2889_v13 = vmul.f32 %v2886_v53, %v10248_v36 }
 0x5f2   :  { %v2881_v38 = vpop.permute.xlu0 %2880 }
 0x5f3   :  { %v2883_v58 = vpop.permute.xlu1 %2882  ;;  %v2885_v23 = vsel %vm126_vm0, %v2879_v27, %v2881_v38  ;;  %v10257_v27 = vld [vmem:[#allocation15_spill] sm:$0xff] }
 0x5f4   :  { %v2884_v50 = vsel %vm126_vm0, %v2881_v38, %v2883_v58  ;;  %v2887_v16 = vsel %vm126_vm0, %v2883_v58, %v2877_v29  ;;  %v2890_v44 = vmul.f32 %v2885_v23, %v10254_v4  ;;  %v10262_v23 = vld [vmem:[#allocation13_spill] sm:$0xff] }
 0x5f5   :  { %v2888_v21 = vmul.f32 %v2887_v16, %v10039_v40  ;;  %v2891_v20 = vmul.f32 %v2884_v50, %v10251_v37  ;;  %v10261_v16 = vld [vmem:[#allocation16_spill] sm:$0xff] }
 0x5f6   :  { %v2893_v5 = vpop.permute.xlu0 %2892 }
 0x5f7   :  { %v2895_v10 = vpop.permute.xlu1 %2894 }
 0x5f8   :  { %v2902_v8 = vsel %vm223_vm1, %v2893_v5, %v2895_v10 }
 0x5f9   :  { %v2905_v30 = vmul.f32 %v2902_v8, %v10249_v17  ;;  %v10259_v8 = vld [vmem:[#allocation14_spill] sm:$0xff] }
 0x5fa   :  { %v2897_v39 = vpop.permute.xlu0 %2896 }
 0x5fb   :  { %v2901_v48 = vsel %vm223_vm1, %v2895_v10, %v2897_v39  ;;  %v2899_v7 = vpop.permute.xlu1 %2898  ;;  %v8370_v22 = vpack.c.bf16 %v2905_v30, %v2889_v13  ;;  %v10260_v30 = vld [vmem:[#allocation17_spill] sm:$0xff] }
 0x5fc   :  { %v2906_v0 = vmul.f32 %v2901_v48, %v10250_v46  ;;  %v2900_v51 = vsel %vm223_vm1, %v2897_v39, %v2899_v7  ;;  %v2903_v54 = vsel %vm223_vm1, %v2899_v7, %v2893_v5  ;;  %v10258_v5 = vld [vmem:[#allocation18_spill] sm:$0xff] }
 0x5fd   :  { %v2904_v61 = vmul.f32 %v2903_v54, %v10252_v28  ;;  %v2907_v62 = vmul.f32 %v2900_v51, %v10253_v45  ;;  %5032 = vmatprep.subr.bf16.mxu0 %v8370_v22 }
 0x5fe   :  { %v2909_v25 = vpop.permute.xlu0 %2908  ;;  %v8387_v35 = vpack.c.bf16 %v2906_v0, %v2890_v44 }
 0x5ff   :  { %v8383_v11 = vpack.c.bf16 %v2904_v61, %v2888_v21  ;;  %v2911_v49 = vpop.permute.xlu1 %2910  ;;  %v8385_v56 = vpack.c.bf16 %v2907_v62, %v2891_v20  ;;  %v10263_v62 = vld [vmem:[#allocation22_spill] sm:$0xff] }
 0x600   :  { %v2918_v32 = vsel %vm320_vm2, %v2909_v25, %v2911_v49 }
 0x601   :  { %5034 = vmatpush1.bf16.msra.mxu0 %v8383_v11  ;;  %5068 = vmatprep.subr.bf16.mxu1 %v8385_v56  ;;  %v2921_v63 = vmul.f32 %v2918_v32, %v10255_v34 }
 0x602   :  { %5070 = vmatpush1.bf16.msra.mxu1 %v8387_v35  ;;  %v2913_v19 = vpop.permute.xlu0 %2912 }
 0x603   :  { %v2915_v33 = vpop.permute.xlu1 %2914  ;;  %v2917_v9 = vsel %vm320_vm2, %v2911_v49, %v2913_v19 }
 0x604   :  { %v2916_v1 = vsel %vm320_vm2, %v2913_v19, %v2915_v33  ;;  %v2919_v52 = vsel %vm320_vm2, %v2915_v33, %v2909_v25  ;;  %v2922_v48 = vmul.f32 %v2917_v9, %v10262_v23  ;;  %v10264_v19 = vld [vmem:[#allocation19_spill] sm:$0xff] }
 0x605   :  { %v2920_v10 = vmul.f32 %v2919_v52, %v10258_v5  ;;  %v2923_v13 = vmul.f32 %v2916_v1, %v10259_v8 }
 0x606   :  { %v2925_v26 = vpop.permute.xlu0 %2924 }
 0x607   :  { %v2927_v60 = vpop.permute.xlu1 %2926 }
 0x608   :  { %v2934_v42 = vsel %vm417_vm3, %v2925_v26, %v2927_v60 }
 0x609   :  { %v2937_v59 = vmul.f32 %v2934_v42, %v10256_v55 }
 0x60a   :  { %v2929_v31 = vpop.permute.xlu0 %2928 }
 0x60b   :  { %v2933_v43 = vsel %vm417_vm3, %v2927_v60, %v2929_v31  ;;  %v2931_v57 = vpop.permute.xlu1 %2930  ;;  %v8406_v29 = vpack.c.bf16 %v2937_v59, %v2921_v63  ;;  %v10265_v60 = vld [vmem:[#allocation20_spill] sm:$0xff]  ;;  %v10266_v63 = vld [vmem:[#allocation21_spill] sm:$0xff] }
 0x60c   :  { %v2938_v38 = vmul.f32 %v2933_v43, %v10257_v27  ;;  %v2932_v58 = vsel %vm417_vm3, %v2929_v31, %v2931_v57  ;;  %v2935_v53 = vsel %vm417_vm3, %v2931_v57, %v2925_v26 }
 0x60d   :  { %v2936_v50 = vmul.f32 %v2935_v53, %v10260_v30  ;;  %v2939_v39 = vmul.f32 %v2932_v58, %v10261_v16  ;;  %5036 = vmatprep.subr.bf16.mxu0 %v8406_v29 }
 0x60e   :  { %v2941_v7 = vpop.permute.xlu0 %2940  ;;  %v8423_v21 = vpack.c.bf16 %v2938_v38, %v2922_v48 }
 0x60f   :  { %v8419_v0 = vpack.c.bf16 %v2936_v50, %v2920_v10  ;;  %v2943_v51 = vpop.permute.xlu1 %2942  ;;  %v8421_v54 = vpack.c.bf16 %v2939_v39, %v2923_v13  ;;  %v10268_v39 = vld [vmem:[#allocation29_spill] sm:$0xff] }
 0x610   :  { %v2950_v20 = vsel %vm514_vm4, %v2941_v7, %v2943_v51 }
 0x611   :  { %5038 = vmatpush1.bf16.msra.mxu0 %v8419_v0  ;;  %5072 = vmatprep.subr.bf16.mxu1 %v8421_v54  ;;  %v2952_v44 = vmul.f32 %v2950_v20, %v10263_v62 }
 0x612   :  { %5074 = vmatpush1.bf16.msra.mxu1 %v8423_v21  ;;  %v2945_v61 = vpop.permute.xlu0 %2944 }
 0x613   :  { %v2949_v25 = vsel %vm514_vm4, %v2943_v51, %v2945_v61  ;;  %v2947_v49 = vpop.permute.xlu1 %2946  ;;  %v8444_v31 = vpack.c.bf16 %v2952_v44, %v8270_v12  ;;  %v10270_v44 = vld [vmem:[#allocation23_spill] sm:$0xff] }
 0x614   :  { %v2953_v33 = vmul.f32 %v2949_v25, %v10264_v19  ;;  %v2948_v32 = vsel %vm514_vm4, %v2945_v61, %v2947_v49  ;;  %v2951_v26 = vsel %vm514_vm4, %v2947_v49, %v2941_v7  ;;  %v10269_v7 = vld [vmem:[#allocation30_spill] sm:$0xff]  ;;  %v10271_v49 = vld [vmem:[#allocation24_spill] sm:$0xff] }
 0x615   :  { %v2954_v42 = vmul.f32 %v2948_v32, %v10265_v60  ;;  %v2955_v59 = vmul.f32 %v2951_v26, %v10266_v63 }
 0x616   :  { %v2957_v1 = vpop.permute.xlu0 %2956  ;;  %v8441_v52 = vpack.c.bf16 %v2953_v33, %v8272_v24 }
 0x617   :  { %v8447_v9 = vpack.c.bf16 %v2954_v42, %v8278_v3  ;;  %v2959_v43 = vpop.permute.xlu1 %2958  ;;  %v8450_v57 = vpack.c.bf16 %v2955_v59, %v8280_v18  ;;  %v10272_v42 = vld [vmem:[#allocation28_spill] sm:$0xff] }
 0x618   :  { %5040 = vmatprep.subr.bf16.mxu0 %v8441_v52  ;;  %v2966_v3 = vsel %vm611_vm5, %v2957_v1, %v2959_v43 }
 0x619   :  { %10267 = vst [vmem:[#allocation121_spill] sm:$0xff] %v8447_v9  ;;  %5042 = vmatpush1.bf16.msra.mxu0 %v8444_v31  ;;  %5076 = vmatprep.subr.bf16.mxu1 %v8450_v57  ;;  %v2968_v48 = vmul.f32 %v2966_v3, %v10268_v39  ;;  %v10275_v3 = vld [vmem:[#allocation27_spill] sm:$0xff] }
 0x61a   :  { %5078 = vmatpush1.bf16.msra.mxu1 %v8447_v9  ;;  %v2961_v24 = vpop.permute.xlu0 %2960 }
 0x61b   :  { %v2963_v38 = vpop.permute.xlu1 %2962  ;;  %v2965_v18 = vsel %vm611_vm5, %v2959_v43, %v2961_v24 }
 0x61c   :  { %v2964_v10 = vsel %vm611_vm5, %v2961_v24, %v2963_v38  ;;  %v2967_v13 = vsel %vm611_vm5, %v2963_v38, %v2957_v1  ;;  %v2969_v25 = vmul.f32 %v2965_v18, %v10270_v44  ;;  %v10273_v1 = vld [vmem:[#allocation25_spill] sm:$0xff]  ;;  %v10274_v24 = vld [vmem:[#allocation26_spill] sm:$0xff] }
 0x61d   :  { %v2970_v59 = vmul.f32 %v2964_v10, %v10272_v42  ;;  %v2971_v43 = vmul.f32 %v2967_v13, %v10273_v1  ;;  %v3004_v10 = vmul.f32 %v8322_v41, %v10039_v40 }
 0x61e   :  { %v2973_v58 = vpop.permute.xlu0 %2972 }
 0x61f   :  { %v2975_v12 = vpop.permute.xlu1 %2974 }
 0x620   :  { %v2982_v53 = vsel %vm708_vm6, %v2973_v58, %v2975_v12 }
 0x621   :  { %v2984_v51 = vmul.f32 %v2982_v53, %v10269_v7 }
 0x622   :  { %v2977_v50 = vpop.permute.xlu0 %2976 }
 0x623   :  { %v2981_v20 = vsel %vm708_vm6, %v2975_v12, %v2977_v50  ;;  %v2979_v61 = vpop.permute.xlu1 %2978  ;;  %v8482_v18 = vpack.c.bf16 %v2984_v51, %v2968_v48  ;;  %v3006_v48 = vmul.f32 %v8330_v2, %v10254_v4  ;;  %v3005_v51 = vmul.f32 %v8326_v14, %v10248_v36  ;;  %v10281_v36 = vld [vmem:[#allocation43_spill] sm:$0xff] }
 0x624   :  { %v2985_v33 = vmul.f32 %v2981_v20, %v10271_v49  ;;  %v2980_v32 = vsel %vm708_vm6, %v2977_v50, %v2979_v61  ;;  %v2983_v26 = vsel %vm708_vm6, %v2979_v61, %v2973_v58  ;;  %v3007_v61 = vmul.f32 %v8334_v47, %v10251_v37 }
 0x625   :  { %v2986_v38 = vmul.f32 %v2980_v32, %v10274_v24  ;;  %v2987_v53 = vmul.f32 %v2983_v26, %v10275_v3  ;;  %10276 = vst [vmem:[#allocation105_spill] sm:$0xff] %v8482_v18 }
 0x626   :  { %v2989_v12 = vpop.permute.xlu0 %2988  ;;  %v8480_v6 = vpack.c.bf16 %v2985_v33, %v2969_v25  ;;  %v3009_v25 = vmul.f32 %v8326_v14, %v10249_v17  ;;  %v10278_v33 = vld [vmem:[#allocation41_spill] sm:$0xff]  ;;  %v10280_v17 = vld [vmem:[#allocation42_spill] sm:$0xff] }
 0x627   :  { %v8484_v20 = vpack.c.bf16 %v2986_v38, %v2970_v59  ;;  %v2991_v9 = vpop.permute.xlu1 %2990  ;;  %v8486_v50 = vpack.c.bf16 %v2987_v53, %v2971_v43  ;;  %v3011_v43 = vmul.f32 %v8334_v47, %v10253_v45  ;;  %v3015_v38 = vmul.f32 %v8334_v47, %v10259_v8  ;;  %v10279_v53 = vld [vmem:[#allocation32_spill] sm:$0xff] }
 0x628   :  { %v2998_v58 = vsel %vm805_vm7, %v2989_v12, %v2991_v9  ;;  %5044 = vmatprep.subr.bf16.mxu0 %v8480_v6  ;;  %v3008_v8 = vmul.f32 %v8322_v41, %v10252_v28 }
 0x629   :  { %10277 = vst [vmem:[#allocation101_spill] sm:$0xff] %v8484_v20  ;;  %5046 = vmatpush1.bf16.msra.mxu0 %v8482_v18  ;;  %5080 = vmatprep.subr.bf16.mxu1 %v8486_v50  ;;  %v3000_v32 = vmul.f32 %v2998_v58, %v10278_v33  ;;  %v3013_v58 = vmul.f32 %v8326_v14, %v10255_v34 }
 0x62a   :  { %5082 = vmatpush1.bf16.msra.mxu1 %v8484_v20  ;;  %v2993_v13 = vpop.permute.xlu0 %2992 }
 0x62b   :  { %v2997_v26 = vsel %vm805_vm7, %v2991_v9, %v2993_v13  ;;  %v2995_v59 = vpop.permute.xlu1 %2994  ;;  %v8526_v45 = vpack.c.bf16 %v3004_v10, %v3000_v32  ;;  %v3014_v10 = vmul.f32 %v8330_v2, %v10262_v23  ;;  %v3018_v32 = vmul.f32 %v8330_v2, %v10257_v27 }
 0x62c   :  { %v3001_v4 = vmul.f32 %v2997_v26, %v10279_v53  ;;  %v2996_v37 = vsel %vm805_vm7, %v2993_v13, %v2995_v59  ;;  %v2999_v40 = vsel %vm805_vm7, %v2995_v59, %v2989_v12  ;;  %v3012_v26 = vmul.f32 %v8322_v41, %v10258_v5 }
 0x62d   :  { %v3002_v9 = vmul.f32 %v2996_v37, %v10280_v17  ;;  %v3003_v20 = vmul.f32 %v2999_v40, %v10281_v36  ;;  %v8532_v59 = vpack.c.bf16 %v3015_v38, %v3011_v43  ;;  %v8535_v37 = vpack.c.bf16 %v3013_v58, %v3009_v25 }
 0x62e   :  { %v8520_v18 = vpack.c.bf16 %v3005_v51, %v3001_v4  ;;  %v3017_v40 = vmul.f32 %v8326_v14, %v10256_v55  ;;  %v3010_v4 = vmul.f32 %v8330_v2, %v10250_v46  ;;  %v8552_v51 = vpack.c.bf16 %v3012_v26, %v3008_v8 }
 0x62f   :  { %v8528_v13 = vpack.c.bf16 %v3006_v48, %v3002_v9  ;;  %v8530_v12 = vpack.c.bf16 %v3007_v61, %v3003_v20  ;;  %v3019_v20 = vmul.f32 %v8334_v47, %v10261_v16  ;;  %v3016_v48 = vmul.f32 %v8322_v41, %v10260_v30 }
 0x630   :  { %5048 = vmatprep.subr.bf16.mxu0 %v8520_v18  ;;  %v3021_v61 = vmul.f32 %v8326_v14, %v10264_v19  ;;  %v3025_v25 = vmul.f32 %v8326_v14, %v10270_v44  ;;  %v8561_v43 = vpack.c.bf16 %v8326_v14, %v3017_v40  ;;  %v8563_v38 = vpack.c.bf16 %v3014_v10, %v3010_v4 }
 0x631   :  { %5050 = vmatpush1.bf16.msra.mxu0 %v8526_v45  ;;  %5084 = vmatprep.subr.bf16.mxu1 %v8530_v12  ;;  %v8567_v58 = vpack.c.bf16 %v8334_v47, %v3019_v20  ;;  %v3023_v8 = vmul.f32 %v8334_v47, %v10266_v63  ;;  %v3027_v9 = vmul.f32 %v8334_v47, %v10273_v1 }
 0x632   :  { %5052 = vmatprep.subr.bf16.mxu0 %v8535_v37  ;;  %5086 = vmatpush1.bf16.msra.mxu1 %v8528_v13  ;;  %v5057_v26 = vpack.c.bf16 %v8322_v41, %v3016_v48  ;;  %v5059_v40 = vpack.c.bf16 %v3025_v25, %v3021_v61  ;;  %v5093_v4 = vpack.c.bf16 %v8330_v2, %v3018_v32 }
 0x633   :  { %5088 = vmatprep.subr.bf16.mxu1 %v8532_v59  ;;  %v3020_v10 = vmul.f32 %v8322_v41, %v10263_v62  ;;  %v3024_v20 = vmul.f32 %v8322_v41, %v10268_v39  ;;  %v3029_v1 = vmul.f32 %v8326_v14, %v10271_v49  ;;  %v3033_v44 = vmul.f32 %v8326_v14, %v10279_v53 }
 0x634   :  { %v3022_v48 = vmul.f32 %v8330_v2, %v10265_v60  ;;  %v3026_v61 = vmul.f32 %v8330_v2, %v10272_v42  ;;  %v5095_v25 = vpack.c.bf16 %v3027_v9, %v3023_v8  ;;  %v3031_v32 = vmul.f32 %v8334_v47, %v10275_v3 }
 0x635   :  { %5054 = vmatpush1.bf16.msra.mxu0 %v8552_v51  ;;  %v3035_v39 = vmul.f32 %v8334_v47, %v10281_v36  ;;  %v5061_v49 = vpack.c.bf16 %v3024_v20, %v3020_v10  ;;  %v3028_v14 = vmul.f32 %v8322_v41, %v10269_v7  ;;  %v3032_v53 = vmul.f32 %v8322_v41, %v10278_v33  ;;  %v3036_v41 = vld [vmem:[%s9585_s11] sm:$0xff] }
 0x636   :  { %5056 = vmatprep.subr.bf16.mxu0 %v8561_v43  ;;  %5090 = vmatpush1.bf16.msra.mxu1 %v8563_v38  ;;  %v5063_v63 = vpack.c.bf16 %v3033_v44, %v3029_v1  ;;  %v5097_v42 = vpack.c.bf16 %v3026_v61, %v3022_v48  ;;  %v3030_v8 = vmul.f32 %v8330_v2, %v10274_v24 }
 0x637   :  { %5092 = vmatprep.subr.bf16.mxu1 %v8567_v58  ;;  %v3034_v9 = vmul.f32 %v8330_v2, %v10280_v17  ;;  %v5099_v47 = vpack.c.bf16 %v3035_v39, %v3031_v32  ;;  %v5065_v10 = vpack.c.bf16 %v3032_v53, %v3028_v14  ;;  %v10282_v2 = vld [vmem:[#allocation121_spill] sm:$0xff]  ;;  %v10285_v53 = vld [vmem:[#allocation3_spill] sm:$0xff] }
 0x638   :  { %v10288_v14 = vld [vmem:[#allocation5_spill] sm:$0xff] }
 0x639   :  { %5058 = vmatpush1.bf16.msra.mxu0 %v5057_v26  ;;  %v5101_v20 = vpack.c.bf16 %v3034_v9, %v3030_v8 }
 0x63a   :  { %5060 = vmatprep.subr.bf16.mxu0 %v5059_v40  ;;  %5094 = vmatpush1.bf16.msra.mxu1 %v5093_v4 }
 0x63b   :  { %5096 = vmatprep.subr.bf16.mxu1 %v5095_v25 }
 0x63d   :  { %5062 = vmatpush1.bf16.msra.mxu0 %v5061_v49 }
 0x63e   :  { %5064 = vmatprep.subr.bf16.mxu0 %v5063_v63  ;;  %5098 = vmatpush1.bf16.msra.mxu1 %v5097_v42 }
 0x63f   :  { %5100 = vmatprep.subr.bf16.mxu1 %v5099_v47 }
 0x641   :  { %5066 = vmatpush1.bf16.msra.mxu0 %v5065_v10 }
 0x642   :  { %5102 = vmatpush1.bf16.msra.mxu1 %v5101_v20  ;;  %5104 = vmatprep.subr.bf16.mxu0 %v8370_v22  ;;  %v10283_v22 = vld [vmem:[#allocation105_spill] sm:$0xff] }
 0x643   :  { %5156 = vmatprep.subr.bf16.mxu1 %v8385_v56 }
 0x644   :  { %3113 = vmatmul.mubr.f32.vlgmr.msra.gmra.mrb[16].mxu0 %v3036_v41 }
 0x645   :  { %3184 = vmatmul.mubr.f32.vlgmr.msra.gmra.mrb[16].mxu1 %v3036_v41  ;;  %5106 = vmatpush1.bf16.msra.mxu0 %v8383_v11  ;;  %v10284_v11 = vld [vmem:[#allocation101_spill] sm:$0xff] }
 0x646   :  { %5108 = vmatprep.subr.bf16.mxu0 %v8406_v29  ;;  %5158 = vmatpush1.bf16.msra.mxu1 %v8387_v35 }
 0x647   :  { %5160 = vmatprep.subr.bf16.mxu1 %v8421_v54 }
 0x649   :  { %5110 = vmatpush1.bf16.msra.mxu0 %v8419_v0 }
 0x64a   :  { %5112 = vmatprep.subr.bf16.mxu0 %v8441_v52  ;;  %5162 = vmatpush1.bf16.msra.mxu1 %v8423_v21  ;;  %v3319_v52 = vld [vmem:[%s9586_s13 + $0x8] sm:$0xff] }
 0x64b   :  { %5164 = vmatprep.subr.bf16.mxu1 %v8450_v57  ;;  %4649 = vmatprep.mubr.msk.f32.mxu0 %vm2551_vm9, %v3319_v52 }
 0x64c   :  { %4650 = vmatprep.mubr.msk.f32.mxu1 %vm2551_vm9, %v3319_v52 }
 0x64d   :  { %5114 = vmatpush1.bf16.msra.mxu0 %v8444_v31  ;;  %v3320_v31 = vld [vmem:[%s9587_s14] sm:$0xff] }
 0x64e   :  { %5116 = vmatprep.subr.bf16.mxu0 %v8480_v6  ;;  %5166 = vmatpush1.bf16.msra.mxu1 %v10282_v2  ;;  %v3042_v6 = vpop.permute.xlu0 %3041 }
 0x64f   :  { %5168 = vmatprep.subr.bf16.mxu1 %v8486_v50 }
 0x651   :  { %5118 = vmatpush1.bf16.msra.mxu0 %v10283_v22 }
 0x652   :  { %5120 = vmatprep.subr.bf16.mxu0 %v8520_v18  ;;  %5170 = vmatpush1.bf16.msra.mxu1 %v10284_v11 }
 0x653   :  { %5172 = vmatprep.subr.bf16.mxu1 %v8530_v12  ;;  %v10286_v12 = vld [vmem:[#allocation4_spill] sm:$0xff] }
 0x655   :  { %5122 = vmatpush1.bf16.msra.mxu0 %v8526_v45 }
 0x656   :  { %5124 = vmatprep.subr.bf16.mxu0 %v8535_v37  ;;  %5174 = vmatpush1.bf16.msra.mxu1 %v8528_v13 }
 0x657   :  { %5176 = vmatprep.subr.bf16.mxu1 %v8532_v59 }
 0x659   :  { %5126 = vmatpush1.bf16.msra.mxu0 %v8552_v51 }
 0x65a   :  { %5128 = vmatprep.subr.bf16.mxu0 %v8561_v43  ;;  %5178 = vmatpush1.bf16.msra.mxu1 %v8563_v38 }
 0x65b   :  { %5180 = vmatprep.subr.bf16.mxu1 %v8567_v58 }
 0x65d   :  { %5130 = vmatpush1.bf16.msra.mxu0 %v5057_v26 }
 0x65e   :  { %5132 = vmatprep.subr.bf16.mxu0 %v5059_v40  ;;  %5182 = vmatpush1.bf16.msra.mxu1 %v5093_v4 }
 0x65f   :  { %5184 = vmatprep.subr.bf16.mxu1 %v5095_v25  ;;  %v10287_v25 = vld [vmem:[#allocation9_spill] sm:$0xff] }
 0x661   :  { %5134 = vmatpush1.bf16.msra.mxu0 %v5061_v49 }
 0x662   :  { %5136 = vmatprep.subr.bf16.mxu0 %v5063_v63  ;;  %5186 = vmatpush1.bf16.msra.mxu1 %v5097_v42 }
 0x663   :  { %5188 = vmatprep.subr.bf16.mxu1 %v5099_v47  ;;  %v10289_v47 = vld [vmem:[#allocation6_spill] sm:$0xff] }
 0x665   :  { %5138 = vmatpush1.bf16.msra.mxu0 %v5065_v10 }
 0x666   :  { %5190 = vmatpush1.bf16.msra.mxu1 %v5101_v20  ;;  %v10290_v20 = vld [vmem:[#allocation7_spill] sm:$0xff] }
 0x717   :  { %v3114_v45 = vpop.f32.mrb[16].mxu0 }
 0x718   :  { %v8631_v56 = vadd.f32 %v3114_v45, %v3042_v6  ;;  %v3116_v35 = vpop.f32.mrb[17].mxu0  ;;  %v3185_v29 = vpop.f32.mrb[16].mxu1 }
 0x719   :  { %v8633_v0 = vadd.f32 %v3116_v35, %v3042_v6  ;;  %v3187_v54 = vpop.f32.mrb[17].mxu1  ;;  %v8639_v21 = vadd.f32 %v3185_v29, %v3042_v6 }
 0x71a   :  { %3190 = vrot.lane.b32.xlu1 %v8631_v56, %s5383_s6  ;;  %v8641_v63 = vadd.f32 %v3187_v54, %v3042_v6 }
 0x71b   :  { %3192 = vrot.lane.b32.xlu0 %v8633_v0, %s5383_s6 }
 0x71e   :  { %3194 = vrot.lane.b32.xlu1 %v8639_v21, %s5383_s6 }
 0x71f   :  { %3196 = vrot.lane.b32.xlu0 %v8641_v63, %s5383_s6 }
 0x722   :  { %3206 = vrot.lane.b32.xlu1 %v8631_v56, %s5384_s2 }
 0x723   :  { %3208 = vrot.lane.b32.xlu0 %v8633_v0, %s5384_s2 }
 0x726   :  { %3210 = vrot.lane.b32.xlu1 %v8639_v21, %s5384_s2 }
 0x727   :  { %3212 = vrot.lane.b32.xlu0 %v8641_v63, %s5384_s2 }
 0x72a   :  { %3222 = vrot.lane.b32.xlu1 %v8631_v56, %s5385_s8 }
 0x72b   :  { %3224 = vrot.lane.b32.xlu0 %v8633_v0, %s5385_s8 }
 0x72e   :  { %3226 = vrot.lane.b32.xlu1 %v8639_v21, %s5385_s8 }
 0x72f   :  { %3228 = vrot.lane.b32.xlu0 %v8641_v63, %s5385_s8 }
 0x732   :  { %3238 = vrot.lane.b32.xlu1 %v8631_v56, %s5386_s4 }
 0x733   :  { %3240 = vrot.lane.b32.xlu0 %v8633_v0, %s5386_s4 }
 0x736   :  { %3242 = vrot.lane.b32.xlu1 %v8639_v21, %s5386_s4 }
 0x737   :  { %3244 = vrot.lane.b32.xlu0 %v8641_v63, %s5386_s4 }
 0x73a   :  { %3254 = vrot.lane.b32.xlu1 %v8631_v56, %s9982_s5 }
 0x73b   :  { %3256 = vrot.lane.b32.xlu0 %v8633_v0, %s9982_s5 }
 0x73e   :  { %3258 = vrot.lane.b32.xlu1 %v8639_v21, %s9982_s5 }
 0x73f   :  { %3260 = vrot.lane.b32.xlu0 %v8641_v63, %s9982_s5 }
 0x742   :  { %3270 = vrot.lane.b32.xlu1 %v8631_v56, %s5388_s9 }
 0x743   :  { %3272 = vrot.lane.b32.xlu0 %v8633_v0, %s5388_s9 }
 0x746   :  { %3274 = vrot.lane.b32.xlu1 %v8639_v21, %s5388_s9 }
 0x747   :  { %3276 = vrot.lane.b32.xlu0 %v8641_v63, %s5388_s9 }
 0x74a   :  { %3286 = vrot.lane.b32.xlu1 %v8631_v56, %s9983_s26 }
 0x74b   :  { %3288 = vrot.lane.b32.xlu0 %v8633_v0, %s9983_s26 }
 0x74e   :  { %3290 = vrot.lane.b32.xlu1 %v8639_v21, %s9983_s26 }
 0x74f   :  { %3292 = vrot.lane.b32.xlu0 %v8641_v63, %s9983_s26 }
 0x752   :  { %3302 = vrot.lane.b32.xlu1 %v8631_v56, %s9981_s27 }
 0x753   :  { %3304 = vrot.lane.b32.xlu0 %v8633_v0, %s9981_s27 }
 0x756   :  { %3306 = vrot.lane.b32.xlu1 %v8639_v21, %s9981_s27 }
 0x757   :  { %3308 = vrot.lane.b32.xlu0 %v8641_v63, %s9981_s27 }
 0x75a   :  { %3323 = vperm.xlu1 %5380, %v3320_v31  }
 0x78c   :  { %v3191_v57 = vpop.permute.xlu1 %3190 }
 0x78d   :  { %v3193_v39 = vpop.permute.xlu0 %3192 }
 0x78e   :  { %v3200_v42 = vsel %vm126_vm0, %v3191_v57, %v3193_v39 }
 0x78f   :  { %v3203_v13 = vmul.f32 %v3200_v42, %v10285_v53 }
 0x790   :  { %v3195_v44 = vpop.permute.xlu1 %3194 }
 0x791   :  { %v3197_v49 = vpop.permute.xlu0 %3196  ;;  %v3199_v38 = vsel %vm126_vm0, %v3193_v39, %v3195_v44 }
 0x792   :  { %v3198_v37 = vsel %vm126_vm0, %v3195_v44, %v3197_v49  ;;  %v3201_v51 = vsel %vm126_vm0, %v3197_v49, %v3191_v57  ;;  %v3204_v41 = vmul.f32 %v3199_v38, %v10290_v20 }
 0x793   :  { %v3202_v32 = vmul.f32 %v3201_v51, %v10287_v25  ;;  %v3205_v8 = vmul.f32 %v3198_v37, %v10288_v14 }
 0x794   :  { %v3207_v1 = vpop.permute.xlu1 %3206 }
 0x795   :  { %v3209_v18 = vpop.permute.xlu0 %3208 }
 0x796   :  { %v3216_v50 = vsel %vm223_vm1, %v3207_v1, %v3209_v18 }
 0x797   :  { %v3219_v59 = vmul.f32 %v3216_v50, %v10286_v12 }
 0x798   :  { %v3211_v43 = vpop.permute.xlu1 %3210 }
 0x799   :  { %v3215_v58 = vsel %vm223_vm1, %v3209_v18, %v3211_v43  ;;  %v3213_v26 = vpop.permute.xlu0 %3212  ;;  %v5139_v40 = vpack.c.bf16 %v3219_v59, %v3203_v13 }
 0x79a   :  { %v3220_v4 = vmul.f32 %v3215_v58, %v10250_v46  ;;  %v3214_v48 = vsel %vm223_vm1, %v3211_v43, %v3213_v26  ;;  %v3217_v61 = vsel %vm223_vm1, %v3213_v26, %v3207_v1  ;;  %v10291_v58 = vld [vmem:[#allocation14_spill] sm:$0xff] }
 0x79b   :  { %v3218_v9 = vmul.f32 %v3217_v61, %v10252_v28  ;;  %v3221_v10 = vmul.f32 %v3214_v48, %v10289_v47  ;;  %5140 = vmatprep.subr.bf16.mxu0 %v5139_v40 }
 0x79c   :  { %v3223_v2 = vpop.permute.xlu1 %3222  ;;  %v5193_v45 = vpack.c.bf16 %v3220_v4, %v3204_v41 }
 0x79d   :  { %v5141_v22 = vpack.c.bf16 %v3218_v9, %v3202_v32  ;;  %v3225_v11 = vpop.permute.xlu0 %3224  ;;  %v5191_v6 = vpack.c.bf16 %v3221_v10, %v3205_v8 }
 0x79e   :  { %v3232_v54 = vsel %vm320_vm2, %v3223_v2, %v3225_v11 }
 0x79f   :  { %5142 = vmatpush1.bf16.msra.mxu0 %v5141_v22  ;;  %5192 = vmatprep.subr.bf16.mxu1 %v5191_v6  ;;  %v3235_v39 = vmul.f32 %v3232_v54, %v10255_v34 }
 0x7a0   :  { %5194 = vmatpush1.bf16.msra.mxu1 %v5193_v45  ;;  %v3227_v35 = vpop.permute.xlu1 %3226 }
 0x7a1   :  { %v3229_v29 = vpop.permute.xlu0 %3228  ;;  %v3231_v18 = vsel %vm320_vm2, %v3225_v11, %v3227_v35 }
 0x7a2   :  { %v3230_v49 = vsel %vm320_vm2, %v3227_v35, %v3229_v29  ;;  %v3233_v42 = vsel %vm320_vm2, %v3229_v29, %v3223_v2  ;;  %v3236_v48 = vmul.f32 %v3231_v18, %v10262_v23 }
 0x7a3   :  { %v3234_v38 = vmul.f32 %v3233_v42, %v10258_v5  ;;  %v3237_v26 = vmul.f32 %v3230_v49, %v10291_v58 }
 0x7a4   :  { %v3239_v52 = vpop.permute.xlu1 %3238 }
 0x7a5   :  { %v3241_v31 = vpop.permute.xlu0 %3240 }
 0x7a6   :  { %v3248_v57 = vsel %vm417_vm3, %v3239_v52, %v3241_v31 }
 0x7a7   :  { %v3251_v44 = vmul.f32 %v3248_v57, %v10256_v55 }
 0x7a8   :  { %v3243_v1 = vpop.permute.xlu1 %3242 }
 0x7a9   :  { %v3247_v50 = vsel %vm417_vm3, %v3241_v31, %v3243_v1  ;;  %v3245_v13 = vpop.permute.xlu0 %3244  ;;  %v5143_v59 = vpack.c.bf16 %v3251_v44, %v3235_v39 }
 0x7aa   :  { %v3252_v37 = vmul.f32 %v3247_v50, %v10257_v27  ;;  %v3246_v51 = vsel %vm417_vm3, %v3243_v1, %v3245_v13  ;;  %v3249_v43 = vsel %vm417_vm3, %v3245_v13, %v3239_v52  ;;  %v10292_v52 = vld [vmem:[#allocation21_spill] sm:$0xff] }
 0x7ab   :  { %v3250_v40 = vmul.f32 %v3249_v43, %v10260_v30  ;;  %v3253_v4 = vmul.f32 %v3246_v51, %v10261_v16  ;;  %5144 = vmatprep.subr.bf16.mxu0 %v5143_v59  ;;  %v10293_v43 = vld [vmem:[#allocation29_spill] sm:$0xff] }
 0x7ac   :  { %v3255_v61 = vpop.permute.xlu1 %3254  ;;  %v5197_v10 = vpack.c.bf16 %v3252_v37, %v3236_v48  ;;  %v10294_v48 = vld [vmem:[#allocation23_spill] sm:$0xff] }
 0x7ad   :  { %v5145_v32 = vpack.c.bf16 %v3250_v40, %v3234_v38  ;;  %v3257_v8 = vpop.permute.xlu0 %3256  ;;  %v5195_v9 = vpack.c.bf16 %v3253_v4, %v3237_v26 }
 0x7ae   :  { %v3264_v41 = vsel %vm514_vm4, %v3255_v61, %v3257_v8 }
 0x7af   :  { %5146 = vmatpush1.bf16.msra.mxu0 %v5145_v32  ;;  %5196 = vmatprep.subr.bf16.mxu1 %v5195_v9  ;;  %v3266_v22 = vmul.f32 %v3264_v41, %v10263_v62  ;;  %v10295_v32 = vld [vmem:[#allocation24_spill] sm:$0xff] }
 0x7b0   :  { %5198 = vmatpush1.bf16.msra.mxu1 %v5197_v10  ;;  %v3259_v2 = vpop.permute.xlu1 %3258  ;;  %v10296_v41 = vld [vmem:[#allocation28_spill] sm:$0xff] }
 0x7b1   :  { %v3263_v11 = vsel %vm514_vm4, %v3257_v8, %v3259_v2  ;;  %v3261_v6 = vpop.permute.xlu0 %3260  ;;  %v5149_v44 = vpack.c.bf16 %v3266_v22, %v8631_v56  ;;  %v10297_v22 = vld [vmem:[#allocation25_spill] sm:$0xff] }
 0x7b2   :  { %v3267_v45 = vmul.f32 %v3263_v11, %v10264_v19  ;;  %v3262_v35 = vsel %vm514_vm4, %v3259_v2, %v3261_v6  ;;  %v3265_v29 = vsel %vm514_vm4, %v3261_v6, %v3255_v61 }
 0x7b3   :  { %v3268_v54 = vmul.f32 %v3262_v35, %v10265_v60  ;;  %v3269_v31 = vmul.f32 %v3265_v29, %v10292_v52 }
 0x7b4   :  { %v3271_v57 = vpop.permute.xlu1 %3270  ;;  %v5147_v39 = vpack.c.bf16 %v3267_v45, %v8633_v0 }
 0x7b5   :  { %v5201_v49 = vpack.c.bf16 %v3268_v54, %v8639_v21  ;;  %v3273_v42 = vpop.permute.xlu0 %3272  ;;  %v5199_v1 = vpack.c.bf16 %v3269_v31, %v8641_v63 }
 0x7b6   :  { %5148 = vmatprep.subr.bf16.mxu0 %v5147_v39  ;;  %v3280_v37 = vsel %vm611_vm5, %v3271_v57, %v3273_v42 }
 0x7b7   :  { %5150 = vmatpush1.bf16.msra.mxu0 %v5149_v44  ;;  %5200 = vmatprep.subr.bf16.mxu1 %v5199_v1  ;;  %v3282_v38 = vmul.f32 %v3280_v37, %v10293_v43 }
 0x7b8   :  { %5202 = vmatpush1.bf16.msra.mxu1 %v5201_v49  ;;  %v3275_v18 = vpop.permute.xlu1 %3274 }
 0x7b9   :  { %v3277_v50 = vpop.permute.xlu0 %3276  ;;  %v3279_v56 = vsel %vm611_vm5, %v3273_v42, %v3275_v18 }
 0x7ba   :  { %v3278_v21 = vsel %vm611_vm5, %v3275_v18, %v3277_v50  ;;  %v3281_v63 = vsel %vm611_vm5, %v3277_v50, %v3271_v57  ;;  %v3283_v61 = vmul.f32 %v3279_v56, %v10294_v48 }
 0x7bb   :  { %v3284_v2 = vmul.f32 %v3278_v21, %v10296_v41  ;;  %v3285_v11 = vmul.f32 %v3281_v63, %v10297_v22  ;;  %v3318_v21 = vld [vmem:[%s9586_s13] sm:$0xff]  ;;  %v10299_v63 = vmov 0.0  }
 0x7bc   :  { %v3287_v13 = vpop.permute.xlu1 %3286 }
 0x7bd   :  { %v3289_v59 = vpop.permute.xlu0 %3288 }
 0x7be   :  { %v3296_v0 = vsel %vm708_vm6, %v3287_v13, %v3289_v59 }
 0x7bf   :  { %v3298_v26 = vmul.f32 %v3296_v0, %v10269_v7 }
 0x7c0   :  { %v3291_v51 = vpop.permute.xlu1 %3290 }
 0x7c1   :  { %v3295_v40 = vsel %vm708_vm6, %v3289_v59, %v3291_v51  ;;  %v3293_v4 = vpop.permute.xlu0 %3292  ;;  %v5153_v54 = vpack.c.bf16 %v3298_v26, %v3282_v38 }
 0x7c2   :  { %v3299_v8 = vmul.f32 %v3295_v40, %v10295_v32  ;;  %v3294_v9 = vsel %vm708_vm6, %v3291_v51, %v3293_v4  ;;  %v3297_v10 = vsel %vm708_vm6, %v3293_v4, %v3287_v13  ;;  %v10298_v13 = vld [vmem:[#allocation32_spill] sm:$0xff] }
 0x7c3   :  { %v3300_v6 = vmul.f32 %v3294_v9, %v10274_v24  ;;  %v3301_v45 = vmul.f32 %v3297_v10, %v10275_v3 }
 0x7c4   :  { %v3303_v35 = vpop.permute.xlu1 %3302  ;;  %v5151_v29 = vpack.c.bf16 %v3299_v8, %v3283_v61 }
 0x7c5   :  { %v5205_v31 = vpack.c.bf16 %v3300_v6, %v3284_v2  ;;  %v3305_v57 = vpop.permute.xlu0 %3304  ;;  %v5203_v39 = vpack.c.bf16 %v3301_v45, %v3285_v11 }
 0x7c6   :  { %5152 = vmatprep.subr.bf16.mxu0 %v5151_v29  ;;  %v3312_v44 = vsel %vm805_vm7, %v3303_v35, %v3305_v57 }
 0x7c7   :  { %5154 = vmatpush1.bf16.msra.mxu0 %v5153_v54  ;;  %5204 = vmatprep.subr.bf16.mxu1 %v5203_v39  ;;  %v3314_v37 = vmul.f32 %v3312_v44, %v10278_v33 }
 0x7c8   :  { %5206 = vmatpush1.bf16.msra.mxu1 %v5205_v31  ;;  %v3307_v49 = vpop.permute.xlu1 %3306 }
 0x7c9   :  { %v3311_v42 = vsel %vm805_vm7, %v3305_v57, %v3307_v49  ;;  %v3309_v1 = vpop.permute.xlu0 %3308 }
 0x7ca   :  { %v3310_v18 = vsel %vm805_vm7, %v3307_v49, %v3309_v1  ;;  %v3313_v50 = vsel %vm805_vm7, %v3309_v1, %v3303_v35  ;;  %v3315_v59 = vmul.f32 %v3311_v42, %v10298_v13  ;;  %v3604_v35 = vld [vmem:[%s9588_s16] sm:$0xff] }
 0x7cb   :  { %v3316_v0 = vmul.f32 %v3310_v18, %v10280_v17  ;;  %v3317_v56 = vmul.f32 %v3313_v50, %v10281_v36 }
 0x7cc   :  { %3381 = vmatprep.subr.mxu0 %v3315_v59 }
 0x7cd   :  { %3382 = vmatpush1.msra.mxu0 %v3314_v37  ;;  %3452 = vmatprep.subr.mxu1 %v3317_v56 }
 0x7ce   :  { %3394 = vmatmul.mubr.f32.vlgmr.msra.gmra.mrb[18].mxu0 %v3318_v21  ;;  %3453 = vmatpush1.msra.mxu1 %v3316_v0 }
 0x7cf   :  { %3465 = vmatmul.mubr.f32.vlgmr.msra.gmra.mrb[18].mxu1 %v3318_v21  ;;  %3677 = vmatprep.mubr.f32.mxu0 %v10299_v63 }
 0x7d0   :  { %3748 = vmatprep.mubr.f32.mxu1 %v10299_v63 }
 0x7d9   :  { %v3324_v51 = vpop.permute.xlu1 %3323 }
 0x8a1   :  { %v3395_v38 = vpop.f32.mrb[18].mxu0 }
 0x8a2   :  { %v3396_v26 = vadd.f32 %v3395_v38, %v3324_v51  ;;  %v3397_v40 = vpop.f32.mrb[19].mxu0  ;;  %v3466_v4 = vpop.f32.mrb[18].mxu1 }
 0x8a3   :  { %v3398_v61 = vadd.f32 %v3397_v40, %v3324_v51  ;;  %v3468_v8 = vpop.f32.mrb[19].mxu1  ;;  %v3467_v10 = vadd.f32 %v3466_v4, %v3324_v51 }
 0x8a4   :  { %v8816_v9 = vmax.f32 %v3396_v26, 0.0  ;;  %v3469_v11 = vadd.f32 %v3468_v8, %v3324_v51 }
 0x8a5   :  { %v8818_v2 = vmax.f32 %v3398_v61, 0.0  ;;  %v8824_v6 = vmax.f32 %v3467_v10, 0.0 }
 0x8a6   :  { %3475 = vrot.lane.b32.xlu0 %v8816_v9, %s5383_s6  ;;  %v8826_v45 = vmax.f32 %v3469_v11, 0.0 }
 0x8a7   :  { %3477 = vrot.lane.b32.xlu1 %v8818_v2, %s5383_s6 }
 0x8aa   :  { %3479 = vrot.lane.b32.xlu0 %v8824_v6, %s5383_s6 }
 0x8ab   :  { %3481 = vrot.lane.b32.xlu1 %v8826_v45, %s5383_s6 }
 0x8ae   :  { %3491 = vrot.lane.b32.xlu0 %v8816_v9, %s5384_s2 }
 0x8af   :  { %3493 = vrot.lane.b32.xlu1 %v8818_v2, %s5384_s2 }
 0x8b2   :  { %3495 = vrot.lane.b32.xlu0 %v8824_v6, %s5384_s2 }
 0x8b3   :  { %3497 = vrot.lane.b32.xlu1 %v8826_v45, %s5384_s2 }
 0x8b6   :  { %3507 = vrot.lane.b32.xlu0 %v8816_v9, %s5385_s8 }
 0x8b7   :  { %3509 = vrot.lane.b32.xlu1 %v8818_v2, %s5385_s8 }
 0x8ba   :  { %3511 = vrot.lane.b32.xlu0 %v8824_v6, %s5385_s8 }
 0x8bb   :  { %3513 = vrot.lane.b32.xlu1 %v8826_v45, %s5385_s8 }
 0x8be   :  { %3523 = vrot.lane.b32.xlu0 %v8816_v9, %s5386_s4 }
 0x8bf   :  { %3525 = vrot.lane.b32.xlu1 %v8818_v2, %s5386_s4 }
 0x8c2   :  { %3527 = vrot.lane.b32.xlu0 %v8824_v6, %s5386_s4 }
 0x8c3   :  { %3529 = vrot.lane.b32.xlu1 %v8826_v45, %s5386_s4 }
 0x8c6   :  { %3539 = vrot.lane.b32.xlu0 %v8816_v9, %s9982_s5 }
 0x8c7   :  { %3541 = vrot.lane.b32.xlu1 %v8818_v2, %s9982_s5 }
 0x8ca   :  { %3543 = vrot.lane.b32.xlu0 %v8824_v6, %s9982_s5 }
 0x8cb   :  { %3545 = vrot.lane.b32.xlu1 %v8826_v45, %s9982_s5 }
 0x8ce   :  { %3555 = vrot.lane.b32.xlu0 %v8816_v9, %s5388_s9 }
 0x8cf   :  { %3557 = vrot.lane.b32.xlu1 %v8818_v2, %s5388_s9 }
 0x8d2   :  { %3559 = vrot.lane.b32.xlu0 %v8824_v6, %s5388_s9 }
 0x8d3   :  { %3561 = vrot.lane.b32.xlu1 %v8826_v45, %s5388_s9 }
 0x8d6   :  { %3571 = vrot.lane.b32.xlu0 %v8816_v9, %s9983_s26 }
 0x8d7   :  { %3573 = vrot.lane.b32.xlu1 %v8818_v2, %s9983_s26 }
 0x8da   :  { %3575 = vrot.lane.b32.xlu0 %v8824_v6, %s9983_s26 }
 0x8db   :  { %3577 = vrot.lane.b32.xlu1 %v8826_v45, %s9983_s26 }
 0x8de   :  { %3587 = vrot.lane.b32.xlu0 %v8816_v9, %s9981_s27 }
 0x8df   :  { %3589 = vrot.lane.b32.xlu1 %v8818_v2, %s9981_s27 }
 0x8e2   :  { %3591 = vrot.lane.b32.xlu0 %v8824_v6, %s9981_s27 }
 0x8e3   :  { %3593 = vrot.lane.b32.xlu1 %v8826_v45, %s9981_s27 }
 0x8e6   :  { %3607 = vperm.xlu0 %5379, %v3604_v35  }
 0x918   :  { %v3476_v29 = vpop.permute.xlu0 %3475 }
 0x919   :  { %v3478_v54 = vpop.permute.xlu1 %3477 }
 0x91a   :  { %v3485_v39 = vsel %vm126_vm0, %v3476_v29, %v3478_v54 }
 0x91b   :  { %v3488_v1 = vmul.f32 %v3485_v39, %v10285_v53 }
 0x91c   :  { %v3480_v31 = vpop.permute.xlu0 %3479 }
 0x91d   :  { %v3482_v57 = vpop.permute.xlu1 %3481  ;;  %v3484_v0 = vsel %vm126_vm0, %v3478_v54, %v3480_v31 }
 0x91e   :  { %v3483_v50 = vsel %vm126_vm0, %v3480_v31, %v3482_v57  ;;  %v3486_v59 = vsel %vm126_vm0, %v3482_v57, %v3476_v29  ;;  %v3489_v11 = vmul.f32 %v3484_v0, %v10290_v20 }
 0x91f   :  { %v3487_v4 = vmul.f32 %v3486_v59, %v10287_v25  ;;  %v3490_v61 = vmul.f32 %v3483_v50, %v10288_v14 }
 0x920   :  { %v3492_v44 = vpop.permute.xlu0 %3491 }
 0x921   :  { %v3494_v49 = vpop.permute.xlu1 %3493 }
 0x922   :  { %v3501_v42 = vsel %vm223_vm1, %v3492_v44, %v3494_v49 }
 0x923   :  { %v3504_v18 = vmul.f32 %v3501_v42, %v10286_v12 }
 0x924   :  { %v3496_v37 = vpop.permute.xlu0 %3495 }
 0x925   :  { %v3500_v56 = vsel %vm223_vm1, %v3494_v49, %v3496_v37  ;;  %v3498_v21 = vpop.permute.xlu1 %3497  ;;  %v5207_v51 = vpack.c.bf16 %v3504_v18, %v3488_v1 }
 0x926   :  { %v3505_v38 = vmul.f32 %v3500_v56, %v10250_v46  ;;  %v3499_v26 = vsel %vm223_vm1, %v3496_v37, %v3498_v21  ;;  %v3502_v40 = vsel %vm223_vm1, %v3498_v21, %v3492_v44 }
 0x927   :  { %v3503_v8 = vmul.f32 %v3502_v40, %v10252_v28  ;;  %v3506_v10 = vmul.f32 %v3499_v26, %v10289_v47  ;;  %5208 = vmatprep.subr.bf16.mxu0 %v5207_v51 }
 0x928   :  { %v3508_v35 = vpop.permute.xlu0 %3507  ;;  %v5225_v57 = vpack.c.bf16 %v3505_v38, %v3489_v11 }
 0x929   :  { %v5209_v29 = vpack.c.bf16 %v3503_v8, %v3487_v4  ;;  %v3510_v54 = vpop.permute.xlu1 %3509  ;;  %v5223_v31 = vpack.c.bf16 %v3506_v10, %v3490_v61 }
 0x92a   :  { %v3517_v49 = vsel %vm320_vm2, %v3508_v35, %v3510_v54 }
 0x92b   :  { %5210 = vmatpush1.bf16.msra.mxu0 %v5209_v29  ;;  %5224 = vmatprep.subr.bf16.mxu1 %v5223_v31  ;;  %v3520_v50 = vmul.f32 %v3517_v49, %v10255_v34 }
 0x92c   :  { %5226 = vmatpush1.bf16.msra.mxu1 %v5225_v57  ;;  %v3512_v39 = vpop.permute.xlu0 %3511 }
 0x92d   :  { %v3514_v44 = vpop.permute.xlu1 %3513  ;;  %v3516_v21 = vsel %vm320_vm2, %v3510_v54, %v3512_v39 }
 0x92e   :  { %v3515_v37 = vsel %vm320_vm2, %v3512_v39, %v3514_v44  ;;  %v3518_v0 = vsel %vm320_vm2, %v3514_v44, %v3508_v35  ;;  %v3521_v29 = vmul.f32 %v3516_v21, %v10262_v23 }
 0x92f   :  { %v3519_v8 = vmul.f32 %v3518_v0, %v10258_v5  ;;  %v3522_v10 = vmul.f32 %v3515_v37, %v10291_v58 }
 0x930   :  { %v3524_v42 = vpop.permute.xlu0 %3523 }
 0x931   :  { %v3526_v1 = vpop.permute.xlu1 %3525 }
 0x932   :  { %v3533_v18 = vsel %vm417_vm3, %v3524_v42, %v3526_v1 }
 0x933   :  { %v3536_v59 = vmul.f32 %v3533_v18, %v10256_v55 }
 0x934   :  { %v3528_v56 = vpop.permute.xlu0 %3527 }
 0x935   :  { %v3532_v51 = vsel %vm417_vm3, %v3526_v1, %v3528_v56  ;;  %v3530_v38 = vpop.permute.xlu1 %3529  ;;  %v5211_v26 = vpack.c.bf16 %v3536_v59, %v3520_v50 }
 0x936   :  { %v3537_v40 = vmul.f32 %v3532_v51, %v10257_v27  ;;  %v3531_v4 = vsel %vm417_vm3, %v3528_v56, %v3530_v38  ;;  %v3534_v61 = vsel %vm417_vm3, %v3530_v38, %v3524_v42 }
 0x937   :  { %v3535_v11 = vmul.f32 %v3534_v61, %v10260_v30  ;;  %v3538_v35 = vmul.f32 %v3531_v4, %v10261_v16  ;;  %5212 = vmatprep.subr.bf16.mxu0 %v5211_v26 }
 0x938   :  { %v3540_v54 = vpop.permute.xlu0 %3539  ;;  %v5229_v44 = vpack.c.bf16 %v3537_v40, %v3521_v29 }
 0x939   :  { %v5213_v31 = vpack.c.bf16 %v3535_v11, %v3519_v8  ;;  %v3542_v57 = vpop.permute.xlu1 %3541  ;;  %v5227_v39 = vpack.c.bf16 %v3538_v35, %v3522_v10 }
 0x93a   :  { %v3549_v49 = vsel %vm514_vm4, %v3540_v54, %v3542_v57 }
 0x93b   :  { %5214 = vmatpush1.bf16.msra.mxu0 %v5213_v31  ;;  %5228 = vmatprep.subr.bf16.mxu1 %v5227_v39  ;;  %v3551_v1 = vmul.f32 %v3549_v49, %v10263_v62 }
 0x93c   :  { %5230 = vmatpush1.bf16.msra.mxu1 %v5229_v44  ;;  %v3544_v42 = vpop.permute.xlu0 %3543 }
 0x93d   :  { %v3548_v18 = vsel %vm514_vm4, %v3542_v57, %v3544_v42  ;;  %v3546_v50 = vpop.permute.xlu1 %3545  ;;  %v5217_v26 = vpack.c.bf16 %v3551_v1, %v8816_v9 }
 0x93e   :  { %v3552_v59 = vmul.f32 %v3548_v18, %v10264_v19  ;;  %v3547_v37 = vsel %vm514_vm4, %v3544_v42, %v3546_v50  ;;  %v3550_v0 = vsel %vm514_vm4, %v3546_v50, %v3540_v54 }
 0x93f   :  { %v3553_v56 = vmul.f32 %v3547_v37, %v10265_v60  ;;  %v3554_v21 = vmul.f32 %v3550_v0, %v10292_v52 }
 0x940   :  { %v3556_v51 = vpop.permute.xlu0 %3555  ;;  %v5215_v38 = vpack.c.bf16 %v3552_v59, %v8818_v2 }
 0x941   :  { %v5233_v40 = vpack.c.bf16 %v3553_v56, %v8824_v6  ;;  %v3558_v4 = vpop.permute.xlu1 %3557  ;;  %v5231_v61 = vpack.c.bf16 %v3554_v21, %v8826_v45 }
 0x942   :  { %5216 = vmatprep.subr.bf16.mxu0 %v5215_v38  ;;  %v3565_v29 = vsel %vm611_vm5, %v3556_v51, %v3558_v4 }
 0x943   :  { %5218 = vmatpush1.bf16.msra.mxu0 %v5217_v26  ;;  %5232 = vmatprep.subr.bf16.mxu1 %v5231_v61  ;;  %v3567_v31 = vmul.f32 %v3565_v29, %v10293_v43 }
 0x944   :  { %5234 = vmatpush1.bf16.msra.mxu1 %v5233_v40  ;;  %v3560_v8 = vpop.permute.xlu0 %3559 }
 0x945   :  { %v3562_v10 = vpop.permute.xlu1 %3561  ;;  %v3564_v9 = vsel %vm611_vm5, %v3558_v4, %v3560_v8 }
 0x946   :  { %v3563_v6 = vsel %vm611_vm5, %v3560_v8, %v3562_v10  ;;  %v3566_v45 = vsel %vm611_vm5, %v3562_v10, %v3556_v51  ;;  %v3568_v49 = vmul.f32 %v3564_v9, %v10294_v48 }
 0x947   :  { %v3569_v50 = vmul.f32 %v3563_v6, %v10296_v41  ;;  %v3570_v59 = vmul.f32 %v3566_v45, %v10297_v22  ;;  %v3603_v45 = vld [vmem:[%s9589_s15] sm:$0xff] }
 0x948   :  { %v3572_v11 = vpop.permute.xlu0 %3571 }
 0x949   :  { %v3574_v35 = vpop.permute.xlu1 %3573 }
 0x94a   :  { %v3581_v2 = vsel %vm708_vm6, %v3572_v11, %v3574_v35 }
 0x94b   :  { %v3583_v57 = vmul.f32 %v3581_v2, %v10269_v7 }
 0x94c   :  { %v3576_v54 = vpop.permute.xlu0 %3575 }
 0x94d   :  { %v3580_v39 = vsel %vm708_vm6, %v3574_v35, %v3576_v54  ;;  %v3578_v44 = vpop.permute.xlu1 %3577  ;;  %v5221_v51 = vpack.c.bf16 %v3583_v57, %v3567_v31 }
 0x94e   :  { %v3584_v42 = vmul.f32 %v3580_v39, %v10295_v32  ;;  %v3579_v1 = vsel %vm708_vm6, %v3576_v54, %v3578_v44  ;;  %v3582_v18 = vsel %vm708_vm6, %v3578_v44, %v3572_v11 }
 0x94f   :  { %v3585_v37 = vmul.f32 %v3579_v1, %v10274_v24  ;;  %v3586_v0 = vmul.f32 %v3582_v18, %v10275_v3 }
 0x950   :  { %v3588_v56 = vpop.permute.xlu0 %3587  ;;  %v5219_v21 = vpack.c.bf16 %v3584_v42, %v3568_v49 }
 0x951   :  { %v5237_v38 = vpack.c.bf16 %v3585_v37, %v3569_v50  ;;  %v3590_v26 = vpop.permute.xlu1 %3589  ;;  %v5235_v40 = vpack.c.bf16 %v3586_v0, %v3570_v59 }
 0x952   :  { %5220 = vmatprep.subr.bf16.mxu0 %v5219_v21  ;;  %v3597_v4 = vsel %vm805_vm7, %v3588_v56, %v3590_v26 }
 0x953   :  { %5222 = vmatpush1.bf16.msra.mxu0 %v5221_v51  ;;  %5236 = vmatprep.subr.bf16.mxu1 %v5235_v40  ;;  %v3599_v2 = vmul.f32 %v3597_v4, %v10278_v33 }
 0x954   :  { %5238 = vmatpush1.bf16.msra.mxu1 %v5237_v38  ;;  %v3592_v61 = vpop.permute.xlu0 %3591 }
 0x955   :  { %v3596_v8 = vsel %vm805_vm7, %v3590_v26, %v3592_v61  ;;  %v3594_v10 = vpop.permute.xlu1 %3593 }
 0x956   :  { %v3600_v11 = vmul.f32 %v3596_v8, %v10298_v13  ;;  %v3595_v35 = vsel %vm805_vm7, %v3592_v61, %v3594_v10  ;;  %v3598_v29 = vsel %vm805_vm7, %v3594_v10, %v3588_v56  ;;  %v3888_v56 = vld [vmem:[%s9590_s18] sm:$0xff] }
 0x957   :  { %v3601_v9 = vmul.f32 %v3595_v35, %v10280_v17  ;;  %v3602_v6 = vmul.f32 %v3598_v29, %v10281_v36 }
 0x958   :  { %3629 = vmatprep.subr.mxu0 %v3600_v11 }
 0x959   :  { %3630 = vmatpush1.msra.mxu0 %v3599_v2  ;;  %3700 = vmatprep.subr.mxu1 %v3602_v6 }
 0x95a   :  { %4651 = vmatmul.mubr.msk.f32.vlgmr.msra.gmra.mrb[20].mxu0 %vm885_vm8, %v3603_v45  ;;  %3701 = vmatpush1.msra.mxu1 %v3601_v9 }
 0x95b   :  { %4652 = vmatmul.mubr.msk.f32.vlgmr.msra.gmra.mrb[20].mxu1 %vm885_vm8, %v3603_v45  ;;  %3961 = vmatprep.mubr.f32.mxu0 %v10299_v63 }
 0x95c   :  { %4032 = vmatprep.mubr.f32.mxu1 %v10299_v63 }
 0x965   :  { %v3608_v54 = vpop.permute.xlu0 %3607 }
 0xa2d   :  { %v3679_v31 = vpop.f32.mrb[20].mxu0 }
 0xa2e   :  { %v3680_v57 = vadd.f32 %v3679_v31, %v3608_v54  ;;  %v3681_v39 = vpop.f32.mrb[21].mxu0  ;;  %v3750_v44 = vpop.f32.mrb[20].mxu1 }
 0xa2f   :  { %v3682_v49 = vadd.f32 %v3681_v39, %v3608_v54  ;;  %v3752_v42 = vpop.f32.mrb[21].mxu1  ;;  %v3751_v18 = vadd.f32 %v3750_v44, %v3608_v54 }
 0xa30   :  { %v8998_v1 = vmax.f32 %v3680_v57, 0.0  ;;  %v3753_v59 = vadd.f32 %v3752_v42, %v3608_v54 }
 0xa31   :  { %v9000_v50 = vmax.f32 %v3682_v49, 0.0  ;;  %v9006_v37 = vmax.f32 %v3751_v18, 0.0 }
 0xa32   :  { %3759 = vrot.lane.b32.xlu1 %v8998_v1, %s5383_s6  ;;  %v9008_v0 = vmax.f32 %v3753_v59, 0.0 }
 0xa33   :  { %3761 = vrot.lane.b32.xlu0 %v9000_v50, %s5383_s6 }
 0xa36   :  { %3763 = vrot.lane.b32.xlu1 %v9006_v37, %s5383_s6 }
 0xa37   :  { %3765 = vrot.lane.b32.xlu0 %v9008_v0, %s5383_s6 }
 0xa3a   :  { %3775 = vrot.lane.b32.xlu1 %v8998_v1, %s5384_s2 }
 0xa3b   :  { %3777 = vrot.lane.b32.xlu0 %v9000_v50, %s5384_s2 }
 0xa3e   :  { %3779 = vrot.lane.b32.xlu1 %v9006_v37, %s5384_s2 }
 0xa3f   :  { %3781 = vrot.lane.b32.xlu0 %v9008_v0, %s5384_s2 }
 0xa42   :  { %3791 = vrot.lane.b32.xlu1 %v8998_v1, %s5385_s8 }
 0xa43   :  { %3793 = vrot.lane.b32.xlu0 %v9000_v50, %s5385_s8 }
 0xa46   :  { %3795 = vrot.lane.b32.xlu1 %v9006_v37, %s5385_s8 }
 0xa47   :  { %3797 = vrot.lane.b32.xlu0 %v9008_v0, %s5385_s8 }
 0xa4a   :  { %3807 = vrot.lane.b32.xlu1 %v8998_v1, %s5386_s4 }
 0xa4b   :  { %3809 = vrot.lane.b32.xlu0 %v9000_v50, %s5386_s4 }
 0xa4e   :  { %3811 = vrot.lane.b32.xlu1 %v9006_v37, %s5386_s4 }
 0xa4f   :  { %3813 = vrot.lane.b32.xlu0 %v9008_v0, %s5386_s4 }
 0xa52   :  { %3823 = vrot.lane.b32.xlu1 %v8998_v1, %s9982_s5 }
 0xa53   :  { %3825 = vrot.lane.b32.xlu0 %v9000_v50, %s9982_s5 }
 0xa56   :  { %3827 = vrot.lane.b32.xlu1 %v9006_v37, %s9982_s5 }
 0xa57   :  { %3829 = vrot.lane.b32.xlu0 %v9008_v0, %s9982_s5 }
 0xa5a   :  { %3839 = vrot.lane.b32.xlu1 %v8998_v1, %s5388_s9 }
 0xa5b   :  { %3841 = vrot.lane.b32.xlu0 %v9000_v50, %s5388_s9 }
 0xa5e   :  { %3843 = vrot.lane.b32.xlu1 %v9006_v37, %s5388_s9 }
 0xa5f   :  { %3845 = vrot.lane.b32.xlu0 %v9008_v0, %s5388_s9 }
 0xa62   :  { %3855 = vrot.lane.b32.xlu1 %v8998_v1, %s9983_s26 }
 0xa63   :  { %3857 = vrot.lane.b32.xlu0 %v9000_v50, %s9983_s26 }
 0xa66   :  { %3859 = vrot.lane.b32.xlu1 %v9006_v37, %s9983_s26 }
 0xa67   :  { %3861 = vrot.lane.b32.xlu0 %v9008_v0, %s9983_s26 }
 0xa6a   :  { %3871 = vrot.lane.b32.xlu1 %v8998_v1, %s9981_s27 }
 0xa6b   :  { %3873 = vrot.lane.b32.xlu0 %v9000_v50, %s9981_s27 }
 0xa6e   :  { %3875 = vrot.lane.b32.xlu1 %v9006_v37, %s9981_s27 }
 0xa6f   :  { %3877 = vrot.lane.b32.xlu0 %v9008_v0, %s9981_s27 }
 0xa72   :  { %3891 = vperm.xlu1 %5380, %v3888_v56  }
 0xaa4   :  { %v3760_v21 = vpop.permute.xlu1 %3759 }
 0xaa5   :  { %v3762_v51 = vpop.permute.xlu0 %3761 }
 0xaa6   :  { %v3769_v40 = vsel %vm126_vm0, %v3760_v21, %v3762_v51 }
 0xaa7   :  { %v3772_v10 = vmul.f32 %v3769_v40, %v10285_v53 }
 0xaa8   :  { %v3764_v38 = vpop.permute.xlu1 %3763 }
 0xaa9   :  { %v3766_v26 = vpop.permute.xlu0 %3765  ;;  %v3768_v9 = vsel %vm126_vm0, %v3762_v51, %v3764_v38 }
 0xaaa   :  { %v3767_v35 = vsel %vm126_vm0, %v3764_v38, %v3766_v26  ;;  %v3770_v29 = vsel %vm126_vm0, %v3766_v26, %v3760_v21  ;;  %v3773_v59 = vmul.f32 %v3768_v9, %v10290_v20 }
 0xaab   :  { %v3771_v44 = vmul.f32 %v3770_v29, %v10287_v25  ;;  %v3774_v49 = vmul.f32 %v3767_v35, %v10288_v14 }
 0xaac   :  { %v3776_v4 = vpop.permute.xlu1 %3775 }
 0xaad   :  { %v3778_v61 = vpop.permute.xlu0 %3777 }
 0xaae   :  { %v3785_v8 = vsel %vm223_vm1, %v3776_v4, %v3778_v61 }
 0xaaf   :  { %v3788_v11 = vmul.f32 %v3785_v8, %v10286_v12 }
 0xab0   :  { %v3780_v2 = vpop.permute.xlu1 %3779 }
 0xab1   :  { %v3784_v6 = vsel %vm223_vm1, %v3778_v61, %v3780_v2  ;;  %v3782_v45 = vpop.permute.xlu0 %3781  ;;  %v5239_v54 = vpack.c.bf16 %v3788_v11, %v3772_v10 }
 0xab2   :  { %v3789_v31 = vmul.f32 %v3784_v6, %v10250_v46  ;;  %v3783_v57 = vsel %vm223_vm1, %v3780_v2, %v3782_v45  ;;  %v3786_v39 = vsel %vm223_vm1, %v3782_v45, %v3776_v4 }
 0xab3   :  { %v3787_v42 = vmul.f32 %v3786_v39, %v10252_v28  ;;  %v3790_v18 = vmul.f32 %v3783_v57, %v10289_v47  ;;  %5240 = vmatprep.subr.bf16.mxu0 %v5239_v54 }
 0xab4   :  { %v3792_v56 = vpop.permute.xlu1 %3791  ;;  %v5257_v26 = vpack.c.bf16 %v3789_v31, %v3773_v59 }
 0xab5   :  { %v5241_v21 = vpack.c.bf16 %v3787_v42, %v3771_v44  ;;  %v3794_v51 = vpop.permute.xlu0 %3793  ;;  %v5255_v38 = vpack.c.bf16 %v3790_v18, %v3774_v49 }
 0xab6   :  { %v3801_v61 = vsel %vm320_vm2, %v3792_v56, %v3794_v51 }
 0xab7   :  { %5242 = vmatpush1.bf16.msra.mxu0 %v5241_v21  ;;  %5256 = vmatprep.subr.bf16.mxu1 %v5255_v38  ;;  %v3804_v35 = vmul.f32 %v3801_v61, %v10255_v34 }
 0xab8   :  { %5258 = vmatpush1.bf16.msra.mxu1 %v5257_v26  ;;  %v3796_v40 = vpop.permute.xlu1 %3795 }
 0xab9   :  { %v3798_v4 = vpop.permute.xlu0 %3797  ;;  %v3800_v45 = vsel %vm320_vm2, %v3794_v51, %v3796_v40 }
 0xaba   :  { %v3799_v2 = vsel %vm320_vm2, %v3796_v40, %v3798_v4  ;;  %v3802_v9 = vsel %vm320_vm2, %v3798_v4, %v3792_v56  ;;  %v3805_v21 = vmul.f32 %v3800_v45, %v10262_v23 }
 0xabb   :  { %v3803_v42 = vmul.f32 %v3802_v9, %v10258_v5  ;;  %v3806_v18 = vmul.f32 %v3799_v2, %v10291_v58 }
 0xabc   :  { %v3808_v8 = vpop.permute.xlu1 %3807 }
 0xabd   :  { %v3810_v10 = vpop.permute.xlu0 %3809 }
 0xabe   :  { %v3817_v11 = vsel %vm417_vm3, %v3808_v8, %v3810_v10 }
 0xabf   :  { %v3820_v29 = vmul.f32 %v3817_v11, %v10256_v55 }
 0xac0   :  { %v3812_v6 = vpop.permute.xlu1 %3811 }
 0xac1   :  { %v3816_v54 = vsel %vm417_vm3, %v3810_v10, %v3812_v6  ;;  %v3814_v31 = vpop.permute.xlu0 %3813  ;;  %v5243_v57 = vpack.c.bf16 %v3820_v29, %v3804_v35 }
 0xac2   :  { %v3821_v39 = vmul.f32 %v3816_v54, %v10257_v27  ;;  %v3815_v44 = vsel %vm417_vm3, %v3812_v6, %v3814_v31  ;;  %v3818_v49 = vsel %vm417_vm3, %v3814_v31, %v3808_v8 }
 0xac3   :  { %v3819_v59 = vmul.f32 %v3818_v49, %v10260_v30  ;;  %v3822_v56 = vmul.f32 %v3815_v44, %v10261_v16  ;;  %5244 = vmatprep.subr.bf16.mxu0 %v5243_v57 }
 0xac4   :  { %v3824_v51 = vpop.permute.xlu1 %3823  ;;  %v5261_v4 = vpack.c.bf16 %v3821_v39, %v3805_v21 }
 0xac5   :  { %v5245_v38 = vpack.c.bf16 %v3819_v59, %v3803_v42  ;;  %v3826_v26 = vpop.permute.xlu0 %3825  ;;  %v5259_v40 = vpack.c.bf16 %v3822_v56, %v3806_v18 }
 0xac6   :  { %v3833_v61 = vsel %vm514_vm4, %v3824_v51, %v3826_v26 }
 0xac7   :  { %5246 = vmatpush1.bf16.msra.mxu0 %v5245_v38  ;;  %5260 = vmatprep.subr.bf16.mxu1 %v5259_v40  ;;  %v3835_v10 = vmul.f32 %v3833_v61, %v10263_v62 }
 0xac8   :  { %5262 = vmatpush1.bf16.msra.mxu1 %v5261_v4  ;;  %v3828_v8 = vpop.permute.xlu1 %3827 }
 0xac9   :  { %v3832_v11 = vsel %vm514_vm4, %v3826_v26, %v3828_v8  ;;  %v3830_v35 = vpop.permute.xlu0 %3829  ;;  %v5249_v57 = vpack.c.bf16 %v3835_v10, %v8998_v1 }
 0xaca   :  { %v3836_v29 = vmul.f32 %v3832_v11, %v10264_v19  ;;  %v3831_v2 = vsel %vm514_vm4, %v3828_v8, %v3830_v35  ;;  %v3834_v9 = vsel %vm514_vm4, %v3830_v35, %v3824_v51 }
 0xacb   :  { %v3837_v6 = vmul.f32 %v3831_v2, %v10265_v60  ;;  %v3838_v45 = vmul.f32 %v3834_v9, %v10292_v52 }
 0xacc   :  { %v3840_v54 = vpop.permute.xlu1 %3839  ;;  %v5247_v31 = vpack.c.bf16 %v3836_v29, %v9000_v50 }
 0xacd   :  { %v5265_v39 = vpack.c.bf16 %v3837_v6, %v9006_v37  ;;  %v3842_v44 = vpop.permute.xlu0 %3841  ;;  %v5263_v49 = vpack.c.bf16 %v3838_v45, %v9008_v0 }
 0xace   :  { %5248 = vmatprep.subr.bf16.mxu0 %v5247_v31  ;;  %v3849_v21 = vsel %vm611_vm5, %v3840_v54, %v3842_v44 }
 0xacf   :  { %5250 = vmatpush1.bf16.msra.mxu0 %v5249_v57  ;;  %5264 = vmatprep.subr.bf16.mxu1 %v5263_v49  ;;  %v3851_v61 = vmul.f32 %v3849_v21, %v10293_v43 }
 0xad0   :  { %5266 = vmatpush1.bf16.msra.mxu1 %v5265_v39  ;;  %v3844_v42 = vpop.permute.xlu1 %3843 }
 0xad1   :  { %v3846_v18 = vpop.permute.xlu0 %3845  ;;  %v3848_v38 = vsel %vm611_vm5, %v3842_v44, %v3844_v42 }
 0xad2   :  { %v3847_v26 = vsel %vm611_vm5, %v3844_v42, %v3846_v18  ;;  %v3850_v40 = vsel %vm611_vm5, %v3846_v18, %v3840_v54  ;;  %v3852_v35 = vmul.f32 %v3848_v38, %v10294_v48 }
 0xad3   :  { %v3853_v6 = vmul.f32 %v3847_v26, %v10296_v41  ;;  %v3854_v45 = vmul.f32 %v3850_v40, %v10297_v22 }
 0xad4   :  { %v3856_v59 = vpop.permute.xlu1 %3855 }
 0xad5   :  { %v3858_v56 = vpop.permute.xlu0 %3857 }
 0xad6   :  { %v3865_v51 = vsel %vm708_vm6, %v3856_v59, %v3858_v56 }
 0xad7   :  { %v3867_v8 = vmul.f32 %v3865_v51, %v10269_v7 }
 0xad8   :  { %v3860_v4 = vpop.permute.xlu1 %3859 }
 0xad9   :  { %v3864_v10 = vsel %vm708_vm6, %v3858_v56, %v3860_v4  ;;  %v3862_v11 = vpop.permute.xlu0 %3861  ;;  %v5253_v44 = vpack.c.bf16 %v3867_v8, %v3851_v61 }
 0xada   :  { %v3868_v29 = vmul.f32 %v3864_v10, %v10295_v32  ;;  %v3863_v2 = vsel %vm708_vm6, %v3860_v4, %v3862_v11  ;;  %v3866_v9 = vsel %vm708_vm6, %v3862_v11, %v3856_v59  ;;  %v3887_v10 = vld [vmem:[%s9591_s17] sm:$0xff] }
 0xadb   :  { %v3869_v54 = vmul.f32 %v3863_v2, %v10274_v24  ;;  %v3870_v31 = vmul.f32 %v3866_v9, %v10275_v3 }
 0xadc   :  { %v3872_v57 = vpop.permute.xlu1 %3871  ;;  %v5251_v39 = vpack.c.bf16 %v3868_v29, %v3852_v35 }
 0xadd   :  { %v5269_v49 = vpack.c.bf16 %v3869_v54, %v3853_v6  ;;  %v3874_v42 = vpop.permute.xlu0 %3873  ;;  %v5267_v18 = vpack.c.bf16 %v3870_v31, %v3854_v45 }
 0xade   :  { %5252 = vmatprep.subr.bf16.mxu0 %v5251_v39  ;;  %v3881_v59 = vsel %vm805_vm7, %v3872_v57, %v3874_v42 }
 0xadf   :  { %5254 = vmatpush1.bf16.msra.mxu0 %v5253_v44  ;;  %5268 = vmatprep.subr.bf16.mxu1 %v5267_v18  ;;  %v3883_v4 = vmul.f32 %v3881_v59, %v10278_v33  ;;  %v4538_v18 = vld [vmem:[%s9593_s22] sm:$0xff] }
 0xae0   :  { %5270 = vmatpush1.bf16.msra.mxu1 %v5269_v49  ;;  %v3876_v56 = vpop.permute.xlu1 %3875 }
 0xae1   :  { %v3880_v21 = vsel %vm805_vm7, %v3874_v42, %v3876_v56  ;;  %v3878_v51 = vpop.permute.xlu0 %3877  ;;  %v4172_v42 = vld [vmem:[%s9592_s20] sm:$0x7] }
 0xae2   :  { %v3884_v38 = vmul.f32 %v3880_v21, %v10298_v13  ;;  %v3879_v26 = vsel %vm805_vm7, %v3876_v56, %v3878_v51  ;;  %v3882_v40 = vsel %vm805_vm7, %v3878_v51, %v3872_v57 }
 0xae3   :  { %v3885_v61 = vmul.f32 %v3879_v26, %v10280_v17  ;;  %v3886_v8 = vmul.f32 %v3882_v40, %v10281_v36 }
 0xae4   :  { %3913 = vmatprep.subr.mxu0 %v3884_v38 }
 0xae5   :  { %3914 = vmatpush1.msra.mxu0 %v3883_v4  ;;  %3984 = vmatprep.subr.mxu1 %v3886_v8 }
 0xae6   :  { %4653 = vmatmul.mubr.msk.f32.vlgmr.msra.gmra.mrb[22].mxu0 %vm885_vm8, %v3887_v10  ;;  %3985 = vmatpush1.msra.mxu1 %v3885_v61 }
 0xae7   :  { %4654 = vmatmul.mubr.msk.f32.vlgmr.msra.gmra.mrb[22].mxu1 %vm885_vm8, %v3887_v10  ;;  %4245 = vmatprep.mubr.f32.mxu0 %v10299_v63 }
 0xae8   :  { %4316 = vmatprep.mubr.f32.mxu1 %v10299_v63 }
 0xaf1   :  { %v3892_v11 = vpop.permute.xlu1 %3891 }
 0xbb9   :  { %v3963_v35 = vpop.f32.mrb[22].mxu0 }
 0xbba   :  { %v3964_v29 = vadd.f32 %v3963_v35, %v3892_v11  ;;  %v3965_v2 = vpop.f32.mrb[23].mxu0  ;;  %v4034_v9 = vpop.f32.mrb[22].mxu1 }
 0xbbb   :  { %v3966_v6 = vadd.f32 %v3965_v2, %v3892_v11  ;;  %v4036_v45 = vpop.f32.mrb[23].mxu1  ;;  %v4035_v31 = vadd.f32 %v4034_v9, %v3892_v11 }
 0xbbc   :  { %v9180_v54 = vmax.f32 %v3964_v29, 0.0  ;;  %v4037_v39 = vadd.f32 %v4036_v45, %v3892_v11 }
 0xbbd   :  { %v9182_v57 = vmax.f32 %v3966_v6, 0.0  ;;  %v9188_v44 = vmax.f32 %v4035_v31, 0.0 }
 0xbbe   :  { %4043 = vrot.lane.b32.xlu0 %v9180_v54, %s5383_s6  ;;  %v9190_v49 = vmax.f32 %v4037_v39, 0.0 }
 0xbbf   :  { %4045 = vrot.lane.b32.xlu1 %v9182_v57, %s5383_s6 }
 0xbc2   :  { %4047 = vrot.lane.b32.xlu0 %v9188_v44, %s5383_s6 }
 0xbc3   :  { %4049 = vrot.lane.b32.xlu1 %v9190_v49, %s5383_s6 }
 0xbc6   :  { %4059 = vrot.lane.b32.xlu0 %v9180_v54, %s5384_s2 }
 0xbc7   :  { %4061 = vrot.lane.b32.xlu1 %v9182_v57, %s5384_s2 }
 0xbca   :  { %4063 = vrot.lane.b32.xlu0 %v9188_v44, %s5384_s2 }
 0xbcb   :  { %4065 = vrot.lane.b32.xlu1 %v9190_v49, %s5384_s2 }
 0xbce   :  { %4075 = vrot.lane.b32.xlu0 %v9180_v54, %s5385_s8 }
 0xbcf   :  { %4077 = vrot.lane.b32.xlu1 %v9182_v57, %s5385_s8 }
 0xbd2   :  { %4079 = vrot.lane.b32.xlu0 %v9188_v44, %s5385_s8 }
 0xbd3   :  { %4081 = vrot.lane.b32.xlu1 %v9190_v49, %s5385_s8 }
 0xbd6   :  { %4091 = vrot.lane.b32.xlu0 %v9180_v54, %s5386_s4 }
 0xbd7   :  { %4093 = vrot.lane.b32.xlu1 %v9182_v57, %s5386_s4 }
 0xbda   :  { %4095 = vrot.lane.b32.xlu0 %v9188_v44, %s5386_s4 }
 0xbdb   :  { %4097 = vrot.lane.b32.xlu1 %v9190_v49, %s5386_s4 }
 0xbde   :  { %4107 = vrot.lane.b32.xlu0 %v9180_v54, %s9982_s5 }
 0xbdf   :  { %4109 = vrot.lane.b32.xlu1 %v9182_v57, %s9982_s5 }
 0xbe2   :  { %4111 = vrot.lane.b32.xlu0 %v9188_v44, %s9982_s5 }
 0xbe3   :  { %4113 = vrot.lane.b32.xlu1 %v9190_v49, %s9982_s5 }
 0xbe6   :  { %4123 = vrot.lane.b32.xlu0 %v9180_v54, %s5388_s9 }
 0xbe7   :  { %4125 = vrot.lane.b32.xlu1 %v9182_v57, %s5388_s9 }
 0xbea   :  { %4127 = vrot.lane.b32.xlu0 %v9188_v44, %s5388_s9 }
 0xbeb   :  { %4129 = vrot.lane.b32.xlu1 %v9190_v49, %s5388_s9 }
 0xbee   :  { %4139 = vrot.lane.b32.xlu0 %v9180_v54, %s9983_s26 }
 0xbef   :  { %4141 = vrot.lane.b32.xlu1 %v9182_v57, %s9983_s26 }
 0xbf2   :  { %4143 = vrot.lane.b32.xlu0 %v9188_v44, %s9983_s26 }
 0xbf3   :  { %4145 = vrot.lane.b32.xlu1 %v9190_v49, %s9983_s26 }
 0xbf6   :  { %4155 = vrot.lane.b32.xlu0 %v9180_v54, %s9981_s27 }
 0xbf7   :  { %4157 = vrot.lane.b32.xlu1 %v9182_v57, %s9981_s27 }
 0xbfa   :  { %4159 = vrot.lane.b32.xlu0 %v9188_v44, %s9981_s27 }
 0xbfb   :  { %4161 = vrot.lane.b32.xlu1 %v9190_v49, %s9981_s27 }
 0xbfe   :  { %4175 = vperm.xlu0 %5379, %v4172_v42  }
 0xbff   :  { %4541 = vperm.xlu1 %5380, %v4538_v18  }
 0xc30   :  { %v4044_v59 = vpop.permute.xlu0 %4043 }
 0xc31   :  { %v4046_v56 = vpop.permute.xlu1 %4045 }
 0xc32   :  { %v4053_v38 = vsel %vm126_vm0, %v4044_v59, %v4046_v56 }
 0xc33   :  { %v4056_v61 = vmul.f32 %v4053_v38, %v10285_v53 }
 0xc34   :  { %v4048_v21 = vpop.permute.xlu0 %4047 }
 0xc35   :  { %v4050_v51 = vpop.permute.xlu1 %4049  ;;  %v4052_v29 = vsel %vm126_vm0, %v4046_v56, %v4048_v21 }
 0xc36   :  { %v4051_v10 = vsel %vm126_vm0, %v4048_v21, %v4050_v51  ;;  %v4054_v11 = vsel %vm126_vm0, %v4050_v51, %v4044_v59  ;;  %v4057_v59 = vmul.f32 %v4052_v29, %v10290_v20 }
 0xc37   :  { %v4055_v31 = vmul.f32 %v4054_v11, %v10287_v25  ;;  %v4058_v39 = vmul.f32 %v4051_v10, %v10288_v14 }
 0xc38   :  { %v4060_v26 = vpop.permute.xlu0 %4059 }
 0xc39   :  { %v4062_v40 = vpop.permute.xlu1 %4061 }
 0xc3a   :  { %v4069_v4 = vsel %vm223_vm1, %v4060_v26, %v4062_v40 }
 0xc3b   :  { %v4072_v8 = vmul.f32 %v4069_v4, %v10286_v12 }
 0xc3c   :  { %v4064_v35 = vpop.permute.xlu0 %4063 }
 0xc3d   :  { %v4068_v2 = vsel %vm223_vm1, %v4062_v40, %v4064_v35  ;;  %v4066_v9 = vpop.permute.xlu1 %4065  ;;  %v5271_v6 = vpack.c.bf16 %v4072_v8, %v4056_v61 }
 0xc3e   :  { %v4073_v45 = vmul.f32 %v4068_v2, %v10250_v46  ;;  %v4067_v53 = vsel %vm223_vm1, %v4064_v35, %v4066_v9  ;;  %v4070_v12 = vsel %vm223_vm1, %v4066_v9, %v4060_v26 }
 0xc3f   :  { %v4071_v42 = vmul.f32 %v4070_v12, %v10252_v28  ;;  %v4074_v18 = vmul.f32 %v4067_v53, %v10289_v47  ;;  %5272 = vmatprep.subr.bf16.mxu0 %v5271_v6 }
 0xc40   :  { %v4076_v56 = vpop.permute.xlu0 %4075  ;;  %v5289_v38 = vpack.c.bf16 %v4073_v45, %v4057_v59 }
 0xc41   :  { %v5273_v21 = vpack.c.bf16 %v4071_v42, %v4055_v31  ;;  %v4078_v46 = vpop.permute.xlu1 %4077  ;;  %v5287_v51 = vpack.c.bf16 %v4074_v18, %v4058_v39 }
 0xc42   :  { %v4085_v25 = vsel %vm320_vm2, %v4076_v56, %v4078_v46 }
 0xc43   :  { %5274 = vmatpush1.bf16.msra.mxu0 %v5273_v21  ;;  %5288 = vmatprep.subr.bf16.mxu1 %v5287_v51  ;;  %v4088_v20 = vmul.f32 %v4085_v25, %v10255_v34 }
 0xc44   :  { %5290 = vmatpush1.bf16.msra.mxu1 %v5289_v38  ;;  %v4080_v26 = vpop.permute.xlu0 %4079 }
 0xc45   :  { %v4082_v40 = vpop.permute.xlu1 %4081  ;;  %v4084_v11 = vsel %vm320_vm2, %v4078_v46, %v4080_v26 }
 0xc46   :  { %v4083_v61 = vsel %vm320_vm2, %v4080_v26, %v4082_v40  ;;  %v4086_v8 = vsel %vm320_vm2, %v4082_v40, %v4076_v56  ;;  %v4089_v31 = vmul.f32 %v4084_v11, %v10262_v23 }
 0xc47   :  { %v4087_v6 = vmul.f32 %v4086_v8, %v10258_v5  ;;  %v4090_v45 = vmul.f32 %v4083_v61, %v10291_v58 }
 0xc48   :  { %v4092_v14 = vpop.permute.xlu0 %4091 }
 0xc49   :  { %v4094_v28 = vpop.permute.xlu1 %4093 }
 0xc4a   :  { %v4101_v47 = vsel %vm417_vm3, %v4092_v14, %v4094_v28 }
 0xc4b   :  { %v4104_v4 = vmul.f32 %v4101_v47, %v10256_v55 }
 0xc4c   :  { %v4096_v10 = vpop.permute.xlu0 %4095 }
 0xc4d   :  { %v4100_v35 = vsel %vm417_vm3, %v4094_v28, %v4096_v10  ;;  %v4098_v29 = vpop.permute.xlu1 %4097  ;;  %v5275_v2 = vpack.c.bf16 %v4104_v4, %v4088_v20 }
 0xc4e   :  { %v4105_v9 = vmul.f32 %v4100_v35, %v10257_v27  ;;  %v4099_v34 = vsel %vm417_vm3, %v4096_v10, %v4098_v29  ;;  %v4102_v55 = vsel %vm417_vm3, %v4098_v29, %v4092_v14 }
 0xc4f   :  { %v4103_v53 = vmul.f32 %v4102_v55, %v10260_v30  ;;  %v4106_v12 = vmul.f32 %v4099_v34, %v10261_v16  ;;  %5276 = vmatprep.subr.bf16.mxu0 %v5275_v2 }
 0xc50   :  { %v4108_v39 = vpop.permute.xlu0 %4107  ;;  %v5293_v59 = vpack.c.bf16 %v4105_v9, %v4089_v31 }
 0xc51   :  { %v5277_v42 = vpack.c.bf16 %v4103_v53, %v4087_v6  ;;  %v4110_v27 = vpop.permute.xlu1 %4109  ;;  %v5291_v18 = vpack.c.bf16 %v4106_v12, %v4090_v45 }
 0xc52   :  { %v4117_v56 = vsel %vm514_vm4, %v4108_v39, %v4110_v27 }
 0xc53   :  { %5278 = vmatpush1.bf16.msra.mxu0 %v5277_v42  ;;  %5292 = vmatprep.subr.bf16.mxu1 %v5291_v18  ;;  %v4119_v58 = vmul.f32 %v4117_v56, %v10263_v62  ;;  %v4171_v42 = vld [vmem:[%s9595_s19] sm:$0x7]  ;;  %v4334_v18 = vld [vmem:[%s9594_s3 + $0x8] sm:$0xff] }
 0xc54   :  { %5294 = vmatpush1.bf16.msra.mxu1 %v5293_v59  ;;  %v4112_v5 = vpop.permute.xlu0 %4111 }
 0xc55   :  { %v4116_v30 = vsel %vm514_vm4, %v4110_v27, %v4112_v5  ;;  %v4114_v16 = vpop.permute.xlu1 %4113  ;;  %v5281_v62 = vpack.c.bf16 %v4119_v58, %v9180_v54  ;;  %v4333_v27 = vld [vmem:[%s9594_s3] sm:$0xff] }
 0xc56   :  { %v4120_v23 = vmul.f32 %v4116_v30, %v10264_v19  ;;  %v4115_v21 = vsel %vm514_vm4, %v4112_v5, %v4114_v16  ;;  %v4118_v46 = vsel %vm514_vm4, %v4114_v16, %v4108_v39  ;;  %v4381_v58 = vld [vmem:[%s9594_s3 + $0x180] sm:$0xff]  ;;  %v4382_v30 = vld [vmem:[%s9594_s3 + $0x188] sm:$0xff] }
 0xc57   :  { %v4121_v51 = vmul.f32 %v4115_v21, %v10265_v60  ;;  %v4122_v38 = vmul.f32 %v4118_v46, %v10292_v52  ;;  %v4365_v16 = vld [vmem:[%s9594_s3 + $0x100] sm:$0xff]  ;;  %v4366_v46 = vld [vmem:[%s9594_s3 + $0x108] sm:$0xff] }
 0xc58   :  { %v4124_v26 = vpop.permute.xlu0 %4123  ;;  %v5279_v40 = vpack.c.bf16 %v4120_v23, %v9182_v57 }
 0xc59   :  { %v5297_v25 = vpack.c.bf16 %v4121_v51, %v9188_v44  ;;  %v4126_v14 = vpop.permute.xlu1 %4125  ;;  %v5295_v19 = vpack.c.bf16 %v4122_v38, %v9190_v49  ;;  %v4351_v51 = vld [vmem:[%s9594_s3 + $0x90] sm:$0xff]  ;;  %v4352_v38 = vld [vmem:[%s9594_s3 + $0x98] sm:$0xff] }
 0xc5a   :  { %5280 = vmatprep.subr.bf16.mxu0 %v5279_v40  ;;  %v4133_v52 = vsel %vm611_vm5, %v4124_v26, %v4126_v14  ;;  %v4335_v40 = vld [vmem:[%s9594_s3 + $0x10] sm:$0xff] }
 0xc5b   :  { %5282 = vmatpush1.bf16.msra.mxu0 %v5281_v62  ;;  %5296 = vmatprep.subr.bf16.mxu1 %v5295_v19  ;;  %v4135_v61 = vmul.f32 %v4133_v52, %v10293_v43  ;;  %v4336_v62 = vld [vmem:[%s9594_s3 + $0x18] sm:$0xff]  ;;  %v4353_v19 = vld [vmem:[%s9594_s3 + $0xa0] sm:$0xff] }
 0xc5c   :  { %5298 = vmatpush1.bf16.msra.mxu1 %v5297_v25  ;;  %v4128_v28 = vpop.permute.xlu0 %4127  ;;  %v5337_v25 = vpack.c.bf16 %v4366_v46, %v4365_v16  ;;  %v5309_v52 = vpack.c.bf16 %v4336_v62, %v4335_v40  ;;  %v4343_v16 = vld [vmem:[%s9594_s3 + $0x50] sm:$0xff]  ;;  %v4345_v40 = vld [vmem:[%s9594_s3 + $0x60] sm:$0xff]  ;;  %v4346_v62 = vld [vmem:[%s9594_s3 + $0x68] sm:$0xff] }
 0xc5d   :  { %v4130_v47 = vpop.permute.xlu1 %4129  ;;  %v4132_v54 = vsel %vm611_vm5, %v4126_v14, %v4128_v28  ;;  %v5307_v14 = vpack.c.bf16 %v4352_v38, %v4351_v51  ;;  %v4375_v51 = vld [vmem:[%s9594_s3 + $0x150] sm:$0xff]  ;;  %v4376_v38 = vld [vmem:[%s9594_s3 + $0x158] sm:$0xff] }
 0xc5e   :  { %v4131_v44 = vsel %vm611_vm5, %v4128_v28, %v4130_v47  ;;  %v4134_v49 = vsel %vm611_vm5, %v4130_v47, %v4124_v26  ;;  %v4136_v35 = vmul.f32 %v4132_v54, %v10294_v48  ;;  %v5305_v26 = vpack.c.bf16 %v4334_v18, %v4333_v27  ;;  %v4354_v28 = vld [vmem:[%s9594_s3 + $0xa8] sm:$0xff]  ;;  %v4373_v18 = vld [vmem:[%s9594_s3 + $0x140] sm:$0xff] }
 0xc5f   :  { %v4137_v34 = vmul.f32 %v4131_v44, %v10296_v41  ;;  %v4138_v43 = vmul.f32 %v4134_v49, %v10297_v22  ;;  %v4386_v54 = vld [vmem:[%s9594_s3 + $0x1a8] sm:$0xff]  ;;  %v5311_v44 = vpack.c.bf16 %v4354_v28, %v4353_v19  ;;  %v4337_v49 = vld [vmem:[%s9594_s3 + $0x20] sm:$0xff]  ;;  %v4364_v19 = vld [vmem:[%s9594_s3 + $0xf8] sm:$0xff] }
 0xc60   :  { %v4140_v20 = vpop.permute.xlu0 %4139 }
 0xc61   :  { %v4142_v60 = vpop.permute.xlu1 %4141 }
 0xc62   :  { %v4149_v57 = vsel %vm708_vm6, %v4140_v20, %v4142_v60 }
 0xc63   :  { %v4151_v8 = vmul.f32 %v4149_v57, %v10269_v7  ;;  %v4385_v57 = vld [vmem:[%s9594_s3 + $0x1a0] sm:$0xff] }
 0xc64   :  { %v4144_v4 = vpop.permute.xlu0 %4143 }
 0xc65   :  { %v4148_v10 = vsel %vm708_vm6, %v4142_v60, %v4144_v4  ;;  %v4146_v11 = vpop.permute.xlu1 %4145  ;;  %v5285_v53 = vpack.c.bf16 %v4151_v8, %v4135_v61  ;;  %v4368_v60 = vld [vmem:[%s9594_s3 + $0x118] sm:$0xff]  ;;  %v4355_v61 = vld [vmem:[%s9594_s3 + $0xb0] sm:$0xff]  ;;  %v5343_v8 = vpack.c.bf16 %v4386_v54, %v4385_v57 }
 0xc66   :  { %v4152_v29 = vmul.f32 %v4148_v10, %v10295_v32  ;;  %v4147_v2 = vsel %vm708_vm6, %v4144_v4, %v4146_v11  ;;  %v4150_v9 = vsel %vm708_vm6, %v4146_v11, %v4140_v20  ;;  %v4367_v20 = vld [vmem:[%s9594_s3 + $0x110] sm:$0xff]  ;;  %v4369_v10 = vld [vmem:[%s9594_s3 + $0x120] sm:$0xff]  ;;  %v4370_v11 = vld [vmem:[%s9594_s3 + $0x128] sm:$0xff] }
 0xc67   :  { %v4153_v7 = vmul.f32 %v4147_v2, %v10274_v24  ;;  %v4154_v55 = vmul.f32 %v4150_v9, %v10275_v3  ;;  %v4349_v24 = vld [vmem:[%s9594_s3 + $0x80] sm:$0xff]  ;;  %v4350_v3 = vld [vmem:[%s9594_s3 + $0x88] sm:$0xff]  ;;  %v5341_v4 = vpack.c.bf16 %v4368_v60, %v4367_v20  ;;  %v4388_v2 = vld [vmem:[%s9594_s3 + $0x1b8] sm:$0xff]  ;;  %v5329_v60 = vpack.c.bf16 %v4346_v62, %v4345_v40 }
 0xc68   :  { %v4156_v6 = vpop.permute.xlu0 %4155  ;;  %v5283_v45 = vpack.c.bf16 %v4152_v29, %v4136_v35  ;;  %v5303_v15 = vpack.c.bf16 %v4350_v3, %v4349_v24  ;;  %v4387_v29 = vld [vmem:[%s9594_s3 + $0x1b0] sm:$0xff]  ;;  %v4341_v24 = vld [vmem:[%s9594_s3 + $0x40] sm:$0xff]  ;;  %v4342_v3 = vld [vmem:[%s9594_s3 + $0x48] sm:$0xff] }
 0xc69   :  { %v5301_v48 = vpack.c.bf16 %v4153_v7, %v4137_v34  ;;  %v4158_v12 = vpop.permute.xlu1 %4157  ;;  %v5299_v32 = vpack.c.bf16 %v4154_v55, %v4138_v43  ;;  %v4339_v34 = vld [vmem:[%s9594_s3 + $0x30] sm:$0xff]  ;;  %v4340_v43 = vld [vmem:[%s9594_s3 + $0x38] sm:$0xff]  ;;  %v5345_v7 = vpack.c.bf16 %v4370_v11, %v4369_v10  ;;  %v4357_v55 = vld [vmem:[%s9594_s3 + $0xc0] sm:$0xff] }
 0xc6a   :  { %5284 = vmatprep.subr.bf16.mxu0 %v5283_v45  ;;  %v4165_v31 = vsel %vm805_vm7, %v4156_v6, %v4158_v12  ;;  %v5347_v45 = vpack.c.bf16 %v4388_v2, %v4387_v29  ;;  %v4378_v20 = vld [vmem:[%s9594_s3 + $0x168] sm:$0xff]  ;;  %v4396_v57 = vld [vmem:[%s9594_s3 + $0x1f8] sm:$0xff] }
 0xc6b   :  { %5286 = vmatpush1.bf16.msra.mxu0 %v5285_v53  ;;  %5300 = vmatprep.subr.bf16.mxu1 %v5299_v32  ;;  %v4371_v53 = vld [vmem:[%s9594_s3 + $0x130] sm:$0xff]  ;;  %v4389_v32 = vld [vmem:[%s9594_s3 + $0x1c0] sm:$0xff] }
 0xc6c   :  { %5302 = vmatpush1.bf16.msra.mxu1 %v5301_v48  ;;  %v4160_v41 = vpop.permute.xlu0 %4159  ;;  %v4372_v48 = vld [vmem:[%s9594_s3 + $0x138] sm:$0xff] }
 0xc6d   :  { %v4164_v22 = vsel %vm805_vm7, %v4158_v12, %v4160_v41  ;;  %v4162_v39 = vpop.permute.xlu1 %4161  ;;  %v5317_v12 = vpack.c.bf16 %v4340_v43, %v4339_v34 }
 0xc6e   :  { %v4168_v59 = vmul.f32 %v4164_v22, %v10298_v13  ;;  %v4163_v56 = vsel %vm805_vm7, %v4160_v41, %v4162_v39  ;;  %v4166_v5 = vsel %vm805_vm7, %v4162_v39, %v4156_v6  ;;  %v4167_v13 = vmul.f32 %v4165_v31, %v10278_v33  ;;  %v4358_v6 = vld [vmem:[%s9594_s3 + $0xc8] sm:$0xff]  ;;  %v4359_v39 = vld [vmem:[%s9594_s3 + $0xd0] sm:$0xff] }
 0xc6f   :  { %v4169_v23 = vmul.f32 %v4163_v56, %v10280_v17  ;;  %v4170_v21 = vmul.f32 %v4166_v5, %v10281_v36  ;;  %v4383_v17 = vld [vmem:[%s9594_s3 + $0x190] sm:$0xff]  ;;  %v4384_v36 = vld [vmem:[%s9594_s3 + $0x198] sm:$0xff]  ;;  %v5335_v33 = vpack.c.bf16 %v4382_v30, %v4381_v58  ;;  %v4390_v31 = vld [vmem:[%s9594_s3 + $0x1c8] sm:$0xff]  ;;  %v5319_v41 = vpack.c.bf16 %v4358_v6, %v4357_v55 }
 0xc70   :  { %4197 = vmatprep.subr.mxu0 %v4168_v59  ;;  %v5339_v47 = vpack.c.bf16 %v4384_v36, %v4383_v17  ;;  %v5349_v22 = vpack.c.bf16 %v4372_v48, %v4371_v53  ;;  %v5351_v27 = vpack.c.bf16 %v4390_v31, %v4389_v32  ;;  %v4374_v59 = vld [vmem:[%s9594_s3 + $0x148] sm:$0xff]  ;;  %v5321_v56 = vpack.c.bf16 %v4342_v3, %v4341_v24  ;;  %v4391_v5 = vld [vmem:[%s9594_s3 + $0x1d0] sm:$0xff]  ;;  %v4392_v58 = vld [vmem:[%s9594_s3 + $0x1d8] sm:$0xff] }
 0xc71   :  { %4198 = vmatpush1.msra.mxu0 %v4167_v13  ;;  %4268 = vmatprep.subr.mxu1 %v4170_v21  ;;  %v4344_v13 = vld [vmem:[%s9594_s3 + $0x58] sm:$0xff]  ;;  %v4361_v21 = vld [vmem:[%s9594_s3 + $0xe0] sm:$0xff]  ;;  %v5355_v46 = vpack.c.bf16 %v4392_v58, %v4391_v5  ;;  %v4394_v36 = vld [vmem:[%s9594_s3 + $0x1e8] sm:$0xff] }
 0xc72   :  { %4655 = vmatmul.mubr.msk.f32.vlgmr.msra.gmra.mrb[24].mxu0 %vm885_vm8, %v4171_v42  ;;  %4269 = vmatpush1.msra.mxu1 %v4169_v23  ;;  %v5353_v23 = vpack.c.bf16 %v4374_v59, %v4373_v18  ;;  %v4393_v17 = vld [vmem:[%s9594_s3 + $0x1e0] sm:$0xff] }
 0xc73   :  { %5304 = vmatprep.subr.bf16.mxu0 %v5303_v15  ;;  %4656 = vmatmul.mubr.msk.f32.vlgmr.msra.gmra.mrb[24].mxu1 %vm885_vm8, %v4171_v42  ;;  %v4360_v42 = vld [vmem:[%s9594_s3 + $0xd8] sm:$0xff]  ;;  %v4362_v15 = vld [vmem:[%s9594_s3 + $0xe8] sm:$0xff]  ;;  %v5359_v28 = vpack.c.bf16 %v4394_v36, %v4393_v17  ;;  %v4537_v31 = vld [vmem:[%s9597_s21] sm:$0xff] }
 0xc74   :  { %5306 = vmatpush3.bf16.msra.mxu0 %v5305_v26  ;;  %4461 = vmatprep.mubr.f32.mxu0 %v9000_v50  ;;  %v4338_v50 = vld [vmem:[%s9594_s3 + $0x28] sm:$0xff]  ;;  %v5323_v30 = vpack.c.bf16 %v4360_v42, %v4359_v39  ;;  %v5325_v26 = vpack.c.bf16 %v4344_v13, %v4343_v16 }
 0xc75   :  { %5336 = vmatprep.subr.bf16.mxu1 %v5335_v33  ;;  %4531 = vmatprep.mubr.f32.mxu1 %v9008_v0  ;;  %v4356_v0 = vld [vmem:[%s9594_s3 + $0xb8] sm:$0xff]  ;;  %v5313_v35 = vpack.c.bf16 %v4338_v50, %v4337_v49  ;;  %v5327_v33 = vpack.c.bf16 %v4362_v15, %v4361_v21 }
 0xc76   :  { %5338 = vmatpush3.bf16.msra.mxu1 %v5337_v25  ;;  %5308 = vmatprep.subr.bf16.mxu0 %v5307_v14  ;;  %v5315_v9 = vpack.c.bf16 %v4356_v0, %v4355_v61  ;;  %v5357_v25 = vpack.c.bf16 %v4376_v38, %v4375_v51  ;;  %v4363_v14 = vld [vmem:[%s9594_s3 + $0xf0] sm:$0xff]  ;;  %v4348_v49 = vld [vmem:[%s9594_s3 + $0x78] sm:$0xff] }
 0xc77   :  { %5340 = vmatprep.subr.bf16.mxu1 %v5339_v47  ;;  %v4377_v47 = vld [vmem:[%s9594_s3 + $0x160] sm:$0xff]  ;;  %v5331_v54 = vpack.c.bf16 %v4364_v19, %v4363_v14  ;;  %v4379_v61 = vld [vmem:[%s9594_s3 + $0x170] sm:$0xff]  ;;  %v4380_v0 = vld [vmem:[%s9594_s3 + $0x178] sm:$0xff] }
 0xc78   :  { %5310 = vmatpush3.bf16.msra.mxu0 %v5309_v52  ;;  %v4395_v52 = vld [vmem:[%s9594_s3 + $0x1f0] sm:$0xff]  ;;  %v5361_v50 = vpack.c.bf16 %v4378_v20, %v4377_v47  ;;  %v5365_v10 = vpack.c.bf16 %v4380_v0, %v4379_v61 }
 0xc79   :  { %5312 = vmatprep.subr.bf16.mxu0 %v5311_v44  ;;  %v4347_v44 = vld [vmem:[%s9594_s3 + $0x70] sm:$0xff] }
 0xc7a   :  { %5342 = vmatpush3.bf16.msra.mxu1 %v5341_v4  ;;  %v5363_v4 = vpack.c.bf16 %v4396_v57, %v4395_v52 }
 0xc7b   :  { %5344 = vmatprep.subr.bf16.mxu1 %v5343_v8  ;;  %v5333_v8 = vpack.c.bf16 %v4348_v49, %v4347_v44 }
 0xc7c   :  { %5314 = vmatpush3.bf16.msra.mxu0 %v5313_v35 }
 0xc7d   :  { %5316 = vmatprep.subr.bf16.mxu0 %v5315_v9  ;;  %v4176_v11 = vpop.permute.xlu0 %4175 }
 0xc7e   :  { %5346 = vmatpush3.bf16.msra.mxu1 %v5345_v7 }
 0xc7f   :  { %5348 = vmatprep.subr.bf16.mxu1 %v5347_v45 }
 0xc80   :  { %5318 = vmatpush3.bf16.msra.mxu0 %v5317_v12 }
 0xc81   :  { %5320 = vmatprep.subr.bf16.mxu0 %v5319_v41  ;;  %v4542_v41 = vpop.permute.xlu1 %4541 }
 0xc82   :  { %5350 = vmatpush3.bf16.msra.mxu1 %v5349_v22 }
 0xc83   :  { %5352 = vmatprep.subr.bf16.mxu1 %v5351_v27 }
 0xc84   :  { %5322 = vmatpush3.bf16.msra.mxu0 %v5321_v56 }
 0xc85   :  { %5324 = vmatprep.subr.bf16.mxu0 %v5323_v30 }
 0xc86   :  { %5354 = vmatpush3.bf16.msra.mxu1 %v5353_v23 }
 0xc87   :  { %5356 = vmatprep.subr.bf16.mxu1 %v5355_v46 }
 0xc88   :  { %5326 = vmatpush3.bf16.msra.mxu0 %v5325_v26 }
 0xc89   :  { %5328 = vmatprep.subr.bf16.mxu0 %v5327_v33 }
 0xc8a   :  { %5358 = vmatpush3.bf16.msra.mxu1 %v5357_v25 }
 0xc8b   :  { %5360 = vmatprep.subr.bf16.mxu1 %v5359_v28 }
 0xc8c   :  { %5330 = vmatpush3.bf16.msra.mxu0 %v5329_v60 }
 0xc8d   :  { %5332 = vmatprep.subr.bf16.mxu0 %v5331_v54 }
 0xc8e   :  { %5362 = vmatpush3.bf16.msra.mxu1 %v5361_v50 }
 0xc8f   :  { %5364 = vmatprep.subr.bf16.mxu1 %v5363_v4 }
 0xc90   :  { %5334 = vmatpush3.bf16.msra.mxu0 %v5333_v8 }
 0xc91   :  { %4730 = vmatprep.subr.mxu0 %v10299_v63 }
 0xc92   :  { %5366 = vmatpush3.bf16.msra.mxu1 %v5365_v10 }
 0xc93   :  { %4462 = vmatmul.mubr.f32.vlgmr.msra.gmra.mrb[26].mxu0 %v8998_v1 }
 0xc94   :  { %4732 = vmatprep.mubr.msk.f32.mxu0 %vm5394_vm13, %v10299_v63 }
 0xc95   :  { %4532 = vmatmul.mubr.f32.vlgmr.msra.gmra.mrb[26].mxu1 %v9006_v37 }
 0xd45   :  { %v4247_v35 = vpop.f32.mrb[24].mxu0 }
 0xd46   :  { %v4248_v29 = vadd.f32 %v4247_v35, %v4176_v11  ;;  %v4249_v2 = vpop.f32.mrb[25].mxu0  ;;  %v4318_v9 = vpop.f32.mrb[24].mxu1 }
 0xd47   :  { %v4250_v34 = vadd.f32 %v4249_v2, %v4176_v11  ;;  %v4319_v43 = vadd.f32 %v4318_v9, %v4176_v11  ;;  %v4320_v7 = vpop.f32.mrb[25].mxu1 }
 0xd48   :  { %v4321_v55 = vadd.f32 %v4320_v7, %v4176_v11 }
 0xd49   :  { %v4327_v6 = vcombine.low %v4248_v29, %v4250_v34 }
 0xd4a   :  { %v4328_v45 = vcombine.low %v4319_v43, %v4321_v55 }
 0xd4b   :  { %4331 = vst [vmem:[%s9596_s23] sm:$0x77] %v4327_v6 }
 0xd4c   :  { %4332 = vst [vmem:[%s9596_s23 + $0x8] sm:$0x77] %v4328_v45 }
 0xd66   :  { %v4690_v63 = vpop.f32.mrb[26].mxu0 }
 0xd67   :  { %v4691_v1 = vpop.f32.mrb[27].mxu0 }
 0xd68   :  { %v4692_v37 = vadd.f32 %v4691_v1, %v4690_v63  ;;  %v4725_v53 = vpop.f32.mrb[26].mxu1 }
 0xd69   :  { %v4726_v48 = vpop.f32.mrb[27].mxu1 }
 0xd6a   :  { %v4727_v12 = vadd.f32 %v4726_v48, %v4725_v53 }
 0xd6c   :  { %v4534_v32 = vadd.f32 %v4727_v12, %v4692_v37 }
 0xd6e   :  { %4731 = vmatpush3.msra.mxu0 %v4534_v32 }
 0xd6f   :  { %4733 = vmatmul.mubr.msk.f32.vlgmr.msra.gmra.mrb[28].mxu0 %vm4544_vm14, %v4537_v31 }
 0xe42   :  { %v4614_v24 = vpop.f32.mrb[28].mxu0 }
 0xe43   :  { %v4615_v3 = vadd.f32 %v4614_v24, %v4542_v41  ;;  %v4734_v22 = vpop.f32.mrb[29].mxu0 }
 0xe45   :  { %4618 = vst.msk [vmem:[%s9598_s24] sm:$0xff] %vm2721_vm11, %v4615_v3 }

</bundles_post_ra>
